<compile_context>
chip_gen: v6e
topology: v6e:2x2x1
jax: 0.10.0
libtpu: 0.0.40
codegen_flags: <defaults>
</compile_context>

<pallas_src>
import numpy as np
import jax
import jax.numpy as jnp
from jax.experimental import pallas as pl
from jax.experimental.pallas import tpu as pltpu


# ----------------------------- fused stem kernel -----------------------------
def _stem_kernel(x_ref, *refs):
    """Whole stem for one image (one grid step).

    x_ref : (1, H0, W0*C0)  bf16 input slab in (H, W*C) layout.
    refs  : for each layer (E_ref, G_ref, b_ref), then o_ref.
        E_ref : (kh, Hout, Hin)          f32  0/1 row-selection per kernel-row tap
        G_ref : (kh, Win*Cin, Wout*Cout) bf16 width taps + W-stride + BN folded
        b_ref : (1, Wout*Cout)           f32  conv bias + BN shift (tiled over W)
    o_ref : (1, Hf, Wf*Cf) f32 lane-dense output slab.
    """
    o_ref = refs[-1]
    layer_refs = refs[:-1]
    n_layers = len(layer_refs) // 3

    act = x_ref[0]                                      # (H0, W0*C0) bf16
    for l in range(n_layers):                           # static Python unroll
        e_ref, g_ref, b_ref = layer_refs[3 * l:3 * l + 3]
        kh = e_ref.shape[0]
        a_bf = act.astype(jnp.bfloat16)                 # one cast per layer
        z = b_ref[...]                                  # (1, Lout) f32
        for i in range(kh):                             # kh is static -> unrolled
            # width taps / W-stride / BN scale are all folded into G_i
            y = jnp.dot(a_bf, g_ref[i],
                        preferred_element_type=jnp.float32)       # (Hin, Lout)
            # H-stride / H-padding row selection for kernel-row tap i
            z = z + jnp.dot(e_ref[i], y,
                            preferred_element_type=jnp.float32)   # (Hout, Lout)
        act = jnp.maximum(z, 0.0)                       # fused bias + ReLU, f32
    o_ref[0] = act.astype(o_ref.dtype)                  # single lane-dense store


# --------------------------- static shape bookkeeping -------------------------
def _layer_out_hw(hin, win, layer):
    kh, kw = layer["kernel"]
    sh, sw = layer["stride"]
    ph, pw = layer["padding"]
    return (hin + 2 * ph - kh) // sh + 1, (win + 2 * pw - kw) // sw + 1


def _const_index_map(ndim):
    def index_map(b):
        return (0,) * ndim
    return index_map


def make_stem_forward(cfg, input_shape):
    """Build the jitted forward(packed_params, x_nchw) for a fixed cfg/shape."""
    B, C0, H0, W0 = input_shape

    dims = []                                   # (Hin, Win, Cin, Hout, Wout, Cout)
    hin, win = H0, W0
    for layer in cfg:
        hout, wout = _layer_out_hw(hin, win, layer)
        dims.append((hin, win, layer["cin"], hout, wout, layer["cout"]))
        hin, win = hout, wout
    Hf, Wf, Cf = hin, win, cfg[-1]["cout"]

    in_specs = [pl.BlockSpec((1, H0, W0 * C0), lambda b: (b, 0, 0))]
    for (hi, wi, ci, ho, wo, co), layer in zip(dims, cfg):
        kh = layer["kernel"][0]
        in_specs.append(pl.BlockSpec((kh, ho, hi), _const_index_map(3)))        # E
        in_specs.append(pl.BlockSpec((kh, wi * ci, wo * co), _const_index_map(3)))  # G
        in_specs.append(pl.BlockSpec((1, wo * co), _const_index_map(2)))        # bias
    out_spec = pl.BlockSpec((1, Hf, Wf * Cf), lambda b: (b, 0, 0))

    call = pl.pallas_call(
        _stem_kernel,
        out_shape=jax.ShapeDtypeStruct((B, Hf, Wf * Cf), jnp.float32),
        grid_spec=pltpu.PrefetchScalarGridSpec(
            num_scalar_prefetch=0,
            grid=(B,),
            in_specs=in_specs,
            out_specs=out_spec),
        compiler_params=pltpu.CompilerParams(
            dimension_semantics=("parallel",)),     # B=2 -> one image per TC on v7x
    )

    @jax.jit
    def forward(packed, x_nchw):
        # NCHW -> (B, H, W*C) bf16, once: the only input-side XLA glue.
        x = jnp.transpose(x_nchw, (0, 2, 3, 1)).reshape(B, H0, W0 * C0)
        x = x.astype(jnp.bfloat16)
        flat = [x]
        for p in packed:
            flat += [p["E"], p["G"], p["b"]]
        out = call(*flat)                                    # (B, Hf, Wf*Cf) f32
        # (B, Hf, Wf*Cf) -> NCHW, once: the only output-side XLA glue.
        return jnp.transpose(out.reshape(B, Hf, Wf, Cf), (0, 3, 1, 2))

    return forward


# ------------------------------ parameter setup -------------------------------
def init_stem_params(key, cfg):
    """PyTorch-like init: Conv2d uniform(+-1/sqrt(fan_in)), BatchNorm defaults."""
    params = []
    for layer in cfg:
        key, kw_, kb_ = jax.random.split(key, 3)
        kh, kw = layer["kernel"]
        cin, cout = layer["cin"], layer["cout"]
        bound = 1.0 / np.sqrt(cin * kh * kw)
        params.append(dict(
            w=jax.random.uniform(kw_, (cout, cin, kh, kw), jnp.float32,
                                 -bound, bound),
            b=jax.random.uniform(kb_, (cout,), jnp.float32, -bound, bound),
            gamma=jnp.ones((cout,), jnp.float32),
            beta=jnp.zeros((cout,), jnp.float32),
            running_mean=jnp.zeros((cout,), jnp.float32),
            running_var=jnp.ones((cout,), jnp.float32),
        ))
    return params, key


def fold_stem_params(raw_params, cfg, input_shape, eps=1e-5):
    """Fold eval-mode BN into the conv and rewrite each layer in the
    row-selection (E) + width-folded (G) matmul form used by the fused kernel.
    Done once, on host, at load time.  Also returns f32 folded (w, b) per layer
    (with the same bf16 rounding of w) for the plain-JAX reference."""
    _, C0, H0, W0 = input_shape
    hin, win = H0, W0
    packed, ref_layers = [], []
    for p, layer in zip(raw_params, cfg):
        kh, kw = layer["kernel"]
        sh, sw = layer["stride"]
        ph, pw = layer["padding"]
        cin, cout = layer["cin"], layer["cout"]
        hout, wout = _layer_out_hw(hin, win, layer)

        # --- fold eval-mode BatchNorm into the conv ---
        s = np.asarray(p["gamma"]) / np.sqrt(np.asarray(p["running_var"]) + eps)
        w = np.asarray(p["w"]) * s[:, None, None, None]            # (Cout,Cin,kh,kw)
        b = (np.asarray(p["b"]) * s
             + (np.asarray(p["beta"]) - np.asarray(p["running_mean"]) * s))
        # bf16-round the folded weights once (this is what the kernel uses)
        w = np.asarray(jnp.asarray(w).astype(jnp.bfloat16).astype(jnp.float32))
        w_eff = np.transpose(w, (2, 3, 1, 0))                      # (kh,kw,Cin,Cout)

        # --- G: width taps + W-stride/padding selection, (H,W*C) layout ---
        G = np.zeros((kh, win * cin, wout * cout), np.float32)
        for i in range(kh):
            for wo_ in range(wout):
                for j in range(kw):
                    wc = sw * wo_ + j - pw
                    if 0 <= wc < win:
                        G[i, wc * cin:(wc + 1) * cin,
                          wo_ * cout:(wo_ + 1) * cout] += w_eff[i, j]

        # --- E: H-stride/padding 0/1 row-selection per kernel-row tap ---
        E = np.zeros((kh, hout, hin), np.float32)
        for i in range(kh):
            for ho_ in range(hout):
                hr = sh * ho_ + i - ph
                if 0 <= hr < hin:
                    E[i, ho_, hr] = 1.0

        bias_t = np.tile(b.astype(np.float32), wout).reshape(1, wout * cout)

        packed.append(dict(E=jnp.asarray(E, jnp.float32),
                           G=jnp.asarray(G, jnp.bfloat16),
                           b=jnp.asarray(bias_t, jnp.float32)))
        ref_layers.append((jnp.asarray(w, jnp.float32),
                           jnp.asarray(b, jnp.float32)))
        hin, win = hout, wout
    return packed, ref_layers


# ------------------------------ plain-JAX reference ---------------------------
def ref_forward(x_nchw, ref_layers, cfg):
    x = x_nchw.astype(jnp.bfloat16).astype(jnp.float32)   # same input rounding
    for (w, b), layer in zip(ref_layers, cfg):
        ph, pw = layer["padding"]
        x = jax.lax.conv_general_dilated(
            x, w, window_strides=layer["stride"],
            padding=[(ph, ph), (pw, pw)],
            dimension_numbers=("NCHW", "OIHW", "NCHW"))
        x = jnp.maximum(x + b[None, :, None, None], 0.0)
    return x


# ----------------------------------- main -------------------------------------
if __name__ == "__main__":
    # NFNet "slow" stem configuration (mono spectrogram input: B, 1, freq, time)
    cfg = [
        dict(cin=1,  cout=16,  kernel=(3, 1), stride=(2, 8), padding=(1, 0)),
        dict(cin=16, cout=32,  kernel=(3, 1), stride=(1, 1), padding=(1, 0)),
        dict(cin=32, cout=64,  kernel=(3, 1), stride=(1, 1), padding=(1, 0)),
        dict(cin=64, cout=128, kernel=(3, 3), stride=(2, 2), padding=(1, 1)),
    ]
    B, H, W = 2, 64, 64
    input_shape = (B, 1, H, W)

    key = jax.random.PRNGKey(0)
    raw_params, key = init_stem_params(key, cfg)
    packed_params, ref_layers = fold_stem_params(raw_params, cfg, input_shape)

    key, kx = jax.random.split(key)
    x = jax.random.normal(kx, input_shape, jnp.float32)

    forward = make_stem_forward(cfg, input_shape)
    out = jax.block_until_ready(forward(packed_params, x))

    # 64x64 -> (stride 2,8) 32x8 -> 32x8 -> 32x8 -> (stride 2,2) 16x4, 128 ch
    assert out.shape == (B, 128, 16, 4), out.shape
    assert bool(jnp.all(jnp.isfinite(out)))

    # Correctness vs. a plain-JAX conv reference using the same folded weights
    # (tolerance covers the per-layer bf16 activation rounding in the kernel).
    ref = jax.block_until_ready(ref_forward(x, ref_layers, cfg))
    np.testing.assert_allclose(np.asarray(out), np.asarray(ref),
                               rtol=0.1, atol=0.05)

    print("KERNEL_OK")
</pallas_src>

<mosaic_0001>
module attributes {stable_mosaic.version = 11 : i64} {
  func.func @_stem_kernel(%arg0: i32, %arg1: memref<1x64x64xbf16, #tpu.memory_space<vmem>>, %arg2: memref<3x32x64xf32, #tpu.memory_space<vmem>>, %arg3: memref<3x64x128xbf16, #tpu.memory_space<vmem>>, %arg4: memref<1x128xf32, #tpu.memory_space<vmem>>, %arg5: memref<3x32x32xf32, #tpu.memory_space<vmem>>, %arg6: memref<3x128x256xbf16, #tpu.memory_space<vmem>>, %arg7: memref<1x256xf32, #tpu.memory_space<vmem>>, %arg8: memref<3x32x32xf32, #tpu.memory_space<vmem>>, %arg9: memref<3x256x512xbf16, #tpu.memory_space<vmem>>, %arg10: memref<1x512xf32, #tpu.memory_space<vmem>>, %arg11: memref<3x16x32xf32, #tpu.memory_space<vmem>>, %arg12: memref<3x512x512xbf16, #tpu.memory_space<vmem>>, %arg13: memref<1x512xf32, #tpu.memory_space<vmem>>, %arg14: memref<1x16x512xf32, #tpu.memory_space<vmem>>) attributes {dimension_semantics = [#tpu.dimension_semantics<parallel>], iteration_bounds = array<i64: 2>, scalar_prefetch = 0 : i64, scratch_operands = 0 : i64, tpu.core_type = #tpu.core_type<tc>, window_params = [{transform_indices = @transform_0, window_bounds = array<i64: 1, 64, 64>}, {pipeline_mode = #tpu.pipeline_mode<synchronous>, transform_indices = @transform_1, window_bounds = array<i64: 3, 32, 64>}, {pipeline_mode = #tpu.pipeline_mode<synchronous>, transform_indices = @transform_2, window_bounds = array<i64: 3, 64, 128>}, {pipeline_mode = #tpu.pipeline_mode<synchronous>, transform_indices = @transform_3, window_bounds = array<i64: 1, 128>}, {pipeline_mode = #tpu.pipeline_mode<synchronous>, transform_indices = @transform_4, window_bounds = array<i64: 3, 32, 32>}, {pipeline_mode = #tpu.pipeline_mode<synchronous>, transform_indices = @transform_5, window_bounds = array<i64: 3, 128, 256>}, {pipeline_mode = #tpu.pipeline_mode<synchronous>, transform_indices = @transform_6, window_bounds = array<i64: 1, 256>}, {pipeline_mode = #tpu.pipeline_mode<synchronous>, transform_indices = @transform_7, window_bounds = array<i64: 3, 32, 32>}, {pipeline_mode = #tpu.pipeline_mode<synchronous>, transform_indices = @transform_8, window_bounds = array<i64: 3, 256, 512>}, {pipeline_mode = #tpu.pipeline_mode<synchronous>, transform_indices = @transform_9, window_bounds = array<i64: 1, 512>}, {pipeline_mode = #tpu.pipeline_mode<synchronous>, transform_indices = @transform_10, window_bounds = array<i64: 3, 16, 32>}, {pipeline_mode = #tpu.pipeline_mode<synchronous>, transform_indices = @transform_11, window_bounds = array<i64: 3, 512, 512>}, {pipeline_mode = #tpu.pipeline_mode<synchronous>, transform_indices = @transform_12, window_bounds = array<i64: 1, 512>}, {transform_indices = @transform_13, window_bounds = array<i64: 1, 16, 512>}]} {
    %c0 = arith.constant 0 : index
    %c0_0 = arith.constant 0 : index
    %c0_1 = arith.constant 0 : index
    %0 = vector.load %arg1[%c0, %c0_0, %c0_1] : memref<1x64x64xbf16, #tpu.memory_space<vmem>>, vector<1x64x64xbf16>
    %1 = vector.shape_cast %0 : vector<1x64x64xbf16> to vector<64x64xbf16>
    %c0_2 = arith.constant 0 : index
    %c0_3 = arith.constant 0 : index
    %2 = vector.load %arg4[%c0_2, %c0_3] : memref<1x128xf32, #tpu.memory_space<vmem>>, vector<1x128xf32>
    %c0_4 = arith.constant 0 : index
    %c0_5 = arith.constant 0 : index
    %c0_6 = arith.constant 0 : index
    %3 = vector.load %arg3[%c0_4, %c0_5, %c0_6] : memref<3x64x128xbf16, #tpu.memory_space<vmem>>, vector<1x64x128xbf16>
    %4 = vector.shape_cast %3 : vector<1x64x128xbf16> to vector<64x128xbf16>
    %cst = arith.constant dense<0.000000e+00> : vector<64x128xf32>
    %5 = tpu.matmul %1, %4, %cst {dimension_numbers = #tpu.dot_dimension_numbers<[1], [0], [0], [1], [0, 0, 1, 1], [], []>} : vector<64x64xbf16>, vector<64x128xbf16>, vector<64x128xf32> -> vector<64x128xf32>
    %c0_7 = arith.constant 0 : index
    %c0_8 = arith.constant 0 : index
    %c0_9 = arith.constant 0 : index
    %6 = vector.load %arg2[%c0_7, %c0_8, %c0_9] : memref<3x32x64xf32, #tpu.memory_space<vmem>>, vector<1x32x64xf32>
    %7 = vector.shape_cast %6 : vector<1x32x64xf32> to vector<32x64xf32>
    %cst_10 = arith.constant dense<0.000000e+00> : vector<32x128xf32>
    %8 = tpu.matmul %7, %5, %cst_10 {dimension_numbers = #tpu.dot_dimension_numbers<[1], [0], [0], [1], [0, 0, 1, 1], [], []>} : vector<32x64xf32>, vector<64x128xf32>, vector<32x128xf32> -> vector<32x128xf32>
    %9 = vector.broadcast %2 : vector<1x128xf32> to vector<32x128xf32>
    %10 = arith.addf %9, %8 : vector<32x128xf32>
    %c1 = arith.constant 1 : index
    %c0_11 = arith.constant 0 : index
    %c0_12 = arith.constant 0 : index
    %11 = vector.load %arg3[%c1, %c0_11, %c0_12] : memref<3x64x128xbf16, #tpu.memory_space<vmem>>, vector<1x64x128xbf16>
    %12 = vector.shape_cast %11 : vector<1x64x128xbf16> to vector<64x128xbf16>
    %cst_13 = arith.constant dense<0.000000e+00> : vector<64x128xf32>
    %13 = tpu.matmul %1, %12, %cst_13 {dimension_numbers = #tpu.dot_dimension_numbers<[1], [0], [0], [1], [0, 0, 1, 1], [], []>} : vector<64x64xbf16>, vector<64x128xbf16>, vector<64x128xf32> -> vector<64x128xf32>
    %c1_14 = arith.constant 1 : index
    %c0_15 = arith.constant 0 : index
    %c0_16 = arith.constant 0 : index
    %14 = vector.load %arg2[%c1_14, %c0_15, %c0_16] : memref<3x32x64xf32, #tpu.memory_space<vmem>>, vector<1x32x64xf32>
    %15 = vector.shape_cast %14 : vector<1x32x64xf32> to vector<32x64xf32>
    %cst_17 = arith.constant dense<0.000000e+00> : vector<32x128xf32>
    %16 = tpu.matmul %15, %13, %cst_17 {dimension_numbers = #tpu.dot_dimension_numbers<[1], [0], [0], [1], [0, 0, 1, 1], [], []>} : vector<32x64xf32>, vector<64x128xf32>, vector<32x128xf32> -> vector<32x128xf32>
    %17 = arith.addf %10, %16 : vector<32x128xf32>
    %c2 = arith.constant 2 : index
    %c0_18 = arith.constant 0 : index
    %c0_19 = arith.constant 0 : index
    %18 = vector.load %arg3[%c2, %c0_18, %c0_19] : memref<3x64x128xbf16, #tpu.memory_space<vmem>>, vector<1x64x128xbf16>
    %19 = vector.shape_cast %18 : vector<1x64x128xbf16> to vector<64x128xbf16>
    %cst_20 = arith.constant dense<0.000000e+00> : vector<64x128xf32>
    %20 = tpu.matmul %1, %19, %cst_20 {dimension_numbers = #tpu.dot_dimension_numbers<[1], [0], [0], [1], [0, 0, 1, 1], [], []>} : vector<64x64xbf16>, vector<64x128xbf16>, vector<64x128xf32> -> vector<64x128xf32>
    %c2_21 = arith.constant 2 : index
    %c0_22 = arith.constant 0 : index
    %c0_23 = arith.constant 0 : index
    %21 = vector.load %arg2[%c2_21, %c0_22, %c0_23] : memref<3x32x64xf32, #tpu.memory_space<vmem>>, vector<1x32x64xf32>
    %22 = vector.shape_cast %21 : vector<1x32x64xf32> to vector<32x64xf32>
    %cst_24 = arith.constant dense<0.000000e+00> : vector<32x128xf32>
    %23 = tpu.matmul %22, %20, %cst_24 {dimension_numbers = #tpu.dot_dimension_numbers<[1], [0], [0], [1], [0, 0, 1, 1], [], []>} : vector<32x64xf32>, vector<64x128xf32>, vector<32x128xf32> -> vector<32x128xf32>
    %24 = arith.addf %17, %23 : vector<32x128xf32>
    %cst_25 = arith.constant 0.000000e+00 : f32
    %25 = vector.broadcast %cst_25 : f32 to vector<32x128xf32>
    %26 = arith.maximumf %24, %25 : vector<32x128xf32>
    %27 = arith.truncf %26 : vector<32x128xf32> to vector<32x128xbf16>
    %c0_26 = arith.constant 0 : index
    %c0_27 = arith.constant 0 : index
    %28 = vector.load %arg7[%c0_26, %c0_27] : memref<1x256xf32, #tpu.memory_space<vmem>>, vector<1x256xf32>
    %c0_28 = arith.constant 0 : index
    %c0_29 = arith.constant 0 : index
    %c0_30 = arith.constant 0 : index
    %29 = vector.load %arg6[%c0_28, %c0_29, %c0_30] : memref<3x128x256xbf16, #tpu.memory_space<vmem>>, vector<1x128x256xbf16>
    %30 = vector.shape_cast %29 : vector<1x128x256xbf16> to vector<128x256xbf16>
    %cst_31 = arith.constant dense<0.000000e+00> : vector<32x256xf32>
    %31 = tpu.matmul %27, %30, %cst_31 {dimension_numbers = #tpu.dot_dimension_numbers<[1], [0], [0], [1], [0, 0, 1, 1], [], []>} : vector<32x128xbf16>, vector<128x256xbf16>, vector<32x256xf32> -> vector<32x256xf32>
    %c0_32 = arith.constant 0 : index
    %c0_33 = arith.constant 0 : index
    %c0_34 = arith.constant 0 : index
    %32 = vector.load %arg5[%c0_32, %c0_33, %c0_34] : memref<3x32x32xf32, #tpu.memory_space<vmem>>, vector<1x32x32xf32>
    %33 = vector.shape_cast %32 : vector<1x32x32xf32> to vector<32x32xf32>
    %cst_35 = arith.constant dense<0.000000e+00> : vector<32x256xf32>
    %34 = tpu.matmul %33, %31, %cst_35 {dimension_numbers = #tpu.dot_dimension_numbers<[1], [0], [0], [1], [0, 0, 1, 1], [], []>} : vector<32x32xf32>, vector<32x256xf32>, vector<32x256xf32> -> vector<32x256xf32>
    %35 = vector.broadcast %28 : vector<1x256xf32> to vector<32x256xf32>
    %36 = arith.addf %35, %34 : vector<32x256xf32>
    %c1_36 = arith.constant 1 : index
    %c0_37 = arith.constant 0 : index
    %c0_38 = arith.constant 0 : index
    %37 = vector.load %arg6[%c1_36, %c0_37, %c0_38] : memref<3x128x256xbf16, #tpu.memory_space<vmem>>, vector<1x128x256xbf16>
    %38 = vector.shape_cast %37 : vector<1x128x256xbf16> to vector<128x256xbf16>
    %cst_39 = arith.constant dense<0.000000e+00> : vector<32x256xf32>
    %39 = tpu.matmul %27, %38, %cst_39 {dimension_numbers = #tpu.dot_dimension_numbers<[1], [0], [0], [1], [0, 0, 1, 1], [], []>} : vector<32x128xbf16>, vector<128x256xbf16>, vector<32x256xf32> -> vector<32x256xf32>
    %c1_40 = arith.constant 1 : index
    %c0_41 = arith.constant 0 : index
    %c0_42 = arith.constant 0 : index
    %40 = vector.load %arg5[%c1_40, %c0_41, %c0_42] : memref<3x32x32xf32, #tpu.memory_space<vmem>>, vector<1x32x32xf32>
    %41 = vector.shape_cast %40 : vector<1x32x32xf32> to vector<32x32xf32>
    %cst_43 = arith.constant dense<0.000000e+00> : vector<32x256xf32>
    %42 = tpu.matmul %41, %39, %cst_43 {dimension_numbers = #tpu.dot_dimension_numbers<[1], [0], [0], [1], [0, 0, 1, 1], [], []>} : vector<32x32xf32>, vector<32x256xf32>, vector<32x256xf32> -> vector<32x256xf32>
    %43 = arith.addf %36, %42 : vector<32x256xf32>
    %c2_44 = arith.constant 2 : index
    %c0_45 = arith.constant 0 : index
    %c0_46 = arith.constant 0 : index
    %44 = vector.load %arg6[%c2_44, %c0_45, %c0_46] : memref<3x128x256xbf16, #tpu.memory_space<vmem>>, vector<1x128x256xbf16>
    %45 = vector.shape_cast %44 : vector<1x128x256xbf16> to vector<128x256xbf16>
    %cst_47 = arith.constant dense<0.000000e+00> : vector<32x256xf32>
    %46 = tpu.matmul %27, %45, %cst_47 {dimension_numbers = #tpu.dot_dimension_numbers<[1], [0], [0], [1], [0, 0, 1, 1], [], []>} : vector<32x128xbf16>, vector<128x256xbf16>, vector<32x256xf32> -> vector<32x256xf32>
    %c2_48 = arith.constant 2 : index
    %c0_49 = arith.constant 0 : index
    %c0_50 = arith.constant 0 : index
    %47 = vector.load %arg5[%c2_48, %c0_49, %c0_50] : memref<3x32x32xf32, #tpu.memory_space<vmem>>, vector<1x32x32xf32>
    %48 = vector.shape_cast %47 : vector<1x32x32xf32> to vector<32x32xf32>
    %cst_51 = arith.constant dense<0.000000e+00> : vector<32x256xf32>
    %49 = tpu.matmul %48, %46, %cst_51 {dimension_numbers = #tpu.dot_dimension_numbers<[1], [0], [0], [1], [0, 0, 1, 1], [], []>} : vector<32x32xf32>, vector<32x256xf32>, vector<32x256xf32> -> vector<32x256xf32>
    %50 = arith.addf %43, %49 : vector<32x256xf32>
    %cst_52 = arith.constant 0.000000e+00 : f32
    %51 = vector.broadcast %cst_52 : f32 to vector<32x256xf32>
    %52 = arith.maximumf %50, %51 : vector<32x256xf32>
    %53 = arith.truncf %52 : vector<32x256xf32> to vector<32x256xbf16>
    %c0_53 = arith.constant 0 : index
    %c0_54 = arith.constant 0 : index
    %54 = vector.load %arg10[%c0_53, %c0_54] : memref<1x512xf32, #tpu.memory_space<vmem>>, vector<1x512xf32>
    %c0_55 = arith.constant 0 : index
    %c0_56 = arith.constant 0 : index
    %c0_57 = arith.constant 0 : index
    %55 = vector.load %arg9[%c0_55, %c0_56, %c0_57] : memref<3x256x512xbf16, #tpu.memory_space<vmem>>, vector<1x256x512xbf16>
    %56 = vector.shape_cast %55 : vector<1x256x512xbf16> to vector<256x512xbf16>
    %cst_58 = arith.constant dense<0.000000e+00> : vector<32x512xf32>
    %57 = tpu.matmul %53, %56, %cst_58 {dimension_numbers = #tpu.dot_dimension_numbers<[1], [0], [0], [1], [0, 0, 1, 1], [], []>} : vector<32x256xbf16>, vector<256x512xbf16>, vector<32x512xf32> -> vector<32x512xf32>
    %c0_59 = arith.constant 0 : index
    %c0_60 = arith.constant 0 : index
    %c0_61 = arith.constant 0 : index
    %58 = vector.load %arg8[%c0_59, %c0_60, %c0_61] : memref<3x32x32xf32, #tpu.memory_space<vmem>>, vector<1x32x32xf32>
    %59 = vector.shape_cast %58 : vector<1x32x32xf32> to vector<32x32xf32>
    %cst_62 = arith.constant dense<0.000000e+00> : vector<32x512xf32>
    %60 = tpu.matmul %59, %57, %cst_62 {dimension_numbers = #tpu.dot_dimension_numbers<[1], [0], [0], [1], [0, 0, 1, 1], [], []>} : vector<32x32xf32>, vector<32x512xf32>, vector<32x512xf32> -> vector<32x512xf32>
    %61 = vector.broadcast %54 : vector<1x512xf32> to vector<32x512xf32>
    %62 = arith.addf %61, %60 : vector<32x512xf32>
    %c1_63 = arith.constant 1 : index
    %c0_64 = arith.constant 0 : index
    %c0_65 = arith.constant 0 : index
    %63 = vector.load %arg9[%c1_63, %c0_64, %c0_65] : memref<3x256x512xbf16, #tpu.memory_space<vmem>>, vector<1x256x512xbf16>
    %64 = vector.shape_cast %63 : vector<1x256x512xbf16> to vector<256x512xbf16>
    %cst_66 = arith.constant dense<0.000000e+00> : vector<32x512xf32>
    %65 = tpu.matmul %53, %64, %cst_66 {dimension_numbers = #tpu.dot_dimension_numbers<[1], [0], [0], [1], [0, 0, 1, 1], [], []>} : vector<32x256xbf16>, vector<256x512xbf16>, vector<32x512xf32> -> vector<32x512xf32>
    %c1_67 = arith.constant 1 : index
    %c0_68 = arith.constant 0 : index
    %c0_69 = arith.constant 0 : index
    %66 = vector.load %arg8[%c1_67, %c0_68, %c0_69] : memref<3x32x32xf32, #tpu.memory_space<vmem>>, vector<1x32x32xf32>
    %67 = vector.shape_cast %66 : vector<1x32x32xf32> to vector<32x32xf32>
    %cst_70 = arith.constant dense<0.000000e+00> : vector<32x512xf32>
    %68 = tpu.matmul %67, %65, %cst_70 {dimension_numbers = #tpu.dot_dimension_numbers<[1], [0], [0], [1], [0, 0, 1, 1], [], []>} : vector<32x32xf32>, vector<32x512xf32>, vector<32x512xf32> -> vector<32x512xf32>
    %69 = arith.addf %62, %68 : vector<32x512xf32>
    %c2_71 = arith.constant 2 : index
    %c0_72 = arith.constant 0 : index
    %c0_73 = arith.constant 0 : index
    %70 = vector.load %arg9[%c2_71, %c0_72, %c0_73] : memref<3x256x512xbf16, #tpu.memory_space<vmem>>, vector<1x256x512xbf16>
    %71 = vector.shape_cast %70 : vector<1x256x512xbf16> to vector<256x512xbf16>
    %cst_74 = arith.constant dense<0.000000e+00> : vector<32x512xf32>
    %72 = tpu.matmul %53, %71, %cst_74 {dimension_numbers = #tpu.dot_dimension_numbers<[1], [0], [0], [1], [0, 0, 1, 1], [], []>} : vector<32x256xbf16>, vector<256x512xbf16>, vector<32x512xf32> -> vector<32x512xf32>
    %c2_75 = arith.constant 2 : index
    %c0_76 = arith.constant 0 : index
    %c0_77 = arith.constant 0 : index
    %73 = vector.load %arg8[%c2_75, %c0_76, %c0_77] : memref<3x32x32xf32, #tpu.memory_space<vmem>>, vector<1x32x32xf32>
    %74 = vector.shape_cast %73 : vector<1x32x32xf32> to vector<32x32xf32>
    %cst_78 = arith.constant dense<0.000000e+00> : vector<32x512xf32>
    %75 = tpu.matmul %74, %72, %cst_78 {dimension_numbers = #tpu.dot_dimension_numbers<[1], [0], [0], [1], [0, 0, 1, 1], [], []>} : vector<32x32xf32>, vector<32x512xf32>, vector<32x512xf32> -> vector<32x512xf32>
    %76 = arith.addf %69, %75 : vector<32x512xf32>
    %cst_79 = arith.constant 0.000000e+00 : f32
    %77 = vector.broadcast %cst_79 : f32 to vector<32x512xf32>
    %78 = arith.maximumf %76, %77 : vector<32x512xf32>
    %79 = arith.truncf %78 : vector<32x512xf32> to vector<32x512xbf16>
    %c0_80 = arith.constant 0 : index
    %c0_81 = arith.constant 0 : index
    %80 = vector.load %arg13[%c0_80, %c0_81] : memref<1x512xf32, #tpu.memory_space<vmem>>, vector<1x512xf32>
    %c0_82 = arith.constant 0 : index
    %c0_83 = arith.constant 0 : index
    %c0_84 = arith.constant 0 : index
    %81 = vector.load %arg12[%c0_82, %c0_83, %c0_84] : memref<3x512x512xbf16, #tpu.memory_space<vmem>>, vector<1x512x512xbf16>
    %82 = vector.shape_cast %81 : vector<1x512x512xbf16> to vector<512x512xbf16>
    %cst_85 = arith.constant dense<0.000000e+00> : vector<32x512xf32>
    %83 = tpu.matmul %79, %82, %cst_85 {dimension_numbers = #tpu.dot_dimension_numbers<[1], [0], [0], [1], [0, 0, 1, 1], [], []>} : vector<32x512xbf16>, vector<512x512xbf16>, vector<32x512xf32> -> vector<32x512xf32>
    %c0_86 = arith.constant 0 : index
    %c0_87 = arith.constant 0 : index
    %c0_88 = arith.constant 0 : index
    %84 = vector.load %arg11[%c0_86, %c0_87, %c0_88] : memref<3x16x32xf32, #tpu.memory_space<vmem>>, vector<1x16x32xf32>
    %85 = vector.shape_cast %84 : vector<1x16x32xf32> to vector<16x32xf32>
    %cst_89 = arith.constant dense<0.000000e+00> : vector<16x512xf32>
    %86 = tpu.matmul %85, %83, %cst_89 {dimension_numbers = #tpu.dot_dimension_numbers<[1], [0], [0], [1], [0, 0, 1, 1], [], []>} : vector<16x32xf32>, vector<32x512xf32>, vector<16x512xf32> -> vector<16x512xf32>
    %87 = vector.broadcast %80 : vector<1x512xf32> to vector<16x512xf32>
    %88 = arith.addf %87, %86 : vector<16x512xf32>
    %c1_90 = arith.constant 1 : index
    %c0_91 = arith.constant 0 : index
    %c0_92 = arith.constant 0 : index
    %89 = vector.load %arg12[%c1_90, %c0_91, %c0_92] : memref<3x512x512xbf16, #tpu.memory_space<vmem>>, vector<1x512x512xbf16>
    %90 = vector.shape_cast %89 : vector<1x512x512xbf16> to vector<512x512xbf16>
    %cst_93 = arith.constant dense<0.000000e+00> : vector<32x512xf32>
    %91 = tpu.matmul %79, %90, %cst_93 {dimension_numbers = #tpu.dot_dimension_numbers<[1], [0], [0], [1], [0, 0, 1, 1], [], []>} : vector<32x512xbf16>, vector<512x512xbf16>, vector<32x512xf32> -> vector<32x512xf32>
    %c1_94 = arith.constant 1 : index
    %c0_95 = arith.constant 0 : index
    %c0_96 = arith.constant 0 : index
    %92 = vector.load %arg11[%c1_94, %c0_95, %c0_96] : memref<3x16x32xf32, #tpu.memory_space<vmem>>, vector<1x16x32xf32>
    %93 = vector.shape_cast %92 : vector<1x16x32xf32> to vector<16x32xf32>
    %cst_97 = arith.constant dense<0.000000e+00> : vector<16x512xf32>
    %94 = tpu.matmul %93, %91, %cst_97 {dimension_numbers = #tpu.dot_dimension_numbers<[1], [0], [0], [1], [0, 0, 1, 1], [], []>} : vector<16x32xf32>, vector<32x512xf32>, vector<16x512xf32> -> vector<16x512xf32>
    %95 = arith.addf %88, %94 : vector<16x512xf32>
    %c2_98 = arith.constant 2 : index
    %c0_99 = arith.constant 0 : index
    %c0_100 = arith.constant 0 : index
    %96 = vector.load %arg12[%c2_98, %c0_99, %c0_100] : memref<3x512x512xbf16, #tpu.memory_space<vmem>>, vector<1x512x512xbf16>
    %97 = vector.shape_cast %96 : vector<1x512x512xbf16> to vector<512x512xbf16>
    %cst_101 = arith.constant dense<0.000000e+00> : vector<32x512xf32>
    %98 = tpu.matmul %79, %97, %cst_101 {dimension_numbers = #tpu.dot_dimension_numbers<[1], [0], [0], [1], [0, 0, 1, 1], [], []>} : vector<32x512xbf16>, vector<512x512xbf16>, vector<32x512xf32> -> vector<32x512xf32>
    %c2_102 = arith.constant 2 : index
    %c0_103 = arith.constant 0 : index
    %c0_104 = arith.constant 0 : index
    %99 = vector.load %arg11[%c2_102, %c0_103, %c0_104] : memref<3x16x32xf32, #tpu.memory_space<vmem>>, vector<1x16x32xf32>
    %100 = vector.shape_cast %99 : vector<1x16x32xf32> to vector<16x32xf32>
    %cst_105 = arith.constant dense<0.000000e+00> : vector<16x512xf32>
    %101 = tpu.matmul %100, %98, %cst_105 {dimension_numbers = #tpu.dot_dimension_numbers<[1], [0], [0], [1], [0, 0, 1, 1], [], []>} : vector<16x32xf32>, vector<32x512xf32>, vector<16x512xf32> -> vector<16x512xf32>
    %102 = arith.addf %95, %101 : vector<16x512xf32>
    %cst_106 = arith.constant 0.000000e+00 : f32
    %103 = vector.broadcast %cst_106 : f32 to vector<16x512xf32>
    %104 = arith.maximumf %102, %103 : vector<16x512xf32>
    %c0_107 = arith.constant 0 : index
    %c0_108 = arith.constant 0 : index
    %c0_109 = arith.constant 0 : index
    %105 = vector.load %arg14[%c0_107, %c0_108, %c0_109] : memref<1x16x512xf32, #tpu.memory_space<vmem>>, vector<1x16x512xf32>
    %106 = vector.shape_cast %105 : vector<1x16x512xf32> to vector<16x512xf32>
    %107 = vector.shape_cast %104 : vector<16x512xf32> to vector<1x16x512xf32>
    tpu.vector_store %arg14[%c0_107, %c0_108, %c0_109], %107 {strides = array<i32>} : memref<1x16x512xf32, #tpu.memory_space<vmem>>, vector<1x16x512xf32>,
    return
  }
  func.func @transform_0(%arg0: i32) -> (i32, i32, i32) {
    %c0_i32 = arith.constant 0 : i32
    %c0_i32_0 = arith.constant 0 : i32
    %c0_i32_1 = arith.constant 0 : i32
    return %arg0, %c0_i32, %c0_i32_0 : i32, i32, i32
  }
  func.func @transform_1(%arg0: i32) -> (i32, i32, i32) {
    %c0_i32 = arith.constant 0 : i32
    %c0_i32_0 = arith.constant 0 : i32
    %c0_i32_1 = arith.constant 0 : i32
    %c0_i32_2 = arith.constant 0 : i32
    return %c0_i32, %c0_i32_0, %c0_i32_1 : i32, i32, i32
  }
  func.func @transform_2(%arg0: i32) -> (i32, i32, i32) {
    %c0_i32 = arith.constant 0 : i32
    %c0_i32_0 = arith.constant 0 : i32
    %c0_i32_1 = arith.constant 0 : i32
    %c0_i32_2 = arith.constant 0 : i32
    return %c0_i32, %c0_i32_0, %c0_i32_1 : i32, i32, i32
  }
  func.func @transform_3(%arg0: i32) -> (i32, i32) {
    %c0_i32 = arith.constant 0 : i32
    %c0_i32_0 = arith.constant 0 : i32
    %c0_i32_1 = arith.constant 0 : i32
    return %c0_i32, %c0_i32_0 : i32, i32
  }
  func.func @transform_4(%arg0: i32) -> (i32, i32, i32) {
    %c0_i32 = arith.constant 0 : i32
    %c0_i32_0 = arith.constant 0 : i32
    %c0_i32_1 = arith.constant 0 : i32
    %c0_i32_2 = arith.constant 0 : i32
    return %c0_i32, %c0_i32_0, %c0_i32_1 : i32, i32, i32
  }
  func.func @transform_5(%arg0: i32) -> (i32, i32, i32) {
    %c0_i32 = arith.constant 0 : i32
    %c0_i32_0 = arith.constant 0 : i32
    %c0_i32_1 = arith.constant 0 : i32
    %c0_i32_2 = arith.constant 0 : i32
    return %c0_i32, %c0_i32_0, %c0_i32_1 : i32, i32, i32
  }
  func.func @transform_6(%arg0: i32) -> (i32, i32) {
    %c0_i32 = arith.constant 0 : i32
    %c0_i32_0 = arith.constant 0 : i32
    %c0_i32_1 = arith.constant 0 : i32
    return %c0_i32, %c0_i32_0 : i32, i32
  }
  func.func @transform_7(%arg0: i32) -> (i32, i32, i32) {
    %c0_i32 = arith.constant 0 : i32
    %c0_i32_0 = arith.constant 0 : i32
    %c0_i32_1 = arith.constant 0 : i32
    %c0_i32_2 = arith.constant 0 : i32
    return %c0_i32, %c0_i32_0, %c0_i32_1 : i32, i32, i32
  }
  func.func @transform_8(%arg0: i32) -> (i32, i32, i32) {
    %c0_i32 = arith.constant 0 : i32
    %c0_i32_0 = arith.constant 0 : i32
    %c0_i32_1 = arith.constant 0 : i32
    %c0_i32_2 = arith.constant 0 : i32
    return %c0_i32, %c0_i32_0, %c0_i32_1 : i32, i32, i32
  }
  func.func @transform_9(%arg0: i32) -> (i32, i32) {
    %c0_i32 = arith.constant 0 : i32
    %c0_i32_0 = arith.constant 0 : i32
    %c0_i32_1 = arith.constant 0 : i32
    return %c0_i32, %c0_i32_0 : i32, i32
  }
  func.func @transform_10(%arg0: i32) -> (i32, i32, i32) {
    %c0_i32 = arith.constant 0 : i32
    %c0_i32_0 = arith.constant 0 : i32
    %c0_i32_1 = arith.constant 0 : i32
    %c0_i32_2 = arith.constant 0 : i32
    return %c0_i32, %c0_i32_0, %c0_i32_1 : i32, i32, i32
  }
  func.func @transform_11(%arg0: i32) -> (i32, i32, i32) {
    %c0_i32 = arith.constant 0 : i32
    %c0_i32_0 = arith.constant 0 : i32
    %c0_i32_1 = arith.constant 0 : i32
    %c0_i32_2 = arith.constant 0 : i32
    return %c0_i32, %c0_i32_0, %c0_i32_1 : i32, i32, i32
  }
  func.func @transform_12(%arg0: i32) -> (i32, i32) {
    %c0_i32 = arith.constant 0 : i32
    %c0_i32_0 = arith.constant 0 : i32
    %c0_i32_1 = arith.constant 0 : i32
    return %c0_i32, %c0_i32_0 : i32, i32
  }
  func.func @transform_13(%arg0: i32) -> (i32, i32, i32) {
    %c0_i32 = arith.constant 0 : i32
    %c0_i32_0 = arith.constant 0 : i32
    %c0_i32_1 = arith.constant 0 : i32
    return %arg0, %c0_i32, %c0_i32_0 : i32, i32, i32
  }
}

</mosaic_0001>

<bundles_post_ra>
// kernel: forward.1
= control target key start
LH: loop header
LB: loop body
LE: loop exit
PB: predicated region body
PF: predicated region fallthrough
CT: control target
= control target key end

     0   :  { %18 = vsyncpa [#allocation3], 0  ;;  %s10984_s0 = inlined_call_operand.vmem [shape: bf16[2,64,64], index: 0, kind: input, shape index: {}]   ;;  %s10985_s1 = inlined_call_operand.hbm [shape: f32[3,32,64], index: 1, kind: input, shape index: {}]   ;;  %s10986_s2 = inlined_call_operand.hbm [shape: bf16[3,64,128], index: 2, kind: input, shape index: {}]   ;;  %s10987_s3 = inlined_call_operand.hbm [shape: f32[1,128], index: 3, kind: input, shape index: {}]   ;;  %s10988_s4 = inlined_call_operand.hbm [shape: f32[3,32,32], index: 4, kind: input, shape index: {}]   ;;  %s10989_s5 = inlined_call_operand.hbm [shape: bf16[3,128,256], index: 5, kind: input, shape index: {}]   ;;  %s10990_s6 = inlined_call_operand.hbm [shape: f32[1,256], index: 6, kind: input, shape index: {}]   ;;  %s10991_s7 = inlined_call_operand.hbm [shape: f32[3,32,32], index: 7, kind: input, shape index: {}]   ;;  %s10992_s8 = inlined_call_operand.hbm [shape: bf16[3,256,512], index: 8, kind: input, shape index: {}]   ;;  %s10993_s9 = inlined_call_operand.hbm [shape: f32[1,512], index: 9, kind: input, shape index: {}]   ;;  %s10994_s10 = inlined_call_operand.hbm [shape: f32[3,16,32], index: 10, kind: input, shape index: {}]   ;;  %s10995_s11 = inlined_call_operand.hbm [shape: bf16[3,512,512], index: 11, kind: input, shape index: {}]   ;;  %s10996_s12 = inlined_call_operand.hbm [shape: f32[1,512], index: 12, kind: input, shape index: {}]   ;;  %s10997_s13 = inlined_call_operand.vmem [shape: f32[2,16,512], index: 13, kind: output, shape index: {}]  }
   0x1   :  { %19 = vsyncpa [#allocation5], 0 }
   0x2   :  { %20 = vsyncpa [#allocation8], 0 }
   0x3   :  { %21 = vsyncpa [#allocation11], 0 }
   0x4   :  { %22 = vsyncpa [#allocation14], 0 }
   0x5   :  { %23 = vsyncpa [#allocation17], 0 }
   0x6   :  { %24 = vsyncpa [#allocation20], 0  ;;  %s10361_s25 = smov 0  }
   0x7 LB: > { %s10271_s26 = smov [#allocation4]   ;;  %s10367_s28 = sadd.s32 4294967295, %s10269_s25   ;;  %s10269_s25 = sphi %s10361_s25, %s30_s25  }
   0x8   : > { %s364_s27 = sshll.u32 %s10271_s26, 4  ;;  %p7904_p0 = scmp.ge.s32.totalorder %s10269_s25, 1  ;;  %s365_s27 = int_to_ptr.vmem [resolvable:$true] %s364_s27 }
   0x9   : > { %p339_p1 = scmp.lt.s32.totalorder %s10269_s25, 3  ;;  %p10999_p2 = scmp.eq.s32.totalorder %s10367_s28, 0 }
   0xa   : > { %s10272_s14 = smov [#allocation7]   ;;  %s10273_s16 = smov [#allocation10]  }
   0xb   : > { %p10372_p3 = pnand %p7904_p0, %p339_p1  ;;  %s388_s15 = sshll.u32 %s10272_s14, 4  ;;  %s10384_s15 = int_to_ptr.vmem [resolvable:$true] %s388_s15 }
   0xc   : > { %s415_s17 = sshll.u32 %s10273_s16, 4  ;;  %s9934_s19 = scalar_lea.vmem %s365_s27, 1536  ;;  %s10386_s17 = int_to_ptr.vmem [resolvable:$true] %s415_s17 }
   0xd   : > { %s11001_s29 = scalar_select %p10372_p3, 1, 0 }
   0xe   : > { %p8882_p4 = pneg %p10372_p3  ;;  %p9935_p7 = scmp.ne.s32.totalorder %s365_s27, %s9934_s19 }
   0xf   : > { %p9942_p10 = scmp.lt.s32.totalorder %s365_s27, %s365_s27  ;;  %p9943_p11 = scmp.lt.s32.totalorder %s9934_s19, %s9934_s19 }
  0x10   : > { %p10380_p5 = pnand %p10999_p2, %p8882_p4 }
  0x11   : > { %p9944_p12 = por %p9943_p11, %p9942_p10 }
  0x12   : > { %p10390_p6 = pneg %p10380_p5 }
  0x14   : > { %p9937_p8 = pnand %p9935_p7, %p10390_p6 }
  0x16   : > { %p9938_p9 = pneg %p9937_p8 }
  0x18   : > { %p9945_p13 = pnand %p9944_p12, %p9938_p9 }
  0x1a   : > { %9948 = shalt.err (!%p9945_p13)
}
  0x1b   : > { %s10274_s20 = smov 64   ;;  %s10275_s21 = smov 4  }
  0x1c   : > { %8888 = dma.hbm_to_vmem [thread:$0]  (!%p10380_p5), %s10986_s2, 1536, %s365_s27, [#allocation5], %s10274_s20, %s10274_s20, %s10275_s21  }
  0x1d   : > { %s9960_s24 = scalar_lea.vmem %s10384_s15, 1536  ;;  %p9968_p7 = scmp.lt.s32.totalorder %s10384_s15, %s10384_s15 }
  0x1e   : > { %p9961_p0 = scmp.ne.s32.totalorder %s10384_s15, %s9960_s24  ;;  %p9969_p8 = scmp.lt.s32.totalorder %s9960_s24, %s9960_s24 }
  0x20   : > { %p9963_p1 = pnand %p9961_p0, %p10390_p6  ;;  %p9970_p9 = por %p9969_p8, %p9968_p7 }
  0x22   : > { %p9964_p4 = pneg %p9963_p1 }
  0x24   : > { %p9971_p10 = pnand %p9970_p9, %p9964_p4 }
  0x26   : > { %9974 = shalt.err (!%p9971_p10)
}
  0x27   : > { %s10276_s26 = smov 128   ;;  %s10277_s14 = smov 8  }
  0x28   : > { %8894 = dma.hbm_to_vmem [thread:$0]  (!%p10380_p5), %s10988_s4, 1536, %s10384_s15, [#allocation8], %s10276_s26, %s10276_s26, %s10277_s14  }
  0x29   : > { %s9986_s19 = scalar_lea.vmem %s10386_s17, 32  ;;  %p9994_p0 = scmp.lt.s32.totalorder %s10386_s17, %s10386_s17 }
  0x2a   : > { %p9987_p11 = scmp.ne.s32.totalorder %s10386_s17, %s9986_s19  ;;  %p9995_p1 = scmp.lt.s32.totalorder %s9986_s19, %s9986_s19 }
  0x2c   : > { %p9989_p12 = pnand %p9987_p11, %p10390_p6  ;;  %p9996_p4 = por %p9995_p1, %p9994_p0 }
  0x2e   : > { %p9990_p13 = pneg %p9989_p12 }
  0x30   : > { %p9997_p7 = pnand %p9996_p4, %p9990_p13 }
  0x32   : > { %10000 = shalt.err (!%p9997_p7)
}
  0x33   : > { %8900 = dma.hbm_to_vmem [thread:$0]  (!%p10380_p5), %s10990_s6, 32, %s10386_s17, [#allocation11]  }
  0x34   : > { %s10278_s15 = smov [#allocation13]  }
  0x35   : > { %s438_s22 = sshll.u32 %s10278_s15, 4  ;;  %s439_s22 = int_to_ptr.vmem [resolvable:$true] %s438_s22 }
  0x36   : > { %s10012_s23 = scalar_lea.vmem %s439_s22, 24576  ;;  %p10020_p11 = scmp.lt.s32.totalorder %s439_s22, %s439_s22 }
  0x37   : > { %p10013_p8 = scmp.ne.s32.totalorder %s439_s22, %s10012_s23  ;;  %p10021_p12 = scmp.lt.s32.totalorder %s10012_s23, %s10012_s23 }
  0x39   : > { %p10015_p9 = pnand %p10013_p8, %p10390_p6  ;;  %p10022_p13 = por %p10021_p12, %p10020_p11 }
  0x3b   : > { %p10016_p10 = pneg %p10015_p9 }
  0x3d   : > { %p10023_p0 = pnand %p10022_p13, %p10016_p10 }
  0x3f   : > { %10026 = shalt.err (!%p10023_p0)
}
  0x40   : > { %s10998_s24 = smov 256   ;;  %s10280_s27 = smov 16  }
  0x41   : > { %8906 = dma.hbm_to_vmem [thread:$0]  (!%p10380_p5), %s10992_s8, 24576, %s439_s22, [#allocation14], %s10998_s24, %s10998_s24, %s10280_s27  }
  0x42   : > { %s10281_s19 = smov [#allocation16]   ;;  %s10282_s21 = smov [#allocation2]  }
  0x43   : > { %s462_s20 = sshll.u32 %s10281_s19, 4  ;;  %s351_s15 = sshll.u32 %s10282_s21, 4  ;;  %s463_s20 = int_to_ptr.vmem [resolvable:$true] %s462_s20  ;;  %s352_s15 = int_to_ptr.vmem [resolvable:$true] %s351_s15 }
  0x44   : > { %s10038_s23 = scalar_lea.vmem %s463_s20, 768  ;;  %p10046_p8 = scmp.lt.s32.totalorder %s463_s20, %s463_s20 }
  0x45   : > { %p10039_p1 = scmp.ne.s32.totalorder %s463_s20, %s10038_s23  ;;  %p10047_p9 = scmp.lt.s32.totalorder %s10038_s23, %s10038_s23 }
  0x47   : > { %p10041_p4 = pnand %p10039_p1, %p10390_p6  ;;  %p10048_p10 = por %p10047_p9, %p10046_p8 }
  0x49   : > { %p10042_p7 = pneg %p10041_p4 }
  0x4b   : > { %p10049_p11 = pnand %p10048_p10, %p10042_p7 }
  0x4d   : > { %10052 = shalt.err (!%p10049_p11)
}
  0x4e   : > { %8912 = dma.hbm_to_vmem [thread:$0]  (!%p10380_p5), %s10994_s10, 768, %s463_s20, [#allocation17], %s10276_s26, %s10276_s26, %s10277_s14  }
  0x4f   : > { %s10064_s16 = scalar_lea.vmem %s352_s15, 1536  ;;  %p10072_p1 = scmp.lt.s32.totalorder %s352_s15, %s352_s15 }
  0x50   : > { %p10065_p12 = scmp.ne.s32.totalorder %s352_s15, %s10064_s16  ;;  %p10073_p4 = scmp.lt.s32.totalorder %s10064_s16, %s10064_s16 }
  0x52   : > { %p10067_p13 = pnand %p10065_p12, %p10390_p6  ;;  %p10074_p7 = por %p10073_p4, %p10072_p1 }
  0x54   : > { %p10068_p0 = pneg %p10067_p13 }
  0x56   : > { %p10075_p8 = pnand %p10074_p7, %p10068_p0 }
  0x58   : > { %10078 = shalt.err (!%p10075_p8)
}
  0x59   : > { %8885 = dma.hbm_to_vmem [thread:$0]  (!%p10380_p5), %s10985_s1, 1536, %s352_s15, [#allocation3], %s10276_s26, %s10276_s26, %s10277_s14  }
  0x5a   : > { %s10283_s20 = smov [#allocation6]   ;;  %s10284_s22 = smov [#allocation9]  }
  0x5b   : > { %s378_s23 = sshll.u32 %s10283_s20, 4  ;;  %s401_s17 = sshll.u32 %s10284_s22, 4  ;;  %s379_s23 = int_to_ptr.vmem [resolvable:$true] %s378_s23  ;;  %s402_s17 = int_to_ptr.vmem [resolvable:$true] %s401_s17 }
  0x5c   : > { %s10090_s24 = scalar_lea.vmem %s379_s23, 16  ;;  %s10097_s16 = scalar_lea.vmem %s379_s23, 32 }
  0x5d   : > { %p10091_p9 = scmp.ne.s32.totalorder %s379_s23, %s10090_s24  ;;  %p10098_p12 = scmp.lt.s32.totalorder %s379_s23, %s379_s23 }
  0x5e   : > { %p10099_p13 = scmp.lt.s32.totalorder %s10097_s16, %s10090_s24 }
  0x5f   : > { %p10093_p10 = pnand %p10091_p9, %p10390_p6 }
  0x60   : > { %p10100_p0 = por %p10099_p13, %p10098_p12 }
  0x61   : > { %p10094_p11 = pneg %p10093_p10 }
  0x63   : > { %p10101_p1 = pnand %p10100_p0, %p10094_p11 }
  0x65   : > { %10104 = shalt.err (!%p10101_p1)
}
  0x66   : > { %8891 = dma.hbm_to_vmem [thread:$0]  (!%p10380_p5), %s10987_s3, 16, %s379_s23, [#allocation5]  }
  0x67   : > { %s10116_s21 = scalar_lea.vmem %s402_s17, 6144  ;;  %p10124_p9 = scmp.lt.s32.totalorder %s402_s17, %s402_s17 }
  0x68   : > { %p10117_p4 = scmp.ne.s32.totalorder %s402_s17, %s10116_s21  ;;  %p10125_p10 = scmp.lt.s32.totalorder %s10116_s21, %s10116_s21 }
  0x6a   : > { %p10119_p7 = pnand %p10117_p4, %p10390_p6  ;;  %p10126_p2 = por %p10125_p10, %p10124_p9 }
  0x6c   : > { %p10120_p8 = pneg %p10119_p7 }
  0x6e   : > { %p10127_p3 = pnand %p10126_p2, %p10120_p8 }
  0x70   : > { %10130 = shalt.err (!%p10127_p3)
}
  0x71   : > { %8897 = dma.hbm_to_vmem [thread:$0]  (!%p10380_p5), %s10989_s5, 6144, %s402_s17, [#allocation8], %s10276_s26, %s10276_s26, %s10277_s14  }
  0x72   : > { %s10285_s23 = smov [#allocation12]   ;;  %s10286_s16 = smov [#allocation15]  }
  0x73   : > { %s425_s22 = sshll.u32 %s10285_s23, 4  ;;  %s452_s19 = sshll.u32 %s10286_s16, 4  ;;  %s426_s22 = int_to_ptr.vmem [resolvable:$true] %s425_s22  ;;  %s453_s19 = int_to_ptr.vmem [resolvable:$true] %s452_s19 }
  0x74   : > { %s10142_s15 = scalar_lea.vmem %s426_s22, 1536  ;;  %p10150_p12 = scmp.lt.s32.totalorder %s426_s22, %s426_s22 }
  0x75   : > { %p10143_p11 = scmp.ne.s32.totalorder %s426_s22, %s10142_s15  ;;  %p10151_p13 = scmp.lt.s32.totalorder %s10142_s15, %s10142_s15 }
  0x77   : > { %p10145_p2 = pnand %p10143_p11, %p10390_p6  ;;  %p10152_p0 = por %p10151_p13, %p10150_p12 }
  0x79   : > { %p10146_p3 = pneg %p10145_p2 }
  0x7b   : > { %p10153_p1 = pnand %p10152_p0, %p10146_p3 }
  0x7d   : > { %10156 = shalt.err (!%p10153_p1)
}
  0x7e   : > { %8903 = dma.hbm_to_vmem [thread:$0]  (!%p10380_p5), %s10991_s7, 1536, %s426_s22, [#allocation11], %s10276_s26, %s10276_s26, %s10277_s14  }
  0x7f   : > { %s10168_s24 = scalar_lea.vmem %s453_s19, 64  ;;  %p10176_p9 = scmp.lt.s32.totalorder %s453_s19, %s453_s19 }
  0x80   : > { %p10169_p4 = scmp.ne.s32.totalorder %s453_s19, %s10168_s24  ;;  %p10177_p10 = scmp.lt.s32.totalorder %s10168_s24, %s10168_s24 }
  0x82   : > { %p10171_p7 = pnand %p10169_p4, %p10390_p6  ;;  %p10178_p11 = por %p10177_p10, %p10176_p9 }
  0x84   : > { %p10172_p8 = pneg %p10171_p7 }
  0x86   : > { %p10179_p2 = pnand %p10178_p11, %p10172_p8 }
  0x88   : > { %10182 = shalt.err (!%p10179_p2)
}
  0x89   : > { %8909 = dma.hbm_to_vmem [thread:$0]  (!%p10380_p5), %s10993_s9, 64, %s453_s19, [#allocation14]  }
  0x8a   : > { %s10287_s16 = smov [#allocation18]   ;;  %s10288_s14 = smov [#allocation19]  }
  0x8b   : > { %s475_s26 = sshll.u32 %s10287_s16, 4  ;;  %s489_s22 = sshll.u32 %s10288_s14, 4  ;;  %s476_s26 = int_to_ptr.vmem [resolvable:$true] %s475_s26  ;;  %s490_s22 = int_to_ptr.vmem [resolvable:$true] %s489_s22 }
  0x8c   : > { %s10194_s15 = scalar_lea.vmem %s476_s26, 49152  ;;  %p10202_p0 = scmp.lt.s32.totalorder %s476_s26, %s476_s26 }
  0x8d   : > { %p10195_p3 = scmp.ne.s32.totalorder %s476_s26, %s10194_s15  ;;  %p10203_p1 = scmp.lt.s32.totalorder %s10194_s15, %s10194_s15 }
  0x8f   : > { %p10197_p12 = pnand %p10195_p3, %p10390_p6  ;;  %p10204_p4 = por %p10203_p1, %p10202_p0 }
  0x91   : > { %p10198_p13 = pneg %p10197_p12 }
  0x93   : > { %p10205_p7 = pnand %p10204_p4, %p10198_p13 }
  0x95   : > { %10208 = shalt.err (!%p10205_p7)
}
  0x96   : > { %s11004_s17 = smov 256   ;;  %s10220_s24 = scalar_lea.vmem %s490_s22, 64 }
  0x97   : > { %8915 = dma.hbm_to_vmem [thread:$0]  (!%p10380_p5), %s10995_s11, 49152, %s476_s26, [#allocation17], %s11004_s17, %s11004_s17, %s10280_s27  }
  0x98   : > { %p10221_p8 = scmp.ne.s32.totalorder %s490_s22, %s10220_s24  ;;  %p10228_p11 = scmp.lt.s32.totalorder %s490_s22, %s490_s22 }
  0x99   : > { %p10229_p2 = scmp.lt.s32.totalorder %s10220_s24, %s10220_s24 }
  0x9a   : > { %p10223_p9 = pnand %p10221_p8, %p10390_p6 }
  0x9b   : > { %p10230_p3 = por %p10229_p2, %p10228_p11 }
  0x9c   : > { %p10224_p10 = pneg %p10223_p9 }
  0x9e   : > { %p10231_p12 = pnand %p10230_p3, %p10224_p10 }
  0xa0   : > { %10234 = shalt.err (!%p10231_p12)
}
  0xa1   : > { %8918 = dma.hbm_to_vmem [thread:$0]  (!%p10380_p5), %s10996_s12, 64, %s490_s22, [#allocation20]  }
  0xa2   : > { %p11005_p13 = scmp.ne.s32.totalorder %s11001_s29, 0 }
  0xa3   : > { %p11006_p0 = scmp.eq.s32.totalorder (!%p11005_p13), %s10367_s28, 0 }
  0xa4   : > { %510 = sbr.rel (%p11005_p13) target bundleno = 3512 (0xdb8), region = 72 }
  0xa9   : > { %10240 = dma.done.wait (%p11006_p0), [#allocation3], 1536   ;;  %p11007_p6 = pmov %p11006_p0 }
  0xaa   : > { %p11008_p1 = pmov %p11006_p0 }
  0xab   : > { %10242 = vsyncadd (%p11007_p6), [#allocation3], 4294965760 }
  0xac   : > { %10244 = dma.done.wait (%p11008_p1), [#allocation5], 1552   ;;  %p11009_p4 = pmov %p11006_p0 }
  0xad   : > { %p11010_p7 = pmov %p11006_p0 }
  0xae   : > { %10246 = vsyncadd (%p11009_p4), [#allocation5], 4294965744 }
  0xaf   : > { %10248 = dma.done.wait (%p11010_p7), [#allocation8], 7680   ;;  %p11011_p5 = pmov %p11006_p0 }
  0xb0   : > { %p11012_p8 = pmov %p11006_p0 }
  0xb1   : > { %10250 = vsyncadd (%p11011_p5), [#allocation8], 4294959616 }
  0xb2   : > { %10252 = dma.done.wait (%p11012_p8), [#allocation11], 1568   ;;  %p11013_p9 = pmov %p11006_p0 }
  0xb3   : > { %p11014_p10 = pmov %p11006_p0 }
  0xb4   : > { %10254 = vsyncadd (%p11013_p9), [#allocation11], 4294965728 }
  0xb5   : > { %10256 = dma.done.wait (%p11014_p10), [#allocation14], 24640   ;;  %p11015_p11 = pmov %p11006_p0 }
  0xb6   : > { %p11016_p2 = pmov %p11006_p0 }
  0xb7   : > { %10258 = vsyncadd (%p11015_p11), [#allocation14], 4294942656 }
  0xb8   : > { %10260 = dma.done.wait (%p11016_p2), [#allocation17], 49920   ;;  %p11017_p3 = pmov %p11006_p0 }
  0xb9   : > { %p11018_p12 = pmov %p11006_p0 }
  0xba   : > { %10262 = vsyncadd (%p11017_p3), [#allocation17], 4294917376 }
  0xbb   : > { %10264 = dma.done.wait (%p11018_p12), [#allocation20], 64   ;;  %p11019_p13 = pmov %p11006_p0 }
  0xbc   : > { %p598_p0 = scmp.lt.s32.totalorder %s10367_s28, 1  ;;  %v8971_v0 = vld [vmem:[#allocation4 + $0x18] sm:$0xff]   ;;  %v8972_v1 = vld [vmem:[#allocation4 + $0x10] sm:$0xff]   ;;  %v8973_v2 = vld [vmem:[#allocation4 + $0x8] sm:$0xff]   ;;  %vm670_vm0 = vcmask 523264   ;;  %vm1427_vm1 = vcmask 261120  }
  0xbd   : > { %10266 = vsyncadd (%p11019_p13), [#allocation20], 4294967232  ;;  %8712 = vmatprep.subr.bf16.mxu0 %v8971_v0  ;;  %v8974_v4 = vld [vmem:[#allocation4] sm:$0xff]   ;;  %v8977_v5 = vld [vmem:[#allocation4 + $0x38] sm:$0xff]  }
  0xbe   : > { %s11021_s28 = smov (!%p598_p0, %s10367_s28), 1  ;;  %8713 = vmatpush3.bf16.msra.mxu0 %v8971_v0  ;;  %v8978_v7 = vld [vmem:[#allocation4 + $0x30] sm:$0xff]   ;;  %v8981_v9 = vld [vmem:[#allocation4 + $0x28] sm:$0xff]   ;;  %v8982_v11 = vld [vmem:[#allocation4 + $0x20] sm:$0xff]  }
  0xbf   : > { %s8650_s29 = sshll.u32 %s11021_s28, 5  ;;  %8714 = vmatprep.subr.bf16.mxu0 %v8972_v1  ;;  %v8983_v12 = vld [vmem:[#allocation4 + $0x58] sm:$0xff]   ;;  %v8984_v13 = vld [vmem:[#allocation4 + $0x50] sm:$0xff]   ;;  %v8985_v14 = vld [vmem:[#allocation4 + $0x48] sm:$0xff]   ;;  %s8651_s16 = sshll.u32 %s11021_s28, 6 }
  0xc0   : > { %s602_s27 = scalar_lea.vmem %s10984_s0, %s8650_s29  ;;  %v8986_v15 = vld [vmem:[#allocation4 + $0x40] sm:$0xff]   ;;  %v749_v31 = vld [vmem:[#allocation2 + $0x8] sm:$0xff]  ;;  %v750_v32 = vld [vmem:[#allocation2 + $0x10] sm:$0xff]  ;;  %s607_s22 = scalar_lea.vmem %s10997_s13, %s8651_s16 }
  0xc1   : > { %v8975_v3 = vld [vmem:[%s602_s27] sm:$0xff]   ;;  %v8976_v6 = vld [vmem:[%s602_s27 + $0x8] sm:$0xff]   ;;  %v8979_v8 = vld [vmem:[%s602_s27 + $0x10] sm:$0xff]  }
  0xc2   : > { %8720 = vmatprep.mubr.msk.bf16.mxu0 %vm670_vm0, %v8975_v3  ;;  %8715 = vmatpush3.bf16.msra.mxu0 %v8972_v1  ;;  %v8980_v10 = vld [vmem:[%s602_s27 + $0x18] sm:$0xff]   ;;  %v748_v16 = vld [vmem:[#allocation2] sm:$0xff]  ;;  %v959_v43 = vld [vmem:[#allocation2 + $0x28] sm:$0xff] }
  0xc3   : > { %8716 = vmatprep.subr.bf16.mxu0 %v8973_v2  ;;  %8744 = vmatprep.mubr.msk.f32.mxu1 %vm670_vm0, %v748_v16  ;;  %v751_v35 = vld [vmem:[#allocation2 + $0x18] sm:$0xff]  ;;  %v958_v36 = vld [vmem:[#allocation2 + $0x20] sm:$0xff]  ;;  %v960_v44 = vld [vmem:[#allocation2 + $0x30] sm:$0xff] }
  0xc4   : > { %v961_v46 = vld [vmem:[#allocation2 + $0x38] sm:$0xff]  ;;  %v1162_v47 = vld [vmem:[#allocation2 + $0x40] sm:$0xff]  ;;  %v1163_v49 = vld [vmem:[#allocation2 + $0x48] sm:$0xff] }
  0xc5   : > { %v1164_v50 = vld [vmem:[#allocation2 + $0x50] sm:$0xff]  ;;  %v1165_v51 = vld [vmem:[#allocation2 + $0x58] sm:$0xff]  ;;  %v8990_v54 = vld [vmem:[#allocation9 + $0x60] ss:$8 sps:$4 sm:$0xff]  }
  0xc6   : > { %8717 = vmatpush3.bf16.msra.mxu0 %v8973_v2  ;;  %v8987_v52 = vld [vmem:[#allocation9 + $0x70] ss:$8 sps:$4 sm:$0xff]   ;;  %v8989_v53 = vld [vmem:[#allocation9 + $0x74] ss:$8 sps:$4 sm:$0xff]   ;;  %v8992_v55 = vld [vmem:[#allocation9 + $0x64] ss:$8 sps:$4 sm:$0xff]  }
  0xc7   : > { %8718 = vmatprep.subr.bf16.mxu0 %v8974_v4  ;;  %v8995_v56 = vld [vmem:[#allocation9 + $0x54] ss:$8 sps:$4 sm:$0xff]   ;;  %v8993_v57 = vld [vmem:[#allocation9 + $0x50] ss:$8 sps:$4 sm:$0xff]   ;;  %v8998_v58 = vld [vmem:[#allocation9 + $0x44] ss:$8 sps:$4 sm:$0xff]  }
  0xc8   : > { %v8996_v59 = vld [vmem:[#allocation9 + $0x40] ss:$8 sps:$4 sm:$0xff]   ;;  %v8999_v60 = vld [vmem:[#allocation9 + $0x30] ss:$8 sps:$4 sm:$0xff]   ;;  %v9001_v61 = vld [vmem:[#allocation9 + $0x34] ss:$8 sps:$4 sm:$0xff]  }
  0xc9   : > { %v9004_v62 = vld [vmem:[#allocation9 + $0x24] ss:$8 sps:$4 sm:$0xff]   ;;  %v9002_v63 = vld [vmem:[#allocation9 + $0x20] ss:$8 sps:$4 sm:$0xff]   ;;  %v9007_v0 = vld [vmem:[#allocation9 + $0x14] ss:$8 sps:$4 sm:$0xff]  }
  0xca   : > { %8719 = vmatpush3.bf16.msra.mxu0 %v8974_v4  ;;  %v9005_v1 = vld [vmem:[#allocation9 + $0x10] ss:$8 sps:$4 sm:$0xff]   ;;  %v9010_v2 = vld [vmem:[#allocation9 + $0x4] ss:$8 sps:$4 sm:$0xff]   ;;  %v10289_v4 = vmov 0  }
  0xcb   : > { %8750 = vmatprep.subr.bf16.mxu0 %v8977_v5 }
  0xcd   : > { %8721 = vmatmul.mubr.msk.bf16.vlgmr.msra.gmra.mxu0 %vm670_vm0, %v8976_v6 }
  0xce   : > { %8751 = vmatpush3.bf16.msra.mxu0 %v8977_v5  ;;  %8724 = vmatprep.mubr.msk.bf16.mxu0 %vm670_vm0, %v8979_v8 }
  0xcf   : > { %8752 = vmatprep.subr.bf16.mxu0 %v8978_v7 }
  0xd2   : > { %8753 = vmatpush3.bf16.msra.mxu0 %v8978_v7 }
  0xd3   : > { %8754 = vmatprep.subr.bf16.mxu0 %v8981_v9 }
  0xd5   : > { %8725 = vmatmul.mubr.msk.bf16.gmra.mxu0 %vm670_vm0, %v8980_v10 }
  0xd6   : > { %8755 = vmatpush3.bf16.msra.mxu0 %v8981_v9  ;;  %8758 = vmatprep.mubr.msk.bf16.mxu0 %vm670_vm0, %v8975_v3 }
  0xd7   : > { %8756 = vmatprep.subr.bf16.mxu0 %v8982_v11 }
  0xda   : > { %8757 = vmatpush3.bf16.msra.mxu0 %v8982_v11  ;;  %v7951_v11 = vld [vmem:[#allocation6] ss:$0 sm:$0xff] }
  0xdb   : > { %8788 = vmatprep.subr.bf16.mxu0 %v8983_v12 }
  0xdd   : > { %8759 = vmatmul.mubr.msk.bf16.vlgmr.msra.gmra.mxu0 %vm670_vm0, %v8976_v6 }
  0xde   : > { %8789 = vmatpush3.bf16.msra.mxu0 %v8983_v12  ;;  %8762 = vmatprep.mubr.msk.bf16.mxu0 %vm670_vm0, %v8979_v8 }
  0xdf   : > { %8790 = vmatprep.subr.bf16.mxu0 %v8984_v13 }
  0xe2   : > { %8791 = vmatpush3.bf16.msra.mxu0 %v8984_v13 }
  0xe3   : > { %8792 = vmatprep.subr.bf16.mxu0 %v8985_v14 }
  0xe5   : > { %8763 = vmatmul.mubr.msk.bf16.gmra.mxu0 %vm670_vm0, %v8980_v10 }
  0xe6   : > { %8793 = vmatpush3.bf16.msra.mxu0 %v8985_v14  ;;  %8796 = vmatprep.mubr.msk.bf16.mxu0 %vm670_vm0, %v8975_v3  ;;  %v9008_v3 = vld [vmem:[#allocation9] ss:$8 sps:$4 sm:$0xff]  }
  0xe7   : > { %8794 = vmatprep.subr.bf16.mxu0 %v8986_v15 }
  0xea   : > { %8795 = vmatpush3.bf16.msra.mxu0 %v8986_v15 }
  0xeb   : > { %1370 = vmatprep.subr.bf16.mxu0 %v8989_v53  ;;  %v1425_v53 = vld [vmem:[#allocation7 + $0x10] sm:$0xff] }
  0xed   : > { %8797 = vmatmul.mubr.msk.bf16.vlgmr.msra.gmra.mxu0 %vm670_vm0, %v8976_v6 }
  0xee   : > { %8800 = vmatprep.mubr.msk.bf16.mxu0 %vm670_vm0, %v8979_v8  ;;  %1371 = vmatpush1.bf16.msra.mxu0 %v8987_v52  ;;  %v9017_v52 = vld [vmem:[#allocation9 + $0xd0] ss:$8 sps:$4 sm:$0xff]  }
  0xef   : > { %1372 = vmatprep.subr.bf16.mxu0 %v8992_v55  ;;  %v9020_v55 = vld [vmem:[#allocation9 + $0xc0] ss:$8 sps:$4 sm:$0xff]  }
  0xf2   : > { %1373 = vmatpush1.bf16.msra.mxu0 %v8990_v54  ;;  %v9022_v54 = vld [vmem:[#allocation9 + $0xc4] ss:$8 sps:$4 sm:$0xff]  }
  0xf3   : > { %1374 = vmatprep.subr.bf16.mxu0 %v8995_v56  ;;  %v1426_v56 = vld [vmem:[#allocation7 + $0x18] sm:$0xff] }
  0xf5   : > { %8801 = vmatmul.mubr.msk.bf16.gmra.mxu0 %vm670_vm0, %v8980_v10 }
  0xf6   : > { %1375 = vmatpush1.bf16.msra.mxu0 %v8993_v57  ;;  %1402 = vmatprep.mubr.bf16.mxu0 %v10289_v4  ;;  %v9025_v57 = vld [vmem:[#allocation9 + $0xb4] ss:$8 sps:$4 sm:$0xff]  }
  0xf7   : > { %1376 = vmatprep.subr.bf16.mxu0 %v8998_v58  ;;  %v9023_v58 = vld [vmem:[#allocation9 + $0xb0] ss:$8 sps:$4 sm:$0xff]  }
  0xfa   : > { %1377 = vmatpush1.bf16.msra.mxu0 %v8996_v59  ;;  %v9028_v59 = vld [vmem:[#allocation9 + $0xa4] ss:$8 sps:$4 sm:$0xff]  }
  0xfb   : > { %1378 = vmatprep.subr.bf16.mxu0 %v9001_v61  ;;  %v9031_v61 = vld [vmem:[#allocation9 + $0x94] ss:$8 sps:$4 sm:$0xff]  }
  0xfe   : > { %1379 = vmatpush1.bf16.msra.mxu0 %v8999_v60  ;;  %v9026_v60 = vld [vmem:[#allocation9 + $0xa0] ss:$8 sps:$4 sm:$0xff]  }
  0xff   : > { %1380 = vmatprep.subr.bf16.mxu0 %v9004_v62  ;;  %v9029_v62 = vld [vmem:[#allocation9 + $0x90] ss:$8 sps:$4 sm:$0xff]  }
 0x102   : > { %1381 = vmatpush1.bf16.msra.mxu0 %v9002_v63  ;;  %v9034_v63 = vld [vmem:[#allocation9 + $0x84] ss:$8 sps:$4 sm:$0xff]  }
 0x103   : > { %1382 = vmatprep.subr.bf16.mxu0 %v9007_v0  ;;  %v9032_v0 = vld [vmem:[#allocation9 + $0x80] ss:$8 sps:$4 sm:$0xff]  }
 0x106   : > { %1383 = vmatpush1.bf16.msra.mxu0 %v9005_v1  ;;  %v9037_v1 = vld [vmem:[#allocation9 + $0x174] ss:$8 sps:$4 sm:$0xff]  }
 0x107   : > { %1384 = vmatprep.subr.bf16.mxu0 %v9010_v2  ;;  %v9035_v2 = vld [vmem:[#allocation9 + $0x170] ss:$8 sps:$4 sm:$0xff]  }
 0x10a   : > { %1385 = vmatpush1.bf16.msra.mxu0 %v9008_v3  ;;  %v9040_v3 = vld [vmem:[#allocation9 + $0x164] ss:$8 sps:$4 sm:$0xff]  }
 0x18d   : > { %v8722_v17 = vpop.f32.mrf.mxu0 }
 0x18f   : > { %v717_v18 = vpop.f32.mrf.mxu0 }
 0x191   : > { %v8723_v19 = vpop.f32.mrf.mxu0 }
 0x193   : > { %v720_v20 = vpop.f32.mrf.mxu0 }
 0x195   : > { %v8726_v21 = vpop.f32.mrf.mxu0 }
 0x197   : > { %v733_v22 = vpop.f32.mrf.mxu0 }
 0x199   : > { %v8727_v23 = vpop.f32.mrf.mxu0 }
 0x19a   : > { %8728 = vmatprep.subr.mxu1 %v8727_v23 }
 0x19b   : > { %v736_v24 = vpop.f32.mrf.mxu0  ;;  %8729 = vmatpush3.msra.mxu1 %v8727_v23 }
 0x19c   : > { %8730 = vmatprep.subr.mxu1 %v8726_v21 }
 0x19d   : > { %8731 = vmatpush3.msra.mxu1 %v8726_v21  ;;  %v8760_v25 = vpop.f32.mrf.mxu0 }
 0x19e   : > { %8732 = vmatprep.subr.mxu1 %v736_v24 }
 0x19f   : > { %8733 = vmatpush3.msra.mxu1 %v736_v24  ;;  %v926_v26 = vpop.f32.mrf.mxu0 }
 0x1a0   : > { %8734 = vmatprep.subr.mxu1 %v733_v22 }
 0x1a1   : > { %8735 = vmatpush3.msra.mxu1 %v733_v22  ;;  %v8761_v27 = vpop.f32.mrf.mxu0 }
 0x1a2   : > { %8736 = vmatprep.subr.mxu1 %v8723_v19 }
 0x1a3   : > { %8737 = vmatpush3.msra.mxu1 %v8723_v19  ;;  %v929_v28 = vpop.f32.mrf.mxu0 }
 0x1a4   : > { %8738 = vmatprep.subr.mxu1 %v8722_v17 }
 0x1a5   : > { %8739 = vmatpush3.msra.mxu1 %v8722_v17  ;;  %v8764_v29 = vpop.f32.mrf.mxu0 }
 0x1a6   : > { %8740 = vmatprep.subr.mxu1 %v720_v20 }
 0x1a7   : > { %8741 = vmatpush3.msra.mxu1 %v720_v20  ;;  %v942_v30 = vpop.f32.mrf.mxu0 }
 0x1a8   : > { %8742 = vmatprep.subr.mxu1 %v717_v18 }
 0x1a9   : > { %8743 = vmatpush3.msra.mxu1 %v717_v18  ;;  %v8765_v33 = vpop.f32.mrf.mxu0 }
 0x1aa   : > { %8745 = vmatmul.mubr.msk.f32.vlgmr.msra.gmra.mxu1 %vm670_vm0, %v749_v31  ;;  %8766 = vmatprep.subr.mxu1 %v8765_v33 }
 0x1ab   : > { %v945_v34 = vpop.f32.mrf.mxu0  ;;  %8767 = vmatpush3.msra.mxu1 %v8765_v33  ;;  %8747 = vmatprep.mubr.msk.f32.mxu1 %vm670_vm0, %v750_v32 }
 0x1ac   : > { %8768 = vmatprep.subr.mxu1 %v8764_v29 }
 0x1ad   : > { %8769 = vmatpush3.msra.mxu1 %v8764_v29  ;;  %v8798_v37 = vpop.f32.mrf.mxu0 }
 0x1ae   : > { %8770 = vmatprep.subr.mxu1 %v945_v34  ;;  %8748 = vmatmul.mubr.msk.f32.gmra.mxu1 %vm670_vm0, %v751_v35 }
 0x1af   : > { %8771 = vmatpush3.msra.mxu1 %v945_v34  ;;  %v1130_v38 = vpop.f32.mrf.mxu0  ;;  %8782 = vmatprep.mubr.msk.f32.mxu1 %vm670_vm0, %v958_v36  ;;  %v10290_v36 = vmov 0.0  }
 0x1b0   : > { %8772 = vmatprep.subr.mxu1 %v942_v30 }
 0x1b1   : > { %8773 = vmatpush3.msra.mxu1 %v942_v30  ;;  %v8799_v39 = vpop.f32.mrf.mxu0 }
 0x1b2   : > { %8774 = vmatprep.subr.mxu1 %v8761_v27 }
 0x1b3   : > { %8775 = vmatpush3.msra.mxu1 %v8761_v27  ;;  %v1133_v40 = vpop.f32.mrf.mxu0 }
 0x1b4   : > { %8776 = vmatprep.subr.mxu1 %v8760_v25 }
 0x1b5   : > { %8777 = vmatpush3.msra.mxu1 %v8760_v25  ;;  %v8802_v41 = vpop.f32.mrf.mxu0 }
 0x1b6   : > { %8778 = vmatprep.subr.mxu1 %v929_v28 }
 0x1b7   : > { %8779 = vmatpush3.msra.mxu1 %v929_v28  ;;  %v1146_v42 = vpop.f32.mrf.mxu0 }
 0x1b8   : > { %8780 = vmatprep.subr.mxu1 %v926_v26 }
 0x1b9   : > { %8781 = vmatpush3.msra.mxu1 %v926_v26  ;;  %v8803_v45 = vpop.f32.mrf.mxu0 }
 0x1ba   : > { %8783 = vmatmul.mubr.msk.f32.vlgmr.msra.gmra.mxu1 %vm670_vm0, %v959_v43  ;;  %8804 = vmatprep.subr.mxu1 %v8803_v45 }
 0x1bb   : > { %8805 = vmatpush3.msra.mxu1 %v8803_v45  ;;  %8785 = vmatprep.mubr.msk.f32.mxu1 %vm670_vm0, %v960_v44  ;;  %v1149_v48 = vpop.f32.mrf.mxu0  ;;  %v9013_v45 = vld [vmem:[#allocation9 + $0xf4] ss:$8 sps:$4 sm:$0xff]  }
 0x1bc   : > { %8806 = vmatprep.subr.mxu1 %v8802_v41 }
 0x1bd   : > { %8807 = vmatpush3.msra.mxu1 %v8802_v41 }
 0x1be   : > { %8786 = vmatmul.mubr.msk.f32.gmra.mxu1 %vm670_vm0, %v961_v46  ;;  %8808 = vmatprep.subr.mxu1 %v1149_v48  ;;  %v1423_v46 = vld [vmem:[#allocation7] sm:$0xff] }
 0x1bf   : > { %8809 = vmatpush3.msra.mxu1 %v1149_v48  ;;  %8820 = vmatprep.mubr.msk.f32.mxu1 %vm670_vm0, %v1162_v47  ;;  %v9011_v47 = vld [vmem:[#allocation9 + $0xf0] ss:$8 sps:$4 sm:$0xff]   ;;  %v9016_v48 = vld [vmem:[#allocation9 + $0xe4] ss:$8 sps:$4 sm:$0xff]  }
 0x1c0   : > { %8810 = vmatprep.subr.mxu1 %v1146_v42 }
 0x1c1   : > { %8811 = vmatpush3.msra.mxu1 %v1146_v42 }
 0x1c2   : > { %8812 = vmatprep.subr.mxu1 %v8799_v39 }
 0x1c3   : > { %8813 = vmatpush3.msra.mxu1 %v8799_v39 }
 0x1c4   : > { %8814 = vmatprep.subr.mxu1 %v8798_v37 }
 0x1c5   : > { %8815 = vmatpush3.msra.mxu1 %v8798_v37 }
 0x1c6   : > { %8816 = vmatprep.subr.mxu1 %v1133_v40 }
 0x1c7   : > { %8817 = vmatpush3.msra.mxu1 %v1133_v40 }
 0x1c8   : > { %8818 = vmatprep.subr.mxu1 %v1130_v38 }
 0x1c9   : > { %8819 = vmatpush3.msra.mxu1 %v1130_v38 }
 0x1ca   : > { %8821 = vmatmul.mubr.msk.f32.vlgmr.msra.gmra.mxu1 %vm670_vm0, %v1163_v49  ;;  %v9014_v49 = vld [vmem:[#allocation9 + $0xe0] ss:$8 sps:$4 sm:$0xff]  }
 0x1cb   : > { %8823 = vmatprep.mubr.msk.f32.mxu1 %vm670_vm0, %v1164_v50  ;;  %v1424_v50 = vld [vmem:[#allocation7 + $0x8] sm:$0xff] }
 0x1ce   : > { %8824 = vmatmul.mubr.msk.f32.gmra.mxu1 %vm670_vm0, %v1165_v51  ;;  %v9019_v51 = vld [vmem:[#allocation9 + $0xd4] ss:$8 sps:$4 sm:$0xff]  }
 0x1cf   : > { %1504 = vmatprep.mubr.f32.mxu1 %v10290_v36 }
 0x26a   : > { %v8746_v5 = vpop.f32.mrf.mxu1 }
 0x26b   : > { %v856_v13 = vadd.f32 %v8746_v5, %v7951_v11  ;;  %v9038_v5 = vld [vmem:[#allocation9 + $0x160] ss:$8 sps:$4 sm:$0xff]  }
 0x26c   : > { %v830_v6 = vpop.f32.mrf.mxu1 }
 0x26d   : > { %v855_v15 = vadd.f32 %v7951_v11, %v830_v6  ;;  %v9043_v6 = vld [vmem:[#allocation9 + $0x154] ss:$8 sps:$4 sm:$0xff]  }
 0x26e   : > { %v8749_v7 = vpop.f32.mrf.mxu1 }
 0x26f   : > { %v858_v24 = vadd.f32 %v8749_v7, %v7951_v11  ;;  %v9041_v7 = vld [vmem:[#allocation9 + $0x150] ss:$8 sps:$4 sm:$0xff]  }
 0x270   : > { %v840_v8 = vpop.f32.mrf.mxu1 }
 0x271   : > { %v857_v21 = vadd.f32 %v7951_v11, %v840_v8  ;;  %v9046_v8 = vld [vmem:[#allocation9 + $0x144] ss:$8 sps:$4 sm:$0xff]   ;;  %v9047_v11 = vld [vmem:[#allocation9 + $0x130] ss:$8 sps:$4 sm:$0xff]  }
 0x27a   : > { %v8784_v9 = vpop.f32.mrf.mxu1 }
 0x27b   : > { %v1060_v16 = vadd.f32 %v8784_v9, %v856_v13  ;;  %v9044_v9 = vld [vmem:[#allocation9 + $0x140] ss:$8 sps:$4 sm:$0xff]  }
 0x27c   : > { %v1040_v10 = vpop.f32.mrf.mxu1  ;;  %v9050_v13 = vld [vmem:[#allocation9 + $0x120] ss:$8 sps:$4 sm:$0xff]  }
 0x27d   : > { %v1059_v18 = vadd.f32 %v1040_v10, %v855_v15  ;;  %v9049_v10 = vld [vmem:[#allocation9 + $0x134] ss:$8 sps:$4 sm:$0xff]   ;;  %v9053_v15 = vld [vmem:[#allocation9 + $0x110] ss:$8 sps:$4 sm:$0xff]  }
 0x27e   : > { %v8787_v12 = vpop.f32.mrf.mxu1 }
 0x27f   : > { %v1062_v29 = vadd.f32 %v8787_v12, %v858_v24  ;;  %v9052_v12 = vld [vmem:[#allocation9 + $0x124] ss:$8 sps:$4 sm:$0xff]  }
 0x280   : > { %v1050_v14 = vpop.f32.mrf.mxu1  ;;  %v9082_v24 = vld [vmem:[#allocation13 + $0x8c] ss:$16 sps:$4 sm:$0xff]  }
 0x281   : > { %v1061_v25 = vadd.f32 %v1050_v14, %v857_v21  ;;  %v9055_v14 = vld [vmem:[#allocation9 + $0x114] ss:$8 sps:$4 sm:$0xff]  }
 0x282   : > { %v9068_v21 = vld [vmem:[#allocation13 + $0xc8] ss:$16 sps:$4 sm:$0xff]  }
 0x28a   : > { %v8822_v17 = vpop.f32.mrf.mxu1 }
 0x28b   : > { %v1264_v19 = vadd.f32 %v8822_v17, %v1060_v16  ;;  %v9058_v16 = vld [vmem:[#allocation9 + $0x104] ss:$8 sps:$4 sm:$0xff]   ;;  %v9056_v17 = vld [vmem:[#allocation9 + $0x100] ss:$8 sps:$4 sm:$0xff]  }
 0x28c   : > { %v1244_v20 = vpop.f32.mrf.mxu1 }
 0x28d   : > { %v1263_v22 = vadd.f32 %v1244_v20, %v1059_v18  ;;  %v1268_v26 = vmax.f32 %v1264_v19, 0.0  ;;  %v9062_v18 = vld [vmem:[#allocation13 + $0xe8] ss:$16 sps:$4 sm:$0xff]   ;;  %v9064_v19 = vld [vmem:[#allocation13 + $0xec] ss:$16 sps:$4 sm:$0xff]  }
 0x28e   : > { %v8825_v23 = vpop.f32.mrf.mxu1  ;;  %v9070_v20 = vld [vmem:[#allocation13 + $0xcc] ss:$16 sps:$4 sm:$0xff]  }
 0x28f   : > { %v1267_v27 = vmax.f32 %v1263_v22, 0.0  ;;  %v1266_v32 = vadd.f32 %v8825_v23, %v1062_v29  ;;  %v9076_v22 = vld [vmem:[#allocation13 + $0xac] ss:$16 sps:$4 sm:$0xff]   ;;  %v9074_v23 = vld [vmem:[#allocation13 + $0xa8] ss:$16 sps:$4 sm:$0xff]  }
 0x290   : > { %v1254_v28 = vpop.f32.mrf.mxu1 }
 0x291   : > { %v10572_v30 = vpack.c.bf16 %v1268_v26, %v1267_v27  ;;  %v1265_v31 = vadd.f32 %v1254_v28, %v1061_v25  ;;  %v1270_v34 = vmax.f32 %v1266_v32, 0.0  ;;  %v9080_v25 = vld [vmem:[#allocation13 + $0x88] ss:$16 sps:$4 sm:$0xff]   ;;  %v9088_v26 = vld [vmem:[#allocation13 + $0x6c] ss:$16 sps:$4 sm:$0xff]  }
 0x293   : > { %1403 = vmatmul.mubr.bf16.vlgmr.msra.gmra.mxu0 %v10572_v30  ;;  %v1269_v33 = vmax.f32 %v1265_v31, 0.0 }
 0x294   : > { %1412 = vmatprep.mubr.bf16.mxu0 %v10289_v4 }
 0x295   : > { %v10576_v35 = vpack.c.bf16 %v1270_v34, %v1269_v33 }
 0x29b   : > { %1413 = vmatmul.mubr.bf16.gmra.mxu0 %v10576_v35 }
 0x29c   : > { %1779 = vmatprep.mubr.f32.mxu0 %v10290_v36 }
 0x353   : > { %v1404_v37 = vpop.f32.mrf.mxu0 }
 0x355   : > { %v1406_v38 = vpop.f32.mrf.mxu0 }
 0x357   : > { %v1408_v39 = vpop.f32.mrf.mxu0 }
 0x359   : > { %v1410_v40 = vpop.f32.mrf.mxu0 }
 0x35b   : > { %v1414_v41 = vpop.f32.mrf.mxu0 }
 0x35d   : > { %v1416_v42 = vpop.f32.mrf.mxu0 }
 0x35f   : > { %v1418_v43 = vpop.f32.mrf.mxu0 }
 0x361   : > { %v1420_v44 = vpop.f32.mrf.mxu0 }
 0x362   : > { %1464 = vmatprep.subr.mxu1 %v1420_v44  ;;  %v1699_v44 = vld [vmem:[#allocation7 + $0x20] sm:$0xff] }
 0x363   : > { %1465 = vmatpush1.msra.mxu1 %v1418_v43 }
 0x364   : > { %1466 = vmatprep.subr.mxu1 %v1416_v42 }
 0x365   : > { %1467 = vmatpush1.msra.mxu1 %v1414_v41 }
 0x366   : > { %1468 = vmatprep.subr.mxu1 %v1410_v40 }
 0x367   : > { %1469 = vmatpush1.msra.mxu1 %v1408_v39 }
 0x368   : > { %1470 = vmatprep.subr.mxu1 %v1406_v38 }
 0x369   : > { %1471 = vmatpush1.msra.mxu1 %v1404_v37 }
 0x36a   : > { %7992 = vmatmul.mubr.msk.f32.vlgmr.msra.gmra.mxu1 %vm1427_vm1, %v1423_v46  ;;  %1645 = vmatprep.subr.bf16.mxu1 %v9013_v45  ;;  %v1700_v45 = vld [vmem:[#allocation7 + $0x28] sm:$0xff]  ;;  %v1701_v46 = vld [vmem:[#allocation7 + $0x30] sm:$0xff] }
 0x36b   : > { %1646 = vmatpush1.bf16.msra.mxu1 %v9011_v47  ;;  %1510 = vmatprep.mubr.f32.mxu1 %v10290_v36 }
 0x36c   : > { %1647 = vmatprep.subr.bf16.mxu1 %v9016_v48  ;;  %v1702_v48 = vld [vmem:[#allocation7 + $0x38] sm:$0xff] }
 0x36e   : > { %7993 = vmatmul.mubr.msk.f32.gmra.mxu1 %vm1427_vm1, %v1424_v50 }
 0x36f   : > { %1648 = vmatpush1.bf16.msra.mxu1 %v9014_v49  ;;  %1516 = vmatprep.mubr.f32.mxu1 %v10290_v36 }
 0x370   : > { %1649 = vmatprep.subr.bf16.mxu1 %v9019_v51 }
 0x372   : > { %7994 = vmatmul.mubr.msk.f32.gmra.mxu1 %vm1427_vm1, %v1425_v53 }
 0x373   : > { %1650 = vmatpush1.bf16.msra.mxu1 %v9017_v52  ;;  %1522 = vmatprep.mubr.f32.mxu1 %v10290_v36 }
 0x374   : > { %1651 = vmatprep.subr.bf16.mxu1 %v9022_v54 }
 0x376   : > { %7995 = vmatmul.mubr.msk.f32.gmra.mxu1 %vm1427_vm1, %v1426_v56  ;;  %v9061_v56 = vld [vmem:[#allocation13 + $0xe4] ss:$16 sps:$4 sm:$0xff]  }
 0x377   : > { %1652 = vmatpush1.bf16.msra.mxu1 %v9020_v55  ;;  %1677 = vmatprep.mubr.bf16.mxu1 %v10289_v4 }
 0x378   : > { %1653 = vmatprep.subr.bf16.mxu1 %v9025_v57  ;;  %v1963_v57 = vld [vmem:[#allocation7 + $0x40] sm:$0xff] }
 0x37b   : > { %1654 = vmatpush1.bf16.msra.mxu1 %v9023_v58  ;;  %v9059_v58 = vld [vmem:[#allocation13 + $0xe0] ss:$16 sps:$4 sm:$0xff]  }
 0x37c   : > { %1655 = vmatprep.subr.bf16.mxu1 %v9028_v59  ;;  %v9067_v59 = vld [vmem:[#allocation13 + $0xc4] ss:$16 sps:$4 sm:$0xff]  }
 0x37f   : > { %1656 = vmatpush1.bf16.msra.mxu1 %v9026_v60  ;;  %v1964_v60 = vld [vmem:[#allocation7 + $0x48] sm:$0xff] }
 0x380   : > { %1657 = vmatprep.subr.bf16.mxu1 %v9031_v61  ;;  %v9065_v61 = vld [vmem:[#allocation13 + $0xc0] ss:$16 sps:$4 sm:$0xff]  }
 0x383   : > { %1658 = vmatpush1.bf16.msra.mxu1 %v9029_v62  ;;  %v9073_v62 = vld [vmem:[#allocation13 + $0xa4] ss:$16 sps:$4 sm:$0xff]  }
 0x384   : > { %1659 = vmatprep.subr.bf16.mxu1 %v9034_v63  ;;  %v1965_v63 = vld [vmem:[#allocation7 + $0x50] sm:$0xff] }
 0x387   : > { %1660 = vmatpush1.bf16.msra.mxu1 %v9032_v0  ;;  %v9071_v0 = vld [vmem:[#allocation13 + $0xa0] ss:$16 sps:$4 sm:$0xff]  }
 0x388   : > { %1909 = vmatprep.subr.bf16.mxu1 %v9037_v1  ;;  %v9079_v1 = vld [vmem:[#allocation13 + $0x84] ss:$16 sps:$4 sm:$0xff]  }
 0x38a   : > { %1678 = vmatmul.mubr.bf16.vlgmr.msra.gmra.mxu1 %v10572_v30 }
 0x38b   : > { %1910 = vmatpush1.bf16.msra.mxu1 %v9035_v2  ;;  %1687 = vmatprep.mubr.bf16.mxu1 %v10289_v4  ;;  %v1966_v2 = vld [vmem:[#allocation7 + $0x58] sm:$0xff] }
 0x38c   : > { %1911 = vmatprep.subr.bf16.mxu1 %v9040_v3  ;;  %v9077_v3 = vld [vmem:[#allocation13 + $0x80] ss:$16 sps:$4 sm:$0xff]  }
 0x38f   : > { %1912 = vmatpush1.bf16.msra.mxu1 %v9038_v5  ;;  %v9085_v5 = vld [vmem:[#allocation13 + $0x64] ss:$16 sps:$4 sm:$0xff]  }
 0x390   : > { %1913 = vmatprep.subr.bf16.mxu1 %v9043_v6  ;;  %v9083_v6 = vld [vmem:[#allocation13 + $0x60] ss:$16 sps:$4 sm:$0xff]  }
 0x392   : > { %1688 = vmatmul.mubr.bf16.gmra.mxu1 %v10576_v35 }
 0x393   : > { %1914 = vmatpush1.bf16.msra.mxu1 %v9041_v7  ;;  %1941 = vmatprep.mubr.bf16.mxu1 %v10289_v4  ;;  %v9091_v7 = vld [vmem:[#allocation13 + $0x44] ss:$16 sps:$4 sm:$0xff]  }
 0x394   : > { %1915 = vmatprep.subr.bf16.mxu1 %v9046_v8  ;;  %v9094_v8 = vld [vmem:[#allocation13 + $0x4c] ss:$16 sps:$4 sm:$0xff]  }
 0x397   : > { %1916 = vmatpush1.bf16.msra.mxu1 %v9044_v9  ;;  %v9089_v9 = vld [vmem:[#allocation13 + $0x40] ss:$16 sps:$4 sm:$0xff]  }
 0x398   : > { %1917 = vmatprep.subr.bf16.mxu1 %v9049_v10  ;;  %v9092_v10 = vld [vmem:[#allocation13 + $0x48] ss:$16 sps:$4 sm:$0xff]  }
 0x39b   : > { %1918 = vmatpush1.bf16.msra.mxu1 %v9047_v11  ;;  %v9097_v11 = vld [vmem:[#allocation13 + $0x24] ss:$16 sps:$4 sm:$0xff]  }
 0x39c   : > { %1919 = vmatprep.subr.bf16.mxu1 %v9052_v12  ;;  %v9100_v12 = vld [vmem:[#allocation13 + $0x2c] ss:$16 sps:$4 sm:$0xff]  }
 0x39f   : > { %1920 = vmatpush1.bf16.msra.mxu1 %v9050_v13  ;;  %v9095_v13 = vld [vmem:[#allocation13 + $0x20] ss:$16 sps:$4 sm:$0xff]  }
 0x3a0   : > { %1921 = vmatprep.subr.bf16.mxu1 %v9055_v14  ;;  %v9098_v14 = vld [vmem:[#allocation13 + $0x28] ss:$16 sps:$4 sm:$0xff]  }
 0x3a3   : > { %1922 = vmatpush1.bf16.msra.mxu1 %v9053_v15  ;;  %v9103_v15 = vld [vmem:[#allocation13 + $0x4] ss:$16 sps:$4 sm:$0xff]  }
 0x3a4   : > { %1923 = vmatprep.subr.bf16.mxu1 %v9058_v16  ;;  %v9106_v16 = vld [vmem:[#allocation13 + $0xc] ss:$16 sps:$4 sm:$0xff]  }
 0x3a7   : > { %1924 = vmatpush1.bf16.msra.mxu1 %v9056_v17  ;;  %v9101_v17 = vld [vmem:[#allocation13] ss:$16 sps:$4 sm:$0xff]  }
 0x3a8   : > { %2526 = vmatprep.subr.bf16.mxu1 %v9064_v19  ;;  %v9109_v19 = vld [vmem:[#allocation13 + $0x1e4] ss:$16 sps:$4 sm:$0xff]  }
 0x3aa   : > { %1942 = vmatmul.mubr.bf16.vlgmr.msra.gmra.mxu1 %v10572_v30 }
 0x3ab   : > { %1951 = vmatprep.mubr.bf16.mxu1 %v10289_v4  ;;  %2527 = vmatpush1.bf16.msra.mxu1 %v9062_v18  ;;  %v9086_v4 = vld [vmem:[#allocation13 + $0x68] ss:$16 sps:$4 sm:$0xff]  }
 0x3ac   : > { %2528 = vmatprep.subr.bf16.mxu1 %v9070_v20  ;;  %v9104_v18 = vld [vmem:[#allocation13 + $0x8] ss:$16 sps:$4 sm:$0xff]   ;;  %v9112_v20 = vld [vmem:[#allocation13 + $0x1ec] ss:$16 sps:$4 sm:$0xff]  }
 0x3af   : > { %2529 = vmatpush1.bf16.msra.mxu1 %v9068_v21  ;;  %v9107_v21 = vld [vmem:[#allocation13 + $0x1e0] ss:$16 sps:$4 sm:$0xff]  }
 0x3b0   : > { %2530 = vmatprep.subr.bf16.mxu1 %v9076_v22  ;;  %v9110_v22 = vld [vmem:[#allocation13 + $0x1e8] ss:$16 sps:$4 sm:$0xff]  }
 0x3b2   : > { %1952 = vmatmul.mubr.bf16.gmra.mxu1 %v10576_v35 }
 0x3b3   : > { %2531 = vmatpush1.bf16.msra.mxu1 %v9074_v23  ;;  %v9113_v23 = vld [vmem:[#allocation13 + $0x1c0] ss:$16 sps:$4 sm:$0xff]  }
 0x3b4   : > { %2532 = vmatprep.subr.bf16.mxu1 %v9082_v24  ;;  %v9115_v24 = vld [vmem:[#allocation13 + $0x1c4] ss:$16 sps:$4 sm:$0xff]  }
 0x3b7   : > { %2533 = vmatpush1.bf16.msra.mxu1 %v9080_v25  ;;  %v9116_v25 = vld [vmem:[#allocation13 + $0x1c8] ss:$16 sps:$4 sm:$0xff]  }
 0x3b8   : > { %2534 = vmatprep.subr.bf16.mxu1 %v9088_v26  ;;  %v9118_v26 = vld [vmem:[#allocation13 + $0x1cc] ss:$16 sps:$4 sm:$0xff]  }
 0x3bb   : > { %2535 = vmatpush1.bf16.msra.mxu1 %v9086_v4  ;;  %v9121_v4 = vld [vmem:[#allocation13 + $0x1a4] ss:$16 sps:$4 sm:$0xff]  }
 0x3bc   : > { %2536 = vmatprep.subr.bf16.mxu1 %v9094_v8 }
 0x3bf   : > { %2537 = vmatpush1.bf16.msra.mxu1 %v9092_v10 }
 0x3c0   : > { %2538 = vmatprep.subr.bf16.mxu1 %v9100_v12 }
 0x3c3   : > { %2539 = vmatpush1.bf16.msra.mxu1 %v9098_v14 }
 0x3c4   : > { %2540 = vmatprep.subr.bf16.mxu1 %v9106_v16 }
 0x3c7   : > { %2541 = vmatpush1.bf16.msra.mxu1 %v9104_v18 }
 0x3c8   : > { %2542 = vmatprep.subr.bf16.mxu1 %v9112_v20 }
 0x3cb   : > { %2543 = vmatpush2.bf16.msra.mxu1 %v9110_v22 }
 0x3cc   : > { %2544 = vmatprep.subr.bf16.mxu1 %v9118_v26 }
 0x3cf   : > { %2545 = vmatpush2.bf16.msra.mxu1 %v9116_v25 }
 0x42a   : > { %v10596_v27 = vpop.f32.mrf.mxu1 }
 0x42c   : > { %v10598_v28 = vpop.f32.mrf.mxu1 }
 0x42e   : > { %v10600_v29 = vpop.f32.mrf.mxu1 }
 0x430   : > { %v10602_v30 = vpop.f32.mrf.mxu1 }
 0x432   : > { %v10604_v31 = vpop.f32.mrf.mxu1 }
 0x434   : > { %v10606_v32 = vpop.f32.mrf.mxu1 }
 0x436   : > { %v10608_v33 = vpop.f32.mrf.mxu1 }
 0x438   : > { %v10610_v34 = vpop.f32.mrf.mxu1 }
 0x44a   : > { %v1679_v35 = vpop.f32.mrf.mxu1 }
 0x44c   : > { %v1681_v37 = vpop.f32.mrf.mxu1 }
 0x44e   : > { %v1683_v38 = vpop.f32.mrf.mxu1 }
 0x450   : > { %v1685_v39 = vpop.f32.mrf.mxu1 }
 0x452   : > { %v1689_v40 = vpop.f32.mrf.mxu1 }
 0x454   : > { %v1691_v41 = vpop.f32.mrf.mxu1 }
 0x456   : > { %v1693_v42 = vpop.f32.mrf.mxu1 }
 0x458   : > { %v1695_v43 = vpop.f32.mrf.mxu1 }
 0x459   : > { %1739 = vmatprep.subr.mxu0 %v1695_v43  ;;  %v9133_v43 = vld [vmem:[#allocation13 + $0x164] ss:$16 sps:$4 sm:$0xff]  }
 0x45a   : > { %1740 = vmatpush1.msra.mxu0 %v1693_v42  ;;  %v9128_v42 = vld [vmem:[#allocation13 + $0x188] ss:$16 sps:$4 sm:$0xff]  }
 0x45b   : > { %1741 = vmatprep.subr.mxu0 %v1691_v41  ;;  %v9125_v41 = vld [vmem:[#allocation13 + $0x180] ss:$16 sps:$4 sm:$0xff]  }
 0x45c   : > { %1742 = vmatpush1.msra.mxu0 %v1689_v40  ;;  %v9130_v40 = vld [vmem:[#allocation13 + $0x18c] ss:$16 sps:$4 sm:$0xff]  }
 0x45d   : > { %1743 = vmatprep.subr.mxu0 %v1685_v39  ;;  %v9127_v39 = vld [vmem:[#allocation13 + $0x184] ss:$16 sps:$4 sm:$0xff]  }
 0x45e   : > { %1744 = vmatpush1.msra.mxu0 %v1683_v38  ;;  %v9122_v38 = vld [vmem:[#allocation13 + $0x1a8] ss:$16 sps:$4 sm:$0xff]  }
 0x45f   : > { %1745 = vmatprep.subr.mxu0 %v1681_v37  ;;  %v9119_v37 = vld [vmem:[#allocation13 + $0x1a0] ss:$16 sps:$4 sm:$0xff]  }
 0x460   : > { %1746 = vmatpush1.msra.mxu0 %v1679_v35  ;;  %v9124_v35 = vld [vmem:[#allocation13 + $0x1ac] ss:$16 sps:$4 sm:$0xff]  }
 0x461   : > { %8012 = vmatmul.mubr.msk.f32.vlgmr.msra.gmra.mxu0 %vm1427_vm1, %v1699_v44  ;;  %2546 = vmatprep.subr.bf16.mxu1 %v9124_v35  ;;  %v9136_v44 = vld [vmem:[#allocation13 + $0x16c] ss:$16 sps:$4 sm:$0xff]  }
 0x462   : > { %1785 = vmatprep.mubr.f32.mxu0 %v10290_v36  ;;  %2547 = vmatpush2.bf16.msra.mxu1 %v9122_v38 }
 0x463   : > { %2548 = vmatprep.subr.bf16.mxu1 %v9130_v40 }
 0x465   : > { %8013 = vmatmul.mubr.msk.f32.gmra.mxu0 %vm1427_vm1, %v1700_v45  ;;  %v9131_v45 = vld [vmem:[#allocation13 + $0x160] ss:$16 sps:$4 sm:$0xff]  }
 0x466   : > { %1791 = vmatprep.mubr.f32.mxu0 %v10290_v36  ;;  %2549 = vmatpush2.bf16.msra.mxu1 %v9128_v42 }
 0x467   : > { %2550 = vmatprep.subr.bf16.mxu1 %v9136_v44 }
 0x469   : > { %8014 = vmatmul.mubr.msk.f32.gmra.mxu0 %vm1427_vm1, %v1701_v46  ;;  %v9134_v46 = vld [vmem:[#allocation13 + $0x168] ss:$16 sps:$4 sm:$0xff]  }
 0x46a   : > { %v1943_v47 = vpop.f32.mrf.mxu1  ;;  %1797 = vmatprep.mubr.f32.mxu0 %v10290_v36  ;;  %2551 = vmatpush2.bf16.msra.mxu1 %v9134_v46 }
 0x46c   : > { %v1945_v49 = vpop.f32.mrf.mxu1 }
 0x46d   : > { %8015 = vmatmul.mubr.msk.f32.gmra.mxu0 %vm1427_vm1, %v1702_v48  ;;  %v9142_v48 = vld [vmem:[#allocation13 + $0x14c] ss:$16 sps:$4 sm:$0xff]  }
 0x46e   : > { %v1947_v50 = vpop.f32.mrf.mxu1  ;;  %2043 = vmatprep.mubr.f32.mxu0 %v10290_v36  ;;  %2552 = vmatprep.subr.bf16.mxu1 %v9142_v48 }
 0x470   : > { %v1949_v51 = vpop.f32.mrf.mxu1 }
 0x472   : > { %v1953_v52 = vpop.f32.mrf.mxu1 }
 0x474   : > { %v1955_v53 = vpop.f32.mrf.mxu1 }
 0x476   : > { %v1957_v54 = vpop.f32.mrf.mxu1 }
 0x478   : > { %v1959_v55 = vpop.f32.mrf.mxu1 }
 0x479   : > { %2003 = vmatprep.subr.mxu0 %v1959_v55  ;;  %v9151_v55 = vld [vmem:[#allocation13 + $0x104] ss:$16 sps:$4 sm:$0xff]  }
 0x47a   : > { %2004 = vmatpush1.msra.mxu0 %v1957_v54  ;;  %v9146_v54 = vld [vmem:[#allocation13 + $0x128] ss:$16 sps:$4 sm:$0xff]  }
 0x47b   : > { %2005 = vmatprep.subr.mxu0 %v1955_v53  ;;  %v9143_v53 = vld [vmem:[#allocation13 + $0x120] ss:$16 sps:$4 sm:$0xff]  }
 0x47c   : > { %2006 = vmatpush1.msra.mxu0 %v1953_v52  ;;  %v9148_v52 = vld [vmem:[#allocation13 + $0x12c] ss:$16 sps:$4 sm:$0xff]  }
 0x47d   : > { %2007 = vmatprep.subr.mxu0 %v1949_v51  ;;  %v9145_v51 = vld [vmem:[#allocation13 + $0x124] ss:$16 sps:$4 sm:$0xff]  }
 0x47e   : > { %2008 = vmatpush1.msra.mxu0 %v1947_v50  ;;  %v9140_v50 = vld [vmem:[#allocation13 + $0x148] ss:$16 sps:$4 sm:$0xff]  }
 0x47f   : > { %2009 = vmatprep.subr.mxu0 %v1945_v49  ;;  %v9137_v49 = vld [vmem:[#allocation13 + $0x140] ss:$16 sps:$4 sm:$0xff]   ;;  %2553 = vmatpush2.bf16.msra.mxu1 %v9140_v50 }
 0x480   : > { %2010 = vmatpush1.msra.mxu0 %v1943_v47  ;;  %v9139_v47 = vld [vmem:[#allocation13 + $0x144] ss:$16 sps:$4 sm:$0xff]   ;;  %2554 = vmatprep.subr.bf16.mxu1 %v9148_v52 }
 0x481   : > { %8032 = vmatmul.mubr.msk.f32.vlgmr.msra.gmra.mxu0 %vm1427_vm1, %v1963_v57  ;;  %2473 = vmatprep.subr.bf16.mxu0 %v9061_v56  ;;  %v9154_v56 = vld [vmem:[#allocation13 + $0x10c] ss:$16 sps:$4 sm:$0xff]   ;;  %v9149_v57 = vld [vmem:[#allocation13 + $0x100] ss:$16 sps:$4 sm:$0xff]  }
 0x482   : > { %2049 = vmatprep.mubr.f32.mxu0 %v10290_v36  ;;  %2474 = vmatpush1.bf16.msra.mxu0 %v9059_v58  ;;  %v9152_v58 = vld [vmem:[#allocation13 + $0x108] ss:$16 sps:$4 sm:$0xff]  }
 0x483   : > { %2475 = vmatprep.subr.bf16.mxu0 %v9067_v59  ;;  %2555 = vmatpush2.bf16.msra.mxu1 %v9146_v54 }
 0x484   : > { %2556 = vmatprep.subr.bf16.mxu1 %v9154_v56 }
 0x485   : > { %8033 = vmatmul.mubr.msk.f32.gmra.mxu0 %vm1427_vm1, %v1964_v60 }
 0x486   : > { %2055 = vmatprep.mubr.f32.mxu0 %v10290_v36  ;;  %2476 = vmatpush1.bf16.msra.mxu0 %v9065_v61 }
 0x487   : > { %2477 = vmatprep.subr.bf16.mxu0 %v9073_v62  ;;  %2557 = vmatpush2.bf16.msra.mxu1 %v9152_v58 }
 0x489   : > { %8034 = vmatmul.mubr.msk.f32.gmra.mxu0 %vm1427_vm1, %v1965_v63  ;;  %v1530_v63 = vlaneseq }
 0x48a   : > { %2061 = vmatprep.mubr.f32.mxu0 %v10290_v36  ;;  %2478 = vmatpush1.bf16.msra.mxu0 %v9071_v0 }
 0x48b   : > { %2479 = vmatprep.subr.bf16.mxu0 %v9079_v1  ;;  %v10627_v1 = vshrl.u32 %v1530_v63, 7 }
 0x48d   : > { %8035 = vmatmul.mubr.msk.f32.gmra.mxu0 %vm1427_vm1, %v1966_v2 }
 0x48e   : > { %2480 = vmatpush1.bf16.msra.mxu0 %v9077_v3  ;;  %v10630_v3 = vsub.s32 0, %v10627_v1 }
 0x48f   : > { %2481 = vmatprep.subr.bf16.mxu0 %v9085_v5  ;;  %v1273_v5 = vld [vmem:[#allocation10] sm:$0x3] }
 0x490   : > { %v1533_v8 = vrot.slane %v1273_v5, %v10630_v3 }
 0x492   : > { %2482 = vmatpush1.bf16.msra.mxu0 %v9083_v6  ;;  %v10633_v6 = vsub.s32 1, %v10627_v1  ;;  %v1542_v14 = vadd.f32 %v1533_v8, %v10600_v29  ;;  %v1544_v26 = vadd.f32 %v1533_v8, %v10604_v31  ;;  %v1546_v29 = vadd.f32 %v1533_v8, %v10608_v33 }
 0x493   : > { %2483 = vmatprep.subr.bf16.mxu0 %v9091_v7 }
 0x496   : > { %2484 = vmatpush1.bf16.msra.mxu0 %v9089_v9  ;;  %v1537_v9 = vrot.slane %v1273_v5, %v10633_v6 }
 0x497   : > { %2485 = vmatprep.subr.bf16.mxu0 %v9097_v11  ;;  %v1540_v11 = vadd.f32 %v1533_v8, %v10596_v27 }
 0x49a   : > { %2486 = vmatpush1.bf16.msra.mxu0 %v9095_v13  ;;  %v1541_v13 = vadd.f32 %v1537_v9, %v10598_v28  ;;  %v1545_v28 = vadd.f32 %v1537_v9, %v10606_v32 }
 0x49b   : > { %2487 = vmatprep.subr.bf16.mxu0 %v9103_v15 }
 0x49e   : > { %2488 = vmatpush1.bf16.msra.mxu0 %v9101_v17  ;;  %v1543_v17 = vadd.f32 %v1537_v9, %v10602_v30 }
 0x49f   : > { %2489 = vmatprep.subr.bf16.mxu0 %v9109_v19 }
 0x4a2   : > { %2490 = vmatpush2.bf16.msra.mxu0 %v9107_v21 }
 0x4a3   : > { %2491 = vmatprep.subr.bf16.mxu0 %v9115_v24 }
 0x4a6   : > { %2492 = vmatpush2.bf16.msra.mxu0 %v9113_v23 }
 0x4a7   : > { %2493 = vmatprep.subr.bf16.mxu0 %v9121_v4 }
 0x4aa   : > { %2494 = vmatpush2.bf16.msra.mxu0 %v9119_v37 }
 0x4ab   : > { %2495 = vmatprep.subr.bf16.mxu0 %v9127_v39 }
 0x4ae   : > { %2496 = vmatpush2.bf16.msra.mxu0 %v9125_v41  ;;  %v1547_v41 = vadd.f32 %v1537_v9, %v10610_v34 }
 0x4af   : > { %2497 = vmatprep.subr.bf16.mxu0 %v9133_v43 }
 0x4b2   : > { %2498 = vmatpush2.bf16.msra.mxu0 %v9131_v45 }
 0x4b3   : > { %2499 = vmatprep.subr.bf16.mxu0 %v9139_v47 }
 0x4b6   : > { %2500 = vmatpush2.bf16.msra.mxu0 %v9137_v49 }
 0x4b7   : > { %2501 = vmatprep.subr.bf16.mxu0 %v9145_v51 }
 0x4ba   : > { %2502 = vmatpush2.bf16.msra.mxu0 %v9143_v53 }
 0x4bb   : > { %2503 = vmatprep.subr.bf16.mxu0 %v9151_v55 }
 0x4be   : > { %2504 = vmatpush2.bf16.msra.mxu0 %v9149_v57 }
 0x521   : > { %v1781_v59 = vpop.f32.mrf.mxu0 }
 0x522   : > { %v1804_v15 = vadd.f32 %v1781_v59, %v1540_v11  ;;  %v2579_v11 = vld [vmem:[#allocation12] sm:$0xff] }
 0x523   : > { %v1783_v60 = vpop.f32.mrf.mxu0 }
 0x524   : > { %v1805_v18 = vadd.f32 %v1783_v60, %v1541_v13  ;;  %v9160_v13 = vld [vmem:[#allocation13 + $0x2ec] ss:$16 sps:$4 sm:$0xff]  }
 0x525   : > { %v1787_v61 = vpop.f32.mrf.mxu0 }
 0x526   : > { %v1806_v19 = vadd.f32 %v1787_v61, %v1542_v14  ;;  %v9155_v14 = vld [vmem:[#allocation13 + $0x2e0] ss:$16 sps:$4 sm:$0xff]  }
 0x527   : > { %v1789_v62 = vpop.f32.mrf.mxu0 }
 0x528   : > { %v1807_v22 = vadd.f32 %v1789_v62, %v1543_v17  ;;  %v9163_v17 = vld [vmem:[#allocation13 + $0x2c4] ss:$16 sps:$4 sm:$0xff]  }
 0x529   : > { %v1793_v0 = vpop.f32.mrf.mxu0 }
 0x52a   : > { %v1808_v38 = vadd.f32 %v1793_v0, %v1544_v26  ;;  %v2582_v26 = vld [vmem:[#allocation12 + $0x18] sm:$0xff] }
 0x52b   : > { %v1795_v2 = vpop.f32.mrf.mxu0 }
 0x52c   : > { %v1809_v43 = vadd.f32 %v1795_v2, %v1545_v28  ;;  %v9176_v28 = vld [vmem:[#allocation13 + $0x288] ss:$16 sps:$4 sm:$0xff]  }
 0x52d   : > { %v1799_v7 = vpop.f32.mrf.mxu0 }
 0x52e   : > { %v1810_v44 = vadd.f32 %v1799_v7, %v1546_v29  ;;  %v9181_v29 = vld [vmem:[#allocation13 + $0x264] ss:$16 sps:$4 sm:$0xff]  }
 0x52f   : > { %v1801_v10 = vpop.f32.mrf.mxu0 }
 0x530   : > { %v1811_v47 = vadd.f32 %v1801_v10, %v1547_v41  ;;  %v9190_v41 = vld [vmem:[#allocation13 + $0x24c] ss:$16 sps:$4 sm:$0xff]  }
 0x541   : > { %v2045_v12 = vpop.f32.mrf.mxu0 }
 0x542   : > { %v2068_v20 = vadd.f32 %v2045_v12, %v1804_v15  ;;  %v9157_v12 = vld [vmem:[#allocation13 + $0x2e4] ss:$16 sps:$4 sm:$0xff]   ;;  %v9158_v15 = vld [vmem:[#allocation13 + $0x2e8] ss:$16 sps:$4 sm:$0xff]  }
 0x543   : > { %v2047_v16 = vpop.f32.mrf.mxu0 }
 0x544   : > { %v2069_v23 = vadd.f32 %v2047_v16, %v1805_v18  ;;  %v2076_v27 = vmax.f32 %v2068_v20, 0.0  ;;  %v2580_v16 = vld [vmem:[#allocation12 + $0x8] sm:$0xff] }
 0x545   : > { %v2051_v21 = vpop.f32.mrf.mxu0  ;;  %v9166_v18 = vld [vmem:[#allocation13 + $0x2cc] ss:$16 sps:$4 sm:$0xff]   ;;  %v9164_v20 = vld [vmem:[#allocation13 + $0x2c8] ss:$16 sps:$4 sm:$0xff]  }
 0x546   : > { %v2070_v24 = vadd.f32 %v2051_v21, %v1806_v19  ;;  %v2077_v30 = vmax.f32 %v2069_v23, 0.0  ;;  %v9161_v19 = vld [vmem:[#allocation13 + $0x2c0] ss:$16 sps:$4 sm:$0xff]   ;;  %v9172_v23 = vld [vmem:[#allocation13 + $0x2ac] ss:$16 sps:$4 sm:$0xff]  }
 0x547   : > { %v2053_v25 = vpop.f32.mrf.mxu0  ;;  %v2581_v21 = vld [vmem:[#allocation12 + $0x10] sm:$0xff] }
 0x548   : > { %v2078_v4 = vmax.f32 %v2070_v24, 0.0  ;;  %v2071_v35 = vadd.f32 %v2053_v25, %v1807_v22  ;;  %v9169_v22 = vld [vmem:[#allocation13 + $0x2a4] ss:$16 sps:$4 sm:$0xff]   ;;  %v9167_v24 = vld [vmem:[#allocation13 + $0x2a0] ss:$16 sps:$4 sm:$0xff]  }
 0x549   : > { %v2057_v37 = vpop.f32.mrf.mxu0  ;;  %v9170_v25 = vld [vmem:[#allocation13 + $0x2a8] ss:$16 sps:$4 sm:$0xff]  }
 0x54a   : > { %v10644_v39 = vpack.c.bf16 %v2078_v4, %v2076_v27  ;;  %v2079_v40 = vmax.f32 %v2071_v35, 0.0  ;;  %v2072_v31 = vadd.f32 %v2057_v37, %v1808_v38  ;;  %v9175_v27 = vld [vmem:[#allocation13 + $0x284] ss:$16 sps:$4 sm:$0xff]   ;;  %v9178_v4 = vld [vmem:[#allocation13 + $0x28c] ss:$16 sps:$4 sm:$0xff]  }
 0x54b   : > { %v2059_v42 = vpop.f32.mrf.mxu0  ;;  %v9173_v35 = vld [vmem:[#allocation13 + $0x280] ss:$16 sps:$4 sm:$0xff]   ;;  %v9184_v37 = vld [vmem:[#allocation13 + $0x26c] ss:$16 sps:$4 sm:$0xff]  }
 0x54c   : > { %v10647_v45 = vpack.c.bf16 %v2079_v40, %v2077_v30  ;;  %v2073_v48 = vadd.f32 %v2059_v42, %v1809_v43  ;;  %v2080_v34 = vmax.f32 %v2072_v31, 0.0  ;;  %v9179_v38 = vld [vmem:[#allocation13 + $0x260] ss:$16 sps:$4 sm:$0xff]   ;;  %v9182_v30 = vld [vmem:[#allocation13 + $0x268] ss:$16 sps:$4 sm:$0xff]  }
 0x54d   : > { %v2063_v46 = vpop.f32.mrf.mxu0  ;;  %v9187_v40 = vld [vmem:[#allocation13 + $0x244] ss:$16 sps:$4 sm:$0xff]   ;;  %v9185_v42 = vld [vmem:[#allocation13 + $0x240] ss:$16 sps:$4 sm:$0xff]   ;;  %v9188_v43 = vld [vmem:[#allocation13 + $0x248] ss:$16 sps:$4 sm:$0xff]  }
 0x54e   : > { %v2074_v32 = vadd.f32 %v2063_v46, %v1810_v44  ;;  %2505 = vmatprep.mubr.bf16.mxu0 %v10647_v45  ;;  %2558 = vmatprep.mubr.bf16.mxu1 %v10647_v45  ;;  %v2081_v51 = vmax.f32 %v2073_v48, 0.0  ;;  %v9193_v44 = vld [vmem:[#allocation13 + $0x224] ss:$16 sps:$4 sm:$0xff]   ;;  %v9196_v31 = vld [vmem:[#allocation13 + $0x22c] ss:$16 sps:$4 sm:$0xff]  }
 0x54f   : > { %v2065_v33 = vpop.f32.mrf.mxu0  ;;  %2506 = vmatmul.mubr.bf16.vlgmr.msra.gmra.mxu0 %v10644_v39  ;;  %2559 = vmatmul.mubr.bf16.vlgmr.msra.gmra.mxu1 %v10644_v39  ;;  %v9191_v46 = vld [vmem:[#allocation13 + $0x220] ss:$16 sps:$4 sm:$0xff]   ;;  %v9199_v48 = vld [vmem:[#allocation13 + $0x204] ss:$16 sps:$4 sm:$0xff]  }
 0x550   : > { %v2082_v49 = vmax.f32 %v2074_v32, 0.0  ;;  %v2075_v50 = vadd.f32 %v2065_v33, %v1811_v47  ;;  %v9194_v47 = vld [vmem:[#allocation13 + $0x228] ss:$16 sps:$4 sm:$0xff]   ;;  %v9202_v32 = vld [vmem:[#allocation13 + $0x20c] ss:$16 sps:$4 sm:$0xff]  }
 0x551   : > { %v9197_v33 = vld [vmem:[#allocation13 + $0x200] ss:$16 sps:$4 sm:$0xff]  }
 0x552   : > { %v10653_v52 = vpack.c.bf16 %v2082_v49, %v2080_v34  ;;  %v2083_v53 = vmax.f32 %v2075_v50, 0.0  ;;  %v9200_v34 = vld [vmem:[#allocation13 + $0x208] ss:$16 sps:$4 sm:$0xff]   ;;  %v9205_v49 = vld [vmem:[#allocation13 + $0x3e4] ss:$16 sps:$4 sm:$0xff]  }
 0x553   : > { %v9208_v50 = vld [vmem:[#allocation13 + $0x3ec] ss:$16 sps:$4 sm:$0xff]  }
 0x554   : > { %v10655_v54 = vpack.c.bf16 %v2083_v53, %v2081_v51  ;;  %v9203_v51 = vld [vmem:[#allocation13 + $0x3e0] ss:$16 sps:$4 sm:$0xff]   ;;  %v9206_v53 = vld [vmem:[#allocation13 + $0x3e8] ss:$16 sps:$4 sm:$0xff]  }
 0x556   : > { %2515 = vmatprep.mubr.bf16.mxu0 %v10655_v54  ;;  %2568 = vmatprep.mubr.bf16.mxu1 %v10655_v54 }
 0x557   : > { %2516 = vmatmul.mubr.bf16.gmra.mxu0 %v10653_v52  ;;  %2569 = vmatmul.mubr.bf16.gmra.mxu1 %v10653_v52 }
 0x558   : > { %2659 = vmatprep.mubr.f32.mxu0 %v10290_v36  ;;  %2748 = vmatprep.mubr.f32.mxu1 %v10290_v36 }
 0x60f   : > { %v2507_v55 = vpop.f32.mrf.mxu0  ;;  %v2560_v56 = vpop.f32.mrf.mxu1 }
 0x611   : > { %v2509_v57 = vpop.f32.mrf.mxu0  ;;  %v2562_v58 = vpop.f32.mrf.mxu1 }
 0x613   : > { %v2511_v59 = vpop.f32.mrf.mxu0  ;;  %v2564_v60 = vpop.f32.mrf.mxu1 }
 0x615   : > { %v2513_v61 = vpop.f32.mrf.mxu0  ;;  %v2566_v62 = vpop.f32.mrf.mxu1 }
 0x617   : > { %v2517_v63 = vpop.f32.mrf.mxu0  ;;  %v2570_v0 = vpop.f32.mrf.mxu1 }
 0x619   : > { %v2519_v2 = vpop.f32.mrf.mxu0  ;;  %v2572_v5 = vpop.f32.mrf.mxu1 }
 0x61b   : > { %v2521_v7 = vpop.f32.mrf.mxu0  ;;  %v2574_v8 = vpop.f32.mrf.mxu1 }
 0x61d   : > { %v2523_v9 = vpop.f32.mrf.mxu0  ;;  %v2576_v10 = vpop.f32.mrf.mxu1 }
 0x61e   : > { %2619 = vmatprep.subr.mxu0 %v2523_v9  ;;  %2708 = vmatprep.subr.mxu1 %v2576_v10  ;;  %v9227_v9 = vld [vmem:[#allocation13 + $0x360] ss:$16 sps:$4 sm:$0xff]   ;;  %v9230_v10 = vld [vmem:[#allocation13 + $0x368] ss:$16 sps:$4 sm:$0xff]  }
 0x61f   : > { %2620 = vmatpush1.msra.mxu0 %v2521_v7  ;;  %2709 = vmatpush1.msra.mxu1 %v2574_v8  ;;  %v9229_v7 = vld [vmem:[#allocation13 + $0x364] ss:$16 sps:$4 sm:$0xff]   ;;  %v9232_v8 = vld [vmem:[#allocation13 + $0x36c] ss:$16 sps:$4 sm:$0xff]  }
 0x620   : > { %2621 = vmatprep.subr.mxu0 %v2519_v2  ;;  %2710 = vmatprep.subr.mxu1 %v2572_v5  ;;  %v9221_v2 = vld [vmem:[#allocation13 + $0x380] ss:$16 sps:$4 sm:$0xff]   ;;  %v9224_v5 = vld [vmem:[#allocation13 + $0x388] ss:$16 sps:$4 sm:$0xff]  }
 0x621   : > { %2622 = vmatpush1.msra.mxu0 %v2517_v63  ;;  %2711 = vmatpush1.msra.mxu1 %v2570_v0  ;;  %v9223_v63 = vld [vmem:[#allocation13 + $0x384] ss:$16 sps:$4 sm:$0xff]   ;;  %v9226_v0 = vld [vmem:[#allocation13 + $0x38c] ss:$16 sps:$4 sm:$0xff]  }
 0x622   : > { %2623 = vmatprep.subr.mxu0 %v2513_v61  ;;  %2712 = vmatprep.subr.mxu1 %v2566_v62  ;;  %v9215_v61 = vld [vmem:[#allocation13 + $0x3a0] ss:$16 sps:$4 sm:$0xff]   ;;  %v9218_v62 = vld [vmem:[#allocation13 + $0x3a8] ss:$16 sps:$4 sm:$0xff]  }
 0x623   : > { %2624 = vmatpush1.msra.mxu0 %v2511_v59  ;;  %2713 = vmatpush1.msra.mxu1 %v2564_v60  ;;  %v9217_v59 = vld [vmem:[#allocation13 + $0x3a4] ss:$16 sps:$4 sm:$0xff]   ;;  %v9220_v60 = vld [vmem:[#allocation13 + $0x3ac] ss:$16 sps:$4 sm:$0xff]  }
 0x624   : > { %2625 = vmatprep.subr.mxu0 %v2509_v57  ;;  %2714 = vmatprep.subr.mxu1 %v2562_v58  ;;  %v9209_v57 = vld [vmem:[#allocation13 + $0x3c0] ss:$16 sps:$4 sm:$0xff]   ;;  %v9212_v58 = vld [vmem:[#allocation13 + $0x3c8] ss:$16 sps:$4 sm:$0xff]  }
 0x625   : > { %2626 = vmatpush1.msra.mxu0 %v2507_v55  ;;  %2715 = vmatpush1.msra.mxu1 %v2560_v56  ;;  %v9211_v55 = vld [vmem:[#allocation13 + $0x3c4] ss:$16 sps:$4 sm:$0xff]   ;;  %v9214_v56 = vld [vmem:[#allocation13 + $0x3cc] ss:$16 sps:$4 sm:$0xff]  }
 0x626   : > { %8100 = vmatmul.mubr.msk.f32.vlgmr.msra.gmra.mxu0 %vm1427_vm1, %v2579_v11  ;;  %8104 = vmatmul.mubr.msk.f32.vlgmr.msra.gmra.mxu1 %vm1427_vm1, %v2579_v11  ;;  %v9235_v11 = vld [vmem:[#allocation13 + $0x344] ss:$16 sps:$4 sm:$0xff]  }
 0x627   : > { %3195 = vmatprep.subr.bf16.mxu0 %v9157_v12  ;;  %3248 = vmatprep.subr.bf16.mxu1 %v9160_v13  ;;  %v9238_v12 = vld [vmem:[#allocation13 + $0x34c] ss:$16 sps:$4 sm:$0xff]   ;;  %v9233_v13 = vld [vmem:[#allocation13 + $0x340] ss:$16 sps:$4 sm:$0xff]  }
 0x628   : > { %3196 = vmatpush1.bf16.msra.mxu0 %v9155_v14  ;;  %3249 = vmatpush1.bf16.msra.mxu1 %v9158_v15  ;;  %v9236_v14 = vld [vmem:[#allocation13 + $0x348] ss:$16 sps:$4 sm:$0xff]   ;;  %v9241_v15 = vld [vmem:[#allocation13 + $0x324] ss:$16 sps:$4 sm:$0xff]  }
 0x629   : > { %2665 = vmatprep.mubr.f32.mxu0 %v10290_v36  ;;  %2754 = vmatprep.mubr.f32.mxu1 %v10290_v36 }
 0x62a   : > { %8101 = vmatmul.mubr.msk.f32.gmra.mxu0 %vm1427_vm1, %v2580_v16  ;;  %8105 = vmatmul.mubr.msk.f32.gmra.mxu1 %vm1427_vm1, %v2580_v16  ;;  %v9244_v16 = vld [vmem:[#allocation13 + $0x32c] ss:$16 sps:$4 sm:$0xff]  }
 0x62b   : > { %3197 = vmatprep.subr.bf16.mxu0 %v9163_v17  ;;  %3250 = vmatprep.subr.bf16.mxu1 %v9166_v18  ;;  %v9239_v17 = vld [vmem:[#allocation13 + $0x320] ss:$16 sps:$4 sm:$0xff]   ;;  %v9242_v18 = vld [vmem:[#allocation13 + $0x328] ss:$16 sps:$4 sm:$0xff]  }
 0x62c   : > { %3198 = vmatpush1.bf16.msra.mxu0 %v9161_v19  ;;  %3251 = vmatpush1.bf16.msra.mxu1 %v9164_v20  ;;  %v9247_v19 = vld [vmem:[#allocation13 + $0x304] ss:$16 sps:$4 sm:$0xff]   ;;  %v9250_v20 = vld [vmem:[#allocation13 + $0x30c] ss:$16 sps:$4 sm:$0xff]  }
 0x62d   : > { %2671 = vmatprep.mubr.f32.mxu0 %v10290_v36  ;;  %2760 = vmatprep.mubr.f32.mxu1 %v10290_v36 }
 0x62e   : > { %8102 = vmatmul.mubr.msk.f32.gmra.mxu0 %vm1427_vm1, %v2581_v21  ;;  %8106 = vmatmul.mubr.msk.f32.gmra.mxu1 %vm1427_vm1, %v2581_v21  ;;  %v9245_v21 = vld [vmem:[#allocation13 + $0x300] ss:$16 sps:$4 sm:$0xff]  }
 0x62f   : > { %3199 = vmatprep.subr.bf16.mxu0 %v9169_v22  ;;  %3252 = vmatprep.subr.bf16.mxu1 %v9172_v23  ;;  %v9248_v22 = vld [vmem:[#allocation13 + $0x308] ss:$16 sps:$4 sm:$0xff]  }
 0x630   : > { %3200 = vmatpush1.bf16.msra.mxu0 %v9167_v24  ;;  %3253 = vmatpush1.bf16.msra.mxu1 %v9170_v25 }
 0x631   : > { %2677 = vmatprep.mubr.f32.mxu0 %v10290_v36  ;;  %2766 = vmatprep.mubr.f32.mxu1 %v10290_v36 }
 0x632   : > { %8103 = vmatmul.mubr.msk.f32.gmra.mxu0 %vm1427_vm1, %v2582_v26  ;;  %8107 = vmatmul.mubr.msk.f32.gmra.mxu1 %vm1427_vm1, %v2582_v26 }
 0x633   : > { %3201 = vmatprep.subr.bf16.mxu0 %v9175_v27  ;;  %3254 = vmatprep.subr.bf16.mxu1 %v9178_v4 }
 0x634   : > { %3202 = vmatpush1.bf16.msra.mxu0 %v9173_v35  ;;  %3227 = vmatprep.mubr.bf16.mxu0 %v10647_v45 }
 0x635   : > { %3255 = vmatpush1.bf16.msra.mxu1 %v9176_v28  ;;  %3280 = vmatprep.mubr.bf16.mxu1 %v10647_v45 }
 0x636   : > { %3203 = vmatprep.subr.bf16.mxu0 %v9181_v29  ;;  %3256 = vmatprep.subr.bf16.mxu1 %v9184_v37 }
 0x638   : > { %3204 = vmatpush1.bf16.msra.mxu0 %v9179_v38 }
 0x639   : > { %3257 = vmatpush1.bf16.msra.mxu1 %v9182_v30  ;;  %3205 = vmatprep.subr.bf16.mxu0 %v9187_v40 }
 0x63a   : > { %3258 = vmatprep.subr.bf16.mxu1 %v9190_v41 }
 0x63c   : > { %3206 = vmatpush1.bf16.msra.mxu0 %v9185_v42 }
 0x63d   : > { %3259 = vmatpush1.bf16.msra.mxu1 %v9188_v43  ;;  %3207 = vmatprep.subr.bf16.mxu0 %v9193_v44 }
 0x63e   : > { %3260 = vmatprep.subr.bf16.mxu1 %v9196_v31 }
 0x640   : > { %3208 = vmatpush1.bf16.msra.mxu0 %v9191_v46 }
 0x641   : > { %3261 = vmatpush1.bf16.msra.mxu1 %v9194_v47  ;;  %3209 = vmatprep.subr.bf16.mxu0 %v9199_v48 }
 0x642   : > { %3262 = vmatprep.subr.bf16.mxu1 %v9202_v32 }
 0x644   : > { %3210 = vmatpush1.bf16.msra.mxu0 %v9197_v33 }
 0x645   : > { %3263 = vmatpush1.bf16.msra.mxu1 %v9200_v34  ;;  %3211 = vmatprep.subr.bf16.mxu0 %v9205_v49 }
 0x646   : > { %3264 = vmatprep.subr.bf16.mxu1 %v9208_v50 }
 0x648   : > { %3212 = vmatpush2.bf16.msra.mxu0 %v9203_v51 }
 0x649   : > { %3265 = vmatpush2.bf16.msra.mxu1 %v9206_v53  ;;  %3213 = vmatprep.subr.bf16.mxu0 %v9211_v55 }
 0x64a   : > { %3266 = vmatprep.subr.bf16.mxu1 %v9214_v56 }
 0x64c   : > { %3214 = vmatpush2.bf16.msra.mxu0 %v9209_v57 }
 0x64d   : > { %3267 = vmatpush2.bf16.msra.mxu1 %v9212_v58  ;;  %3215 = vmatprep.subr.bf16.mxu0 %v9217_v59  ;;  %v3302_v59 = vld [vmem:[#allocation12 + $0x20] sm:$0xff] }
 0x64e   : > { %3268 = vmatprep.subr.bf16.mxu1 %v9220_v60  ;;  %v9253_v60 = vld [vmem:[#allocation13 + $0x4e4] ss:$16 sps:$4 sm:$0xff]  }
 0x650   : > { %3216 = vmatpush2.bf16.msra.mxu0 %v9215_v61  ;;  %v9251_v61 = vld [vmem:[#allocation13 + $0x4e0] ss:$16 sps:$4 sm:$0xff]  }
 0x651   : > { %3269 = vmatpush2.bf16.msra.mxu1 %v9218_v62  ;;  %3217 = vmatprep.subr.bf16.mxu0 %v9223_v63  ;;  %v9256_v62 = vld [vmem:[#allocation13 + $0x4ec] ss:$16 sps:$4 sm:$0xff]   ;;  %v9254_v63 = vld [vmem:[#allocation13 + $0x4e8] ss:$16 sps:$4 sm:$0xff]  }
 0x652   : > { %3270 = vmatprep.subr.bf16.mxu1 %v9226_v0  ;;  %v3303_v0 = vld [vmem:[#allocation12 + $0x28] sm:$0xff] }
 0x654   : > { %3218 = vmatpush2.bf16.msra.mxu0 %v9221_v2  ;;  %v9259_v2 = vld [vmem:[#allocation13 + $0x4c4] ss:$16 sps:$4 sm:$0xff]  }
 0x655   : > { %3271 = vmatpush2.bf16.msra.mxu1 %v9224_v5  ;;  %3219 = vmatprep.subr.bf16.mxu0 %v9229_v7  ;;  %v9257_v5 = vld [vmem:[#allocation13 + $0x4c0] ss:$16 sps:$4 sm:$0xff]   ;;  %v9262_v7 = vld [vmem:[#allocation13 + $0x4cc] ss:$16 sps:$4 sm:$0xff]  }
 0x656   : > { %3272 = vmatprep.subr.bf16.mxu1 %v9232_v8  ;;  %v9260_v8 = vld [vmem:[#allocation13 + $0x4c8] ss:$16 sps:$4 sm:$0xff]  }
 0x658   : > { %3220 = vmatpush2.bf16.msra.mxu0 %v9227_v9  ;;  %v3304_v9 = vld [vmem:[#allocation12 + $0x30] sm:$0xff] }
 0x659   : > { %3273 = vmatpush2.bf16.msra.mxu1 %v9230_v10  ;;  %3221 = vmatprep.subr.bf16.mxu0 %v9235_v11  ;;  %v9265_v10 = vld [vmem:[#allocation13 + $0x4a4] ss:$16 sps:$4 sm:$0xff]   ;;  %v9263_v11 = vld [vmem:[#allocation13 + $0x4a0] ss:$16 sps:$4 sm:$0xff]  }
 0x65a   : > { %3274 = vmatprep.subr.bf16.mxu1 %v9238_v12  ;;  %v9268_v12 = vld [vmem:[#allocation13 + $0x4ac] ss:$16 sps:$4 sm:$0xff]  }
 0x65c   : > { %3222 = vmatpush2.bf16.msra.mxu0 %v9233_v13  ;;  %v9266_v13 = vld [vmem:[#allocation13 + $0x4a8] ss:$16 sps:$4 sm:$0xff]  }
 0x65d   : > { %3275 = vmatpush2.bf16.msra.mxu1 %v9236_v14  ;;  %3223 = vmatprep.subr.bf16.mxu0 %v9241_v15  ;;  %v3305_v14 = vld [vmem:[#allocation12 + $0x38] sm:$0xff]  ;;  %v9271_v15 = vld [vmem:[#allocation13 + $0x484] ss:$16 sps:$4 sm:$0xff]  }
 0x65e   : > { %3276 = vmatprep.subr.bf16.mxu1 %v9244_v16  ;;  %v9269_v16 = vld [vmem:[#allocation13 + $0x480] ss:$16 sps:$4 sm:$0xff]  }
 0x660   : > { %3224 = vmatpush2.bf16.msra.mxu0 %v9239_v17  ;;  %v9274_v17 = vld [vmem:[#allocation13 + $0x48c] ss:$16 sps:$4 sm:$0xff]  }
 0x661   : > { %3277 = vmatpush2.bf16.msra.mxu1 %v9242_v18  ;;  %3225 = vmatprep.subr.bf16.mxu0 %v9247_v19  ;;  %v9272_v18 = vld [vmem:[#allocation13 + $0x488] ss:$16 sps:$4 sm:$0xff]   ;;  %v9277_v19 = vld [vmem:[#allocation13 + $0x464] ss:$16 sps:$4 sm:$0xff]  }
 0x662   : > { %3278 = vmatprep.subr.bf16.mxu1 %v9250_v20  ;;  %v9280_v20 = vld [vmem:[#allocation13 + $0x46c] ss:$16 sps:$4 sm:$0xff]  }
 0x664   : > { %3226 = vmatpush2.bf16.msra.mxu0 %v9245_v21  ;;  %v9275_v21 = vld [vmem:[#allocation13 + $0x460] ss:$16 sps:$4 sm:$0xff]  }
 0x665   : > { %3279 = vmatpush2.bf16.msra.mxu1 %v9248_v22  ;;  %v9278_v22 = vld [vmem:[#allocation13 + $0x468] ss:$16 sps:$4 sm:$0xff]  }
 0x667   : > { %3228 = vmatmul.mubr.bf16.vlgmr.msra.gmra.mxu0 %v10644_v39 }
 0x668   : > { %3281 = vmatmul.mubr.bf16.vlgmr.msra.gmra.mxu1 %v10644_v39  ;;  %3237 = vmatprep.mubr.bf16.mxu0 %v10655_v54 }
 0x669   : > { %3290 = vmatprep.mubr.bf16.mxu1 %v10655_v54 }
 0x66f   : > { %3238 = vmatmul.mubr.bf16.gmra.mxu0 %v10653_v52 }
 0x670   : > { %3291 = vmatmul.mubr.bf16.gmra.mxu1 %v10653_v52  ;;  %3382 = vmatprep.mubr.f32.mxu0 %v10290_v36 }
 0x671   : > { %3471 = vmatprep.mubr.f32.mxu1 %v10290_v36 }
 0x6e6   : > { %v10687_v23 = vpop.f32.mrf.mxu0  ;;  %v10689_v24 = vpop.f32.mrf.mxu1 }
 0x6e8   : > { %v10691_v25 = vpop.f32.mrf.mxu0  ;;  %v10693_v26 = vpop.f32.mrf.mxu1 }
 0x6ea   : > { %v10695_v27 = vpop.f32.mrf.mxu0  ;;  %v10697_v4 = vpop.f32.mrf.mxu1 }
 0x6ec   : > { %v10699_v35 = vpop.f32.mrf.mxu0  ;;  %v10701_v28 = vpop.f32.mrf.mxu1 }
 0x6ee   : > { %v10703_v29 = vpop.f32.mrf.mxu0  ;;  %v10705_v37 = vpop.f32.mrf.mxu1 }
 0x6f0   : > { %v10707_v38 = vpop.f32.mrf.mxu0  ;;  %v10709_v30 = vpop.f32.mrf.mxu1 }
 0x6f2   : > { %v10711_v40 = vpop.f32.mrf.mxu0  ;;  %v10713_v41 = vpop.f32.mrf.mxu1 }
 0x6f4   : > { %v10715_v42 = vpop.f32.mrf.mxu0  ;;  %v10717_v43 = vpop.f32.mrf.mxu1 }
 0x727   : > { %v3229_v44 = vpop.f32.mrf.mxu0 }
 0x728   : > { %v3282_v31 = vpop.f32.mrf.mxu1 }
 0x729   : > { %v3231_v46 = vpop.f32.mrf.mxu0 }
 0x72a   : > { %v3284_v47 = vpop.f32.mrf.mxu1 }
 0x72b   : > { %v3233_v48 = vpop.f32.mrf.mxu0 }
 0x72c   : > { %v3286_v32 = vpop.f32.mrf.mxu1 }
 0x72d   : > { %v3235_v33 = vpop.f32.mrf.mxu0 }
 0x72e   : > { %v3288_v34 = vpop.f32.mrf.mxu1 }
 0x72f   : > { %v3239_v49 = vpop.f32.mrf.mxu0 }
 0x730   : > { %v3292_v50 = vpop.f32.mrf.mxu1 }
 0x731   : > { %v3241_v51 = vpop.f32.mrf.mxu0 }
 0x732   : > { %v3294_v53 = vpop.f32.mrf.mxu1 }
 0x733   : > { %v3243_v55 = vpop.f32.mrf.mxu0 }
 0x734   : > { %v3296_v56 = vpop.f32.mrf.mxu1 }
 0x735   : > { %v3245_v57 = vpop.f32.mrf.mxu0 }
 0x736   : > { %v3298_v58 = vpop.f32.mrf.mxu1  ;;  %3342 = vmatprep.subr.mxu0 %v3245_v57  ;;  %v9302_v57 = vld [vmem:[#allocation13 + $0x5e8] ss:$16 sps:$4 sm:$0xff]  }
 0x737   : > { %3431 = vmatprep.subr.mxu1 %v3298_v58  ;;  %3343 = vmatpush1.msra.mxu0 %v3243_v55  ;;  %v9304_v55 = vld [vmem:[#allocation13 + $0x5ec] ss:$16 sps:$4 sm:$0xff]   ;;  %v9307_v58 = vld [vmem:[#allocation13 + $0x5c4] ss:$16 sps:$4 sm:$0xff]  }
 0x738   : > { %3432 = vmatpush1.msra.mxu1 %v3296_v56  ;;  %3344 = vmatprep.subr.mxu0 %v3241_v51  ;;  %v9296_v51 = vld [vmem:[#allocation13 + $0x408] ss:$16 sps:$4 sm:$0xff]   ;;  %v9299_v56 = vld [vmem:[#allocation13 + $0x5e0] ss:$16 sps:$4 sm:$0xff]  }
 0x739   : > { %3433 = vmatprep.subr.mxu1 %v3294_v53  ;;  %3345 = vmatpush1.msra.mxu0 %v3239_v49  ;;  %v9295_v49 = vld [vmem:[#allocation13 + $0x404] ss:$16 sps:$4 sm:$0xff]  }
 0x73a   : > { %3434 = vmatpush1.msra.mxu1 %v3292_v50  ;;  %3346 = vmatprep.subr.mxu0 %v3235_v33  ;;  %v9287_v33 = vld [vmem:[#allocation13 + $0x420] ss:$16 sps:$4 sm:$0xff]   ;;  %v9298_v50 = vld [vmem:[#allocation13 + $0x40c] ss:$16 sps:$4 sm:$0xff]   ;;  %v9301_v53 = vld [vmem:[#allocation13 + $0x5e4] ss:$16 sps:$4 sm:$0xff]  }
 0x73b   : > { %3435 = vmatprep.subr.mxu1 %v3288_v34  ;;  %3347 = vmatpush1.msra.mxu0 %v3233_v48  ;;  %v9289_v48 = vld [vmem:[#allocation13 + $0x424] ss:$16 sps:$4 sm:$0xff]   ;;  %v9290_v34 = vld [vmem:[#allocation13 + $0x428] ss:$16 sps:$4 sm:$0xff]  }
 0x73c   : > { %3436 = vmatpush1.msra.mxu1 %v3286_v32  ;;  %3348 = vmatprep.subr.mxu0 %v3231_v46  ;;  %v9281_v46 = vld [vmem:[#allocation13 + $0x440] ss:$16 sps:$4 sm:$0xff]   ;;  %v9292_v32 = vld [vmem:[#allocation13 + $0x42c] ss:$16 sps:$4 sm:$0xff]  }
 0x73d   : > { %3437 = vmatprep.subr.mxu1 %v3284_v47  ;;  %3349 = vmatpush1.msra.mxu0 %v3229_v44  ;;  %v9283_v44 = vld [vmem:[#allocation13 + $0x444] ss:$16 sps:$4 sm:$0xff]   ;;  %v9284_v47 = vld [vmem:[#allocation13 + $0x448] ss:$16 sps:$4 sm:$0xff]  }
 0x73e   : > { %3438 = vmatpush1.msra.mxu1 %v3282_v31  ;;  %8172 = vmatmul.mubr.msk.f32.vlgmr.msra.gmra.mxu0 %vm1427_vm1, %v3302_v59  ;;  %v9286_v31 = vld [vmem:[#allocation13 + $0x44c] ss:$16 sps:$4 sm:$0xff]  }
 0x73f   : > { %8176 = vmatmul.mubr.msk.f32.vlgmr.msra.gmra.mxu1 %vm1427_vm1, %v3302_v59  ;;  %3897 = vmatprep.subr.bf16.mxu0 %v9253_v60  ;;  %v9310_v59 = vld [vmem:[#allocation13 + $0x5cc] ss:$16 sps:$4 sm:$0xff]   ;;  %v9305_v60 = vld [vmem:[#allocation13 + $0x5c0] ss:$16 sps:$4 sm:$0xff]  }
 0x740   : > { %3950 = vmatprep.subr.bf16.mxu1 %v9256_v62  ;;  %3898 = vmatpush1.bf16.msra.mxu0 %v9251_v61  ;;  %v9308_v61 = vld [vmem:[#allocation13 + $0x5c8] ss:$16 sps:$4 sm:$0xff]   ;;  %v9313_v62 = vld [vmem:[#allocation13 + $0x5a4] ss:$16 sps:$4 sm:$0xff]  }
 0x741   : > { %3951 = vmatpush1.bf16.msra.mxu1 %v9254_v63  ;;  %3388 = vmatprep.mubr.f32.mxu0 %v10290_v36  ;;  %v9316_v63 = vld [vmem:[#allocation13 + $0x5ac] ss:$16 sps:$4 sm:$0xff]  }
 0x742   : > { %3477 = vmatprep.mubr.f32.mxu1 %v10290_v36  ;;  %8173 = vmatmul.mubr.msk.f32.gmra.mxu0 %vm1427_vm1, %v3303_v0 }
 0x743   : > { %8177 = vmatmul.mubr.msk.f32.gmra.mxu1 %vm1427_vm1, %v3303_v0  ;;  %3899 = vmatprep.subr.bf16.mxu0 %v9259_v2  ;;  %v9311_v0 = vld [vmem:[#allocation13 + $0x5a0] ss:$16 sps:$4 sm:$0xff]   ;;  %v9314_v2 = vld [vmem:[#allocation13 + $0x5a8] ss:$16 sps:$4 sm:$0xff]  }
 0x744   : > { %3952 = vmatprep.subr.bf16.mxu1 %v9262_v7  ;;  %3900 = vmatpush1.bf16.msra.mxu0 %v9257_v5  ;;  %v9319_v5 = vld [vmem:[#allocation13 + $0x584] ss:$16 sps:$4 sm:$0xff]   ;;  %v9322_v7 = vld [vmem:[#allocation13 + $0x58c] ss:$16 sps:$4 sm:$0xff]  }
 0x745   : > { %3953 = vmatpush1.bf16.msra.mxu1 %v9260_v8  ;;  %3394 = vmatprep.mubr.f32.mxu0 %v10290_v36  ;;  %v9317_v8 = vld [vmem:[#allocation13 + $0x580] ss:$16 sps:$4 sm:$0xff]  }
 0x746   : > { %3483 = vmatprep.mubr.f32.mxu1 %v10290_v36  ;;  %8174 = vmatmul.mubr.msk.f32.gmra.mxu0 %vm1427_vm1, %v3304_v9 }
 0x747   : > { %8178 = vmatmul.mubr.msk.f32.gmra.mxu1 %vm1427_vm1, %v3304_v9  ;;  %3901 = vmatprep.subr.bf16.mxu0 %v9265_v10  ;;  %v9320_v9 = vld [vmem:[#allocation13 + $0x588] ss:$16 sps:$4 sm:$0xff]   ;;  %v9325_v10 = vld [vmem:[#allocation13 + $0x564] ss:$16 sps:$4 sm:$0xff]  }
 0x748   : > { %3954 = vmatprep.subr.bf16.mxu1 %v9268_v12  ;;  %3902 = vmatpush1.bf16.msra.mxu0 %v9263_v11  ;;  %v9328_v11 = vld [vmem:[#allocation13 + $0x56c] ss:$16 sps:$4 sm:$0xff]   ;;  %v9323_v12 = vld [vmem:[#allocation13 + $0x560] ss:$16 sps:$4 sm:$0xff]  }
 0x749   : > { %3955 = vmatpush1.bf16.msra.mxu1 %v9266_v13  ;;  %3400 = vmatprep.mubr.f32.mxu0 %v10290_v36  ;;  %v9326_v13 = vld [vmem:[#allocation13 + $0x568] ss:$16 sps:$4 sm:$0xff]  }
 0x74a   : > { %3489 = vmatprep.mubr.f32.mxu1 %v10290_v36  ;;  %8175 = vmatmul.mubr.msk.f32.gmra.mxu0 %vm1427_vm1, %v3305_v14 }
 0x74b   : > { %8179 = vmatmul.mubr.msk.f32.gmra.mxu1 %vm1427_vm1, %v3305_v14  ;;  %3903 = vmatprep.subr.bf16.mxu0 %v9271_v15  ;;  %v9331_v14 = vld [vmem:[#allocation13 + $0x544] ss:$16 sps:$4 sm:$0xff]   ;;  %v9334_v15 = vld [vmem:[#allocation13 + $0x54c] ss:$16 sps:$4 sm:$0xff]  }
 0x74c   : > { %3956 = vmatprep.subr.bf16.mxu1 %v9274_v17  ;;  %3904 = vmatpush1.bf16.msra.mxu0 %v9269_v16  ;;  %v9329_v16 = vld [vmem:[#allocation13 + $0x540] ss:$16 sps:$4 sm:$0xff]   ;;  %v9332_v17 = vld [vmem:[#allocation13 + $0x548] ss:$16 sps:$4 sm:$0xff]  }
 0x74d   : > { %3929 = vmatprep.mubr.bf16.mxu0 %v10647_v45  ;;  %3957 = vmatpush1.bf16.msra.mxu1 %v9272_v18  ;;  %v9337_v18 = vld [vmem:[#allocation13 + $0x524] ss:$16 sps:$4 sm:$0xff]  }
 0x74e   : > { %3982 = vmatprep.mubr.bf16.mxu1 %v10647_v45  ;;  %3905 = vmatprep.subr.bf16.mxu0 %v9277_v19  ;;  %v9293_v45 = vld [vmem:[#allocation13 + $0x400] ss:$16 sps:$4 sm:$0xff]   ;;  %v9340_v19 = vld [vmem:[#allocation13 + $0x52c] ss:$16 sps:$4 sm:$0xff]  }
 0x74f   : > { %3958 = vmatprep.subr.bf16.mxu1 %v9280_v20  ;;  %v9335_v20 = vld [vmem:[#allocation13 + $0x520] ss:$16 sps:$4 sm:$0xff]  }
 0x750   : > { %3906 = vmatpush1.bf16.msra.mxu0 %v9275_v21  ;;  %v9338_v21 = vld [vmem:[#allocation13 + $0x528] ss:$16 sps:$4 sm:$0xff]  }
 0x751   : > { %3959 = vmatpush1.bf16.msra.mxu1 %v9278_v22  ;;  %3907 = vmatprep.subr.bf16.mxu0 %v9283_v44  ;;  %v9343_v22 = vld [vmem:[#allocation13 + $0x504] ss:$16 sps:$4 sm:$0xff]   ;;  %v9346_v44 = vld [vmem:[#allocation13 + $0x50c] ss:$16 sps:$4 sm:$0xff]  }
 0x752   : > { %3960 = vmatprep.subr.bf16.mxu1 %v9286_v31  ;;  %v9341_v31 = vld [vmem:[#allocation13 + $0x500] ss:$16 sps:$4 sm:$0xff]  }
 0x754   : > { %3908 = vmatpush1.bf16.msra.mxu0 %v9281_v46  ;;  %v9344_v46 = vld [vmem:[#allocation13 + $0x508] ss:$16 sps:$4 sm:$0xff]  }
 0x755   : > { %3961 = vmatpush1.bf16.msra.mxu1 %v9284_v47  ;;  %3909 = vmatprep.subr.bf16.mxu0 %v9289_v48  ;;  %v2088_v47 = vld [vmem:[#allocation15] sm:$0xf]  ;;  %v2784_v48 = vsub.s32 2, %v10627_v1 }
 0x756   : > { %3962 = vmatprep.subr.bf16.mxu1 %v9292_v32  ;;  %v2788_v32 = vsub.s32 3, %v10627_v1 }
 0x758   : > { %3910 = vmatpush1.bf16.msra.mxu0 %v9287_v33  ;;  %v2777_v33 = vrot.slane %v2088_v47, %v10630_v3 }
 0x759   : > { %3963 = vmatpush1.bf16.msra.mxu1 %v9290_v34  ;;  %3911 = vmatprep.subr.bf16.mxu0 %v9295_v49  ;;  %v2789_v34 = vrot.slane %v2088_v47, %v2788_v32 }
 0x75a   : > { %3964 = vmatprep.subr.bf16.mxu1 %v9298_v50 }
 0x75c   : > { %3912 = vmatpush1.bf16.msra.mxu0 %v9293_v45 }
 0x75d   : > { %3965 = vmatpush1.bf16.msra.mxu1 %v9296_v51  ;;  %3913 = vmatprep.subr.bf16.mxu0 %v9301_v53 }
 0x75e   : > { %3966 = vmatprep.subr.bf16.mxu1 %v9304_v55  ;;  %v2797_v55 = vadd.f32 %v2789_v34, %v10693_v26  ;;  %v2801_v26 = vadd.f32 %v2789_v34, %v10701_v28  ;;  %v2805_v28 = vadd.f32 %v2789_v34, %v10709_v30  ;;  %v2809_v30 = vadd.f32 %v2789_v34, %v10717_v43 }
 0x760   : > { %3914 = vmatpush2.bf16.msra.mxu0 %v9299_v56 }
 0x761   : > { %3967 = vmatpush2.bf16.msra.mxu1 %v9302_v57  ;;  %3915 = vmatprep.subr.bf16.mxu0 %v9307_v58  ;;  %v2798_v58 = vadd.f32 %v2777_v33, %v10695_v27  ;;  %v2802_v27 = vadd.f32 %v2777_v33, %v10703_v29  ;;  %v2806_v29 = vadd.f32 %v2777_v33, %v10711_v40 }
 0x762   : > { %3968 = vmatprep.subr.bf16.mxu1 %v9310_v59 }
 0x764   : > { %3916 = vmatpush2.bf16.msra.mxu0 %v9305_v60 }
 0x765   : > { %3969 = vmatpush2.bf16.msra.mxu1 %v9308_v61  ;;  %3917 = vmatprep.subr.bf16.mxu0 %v9313_v62 }
 0x766   : > { %3970 = vmatprep.subr.bf16.mxu1 %v9316_v63 }
 0x768   : > { %3918 = vmatpush2.bf16.msra.mxu0 %v9311_v0 }
 0x769   : > { %3971 = vmatpush2.bf16.msra.mxu1 %v9314_v2  ;;  %3919 = vmatprep.subr.bf16.mxu0 %v9319_v5 }
 0x76a   : > { %3972 = vmatprep.subr.bf16.mxu1 %v9322_v7 }
 0x76c   : > { %3920 = vmatpush2.bf16.msra.mxu0 %v9317_v8 }
 0x76d   : > { %3973 = vmatpush2.bf16.msra.mxu1 %v9320_v9  ;;  %3921 = vmatprep.subr.bf16.mxu0 %v9325_v10 }
 0x76e   : > { %3974 = vmatprep.subr.bf16.mxu1 %v9328_v11 }
 0x770   : > { %3922 = vmatpush2.bf16.msra.mxu0 %v9323_v12 }
 0x771   : > { %3975 = vmatpush2.bf16.msra.mxu1 %v9326_v13  ;;  %3923 = vmatprep.subr.bf16.mxu0 %v9331_v14 }
 0x772   : > { %3976 = vmatprep.subr.bf16.mxu1 %v9334_v15 }
 0x774   : > { %3924 = vmatpush2.bf16.msra.mxu0 %v9329_v16 }
 0x775   : > { %3977 = vmatpush2.bf16.msra.mxu1 %v9332_v17  ;;  %3925 = vmatprep.subr.bf16.mxu0 %v9337_v18 }
 0x776   : > { %3978 = vmatprep.subr.bf16.mxu1 %v9340_v19 }
 0x778   : > { %3926 = vmatpush2.bf16.msra.mxu0 %v9335_v20 }
 0x779   : > { %3979 = vmatpush2.bf16.msra.mxu1 %v9338_v21  ;;  %3927 = vmatprep.subr.bf16.mxu0 %v9343_v22 }
 0x77a   : > { %3980 = vmatprep.subr.bf16.mxu1 %v9346_v44 }
 0x77c   : > { %3928 = vmatpush2.bf16.msra.mxu0 %v9341_v31 }
 0x77d   : > { %3981 = vmatpush2.bf16.msra.mxu1 %v9344_v46 }
 0x77f   : > { %3930 = vmatmul.mubr.bf16.vlgmr.msra.gmra.mxu0 %v10644_v39 }
 0x780   : > { %3983 = vmatmul.mubr.bf16.vlgmr.msra.gmra.mxu1 %v10644_v39  ;;  %3939 = vmatprep.mubr.bf16.mxu0 %v10655_v54  ;;  %v2785_v39 = vrot.slane %v2088_v47, %v2784_v48 }
 0x781   : > { %3992 = vmatprep.mubr.bf16.mxu1 %v10655_v54  ;;  %v2781_v54 = vrot.slane %v2088_v47, %v10633_v6 }
 0x782   : > { %v2796_v49 = vadd.f32 %v2785_v39, %v10689_v24 }
 0x783   : > { %v2795_v45 = vadd.f32 %v2781_v54, %v10691_v25  ;;  %v2799_v25 = vadd.f32 %v2781_v54, %v10699_v35  ;;  %v2803_v35 = vadd.f32 %v2781_v54, %v10707_v38  ;;  %v2807_v38 = vadd.f32 %v2781_v54, %v10715_v42 }
 0x787   : > { %3940 = vmatmul.mubr.bf16.gmra.mxu0 %v10653_v52 }
 0x788   : > { %3993 = vmatmul.mubr.bf16.gmra.mxu1 %v10653_v52  ;;  %4084 = vmatprep.mubr.f32.mxu0 %v10290_v36  ;;  %v2794_v52 = vadd.f32 %v2777_v33, %v10687_v23  ;;  %v2800_v23 = vadd.f32 %v2785_v39, %v10697_v4  ;;  %v2804_v4 = vadd.f32 %v2785_v39, %v10705_v37 }
 0x789   : > { %4173 = vmatprep.mubr.f32.mxu1 %v10290_v36  ;;  %v2808_v37 = vadd.f32 %v2785_v39, %v10713_v41 }
 0x7fe   : > { %v3384_v50 = vpop.f32.mrf.mxu0 }
 0x7ff   : > { %v10754_v51 = vadd.f32 %v3384_v50, %v2794_v52  ;;  %v3473_v53 = vpop.f32.mrf.mxu1 }
 0x800   : > { %v10757_v56 = vadd.f32 %v3473_v53, %v2796_v49  ;;  %v3386_v57 = vpop.f32.mrf.mxu0 }
 0x801   : > { %v10760_v59 = vadd.f32 %v3386_v57, %v2795_v45  ;;  %v3475_v60 = vpop.f32.mrf.mxu1  ;;  %v4004_v57 = vld [vmem:[#allocation12 + $0x40] sm:$0xff] }
 0x802   : > { %v10763_v61 = vadd.f32 %v3475_v60, %v2797_v55  ;;  %v3390_v24 = vpop.f32.mrf.mxu0  ;;  %v9347_v60 = vld [vmem:[#allocation18 + $0xe0] ss:$16 sps:$4 sm:$0xff]  }
 0x803   : > { %v10766_v62 = vadd.f32 %v3390_v24, %v2798_v58  ;;  %v3479_v63 = vpop.f32.mrf.mxu1  ;;  %v9349_v58 = vld [vmem:[#allocation18 + $0xe4] ss:$16 sps:$4 sm:$0xff]   ;;  %v9350_v24 = vld [vmem:[#allocation18 + $0x2e0] ss:$16 sps:$4 sm:$0xff]  }
 0x804   : > { %v10769_v0 = vadd.f32 %v3479_v63, %v2800_v23  ;;  %v3392_v2 = vpop.f32.mrf.mxu0  ;;  %v9352_v23 = vld [vmem:[#allocation18 + $0x2e4] ss:$16 sps:$4 sm:$0xff]  }
 0x805   : > { %v10772_v5 = vadd.f32 %v3392_v2, %v2799_v25  ;;  %v3481_v7 = vpop.f32.mrf.mxu1  ;;  %v4005_v25 = vld [vmem:[#allocation12 + $0x48] sm:$0xff] }
 0x806   : > { %v10775_v8 = vadd.f32 %v3481_v7, %v2801_v26  ;;  %v3396_v9 = vpop.f32.mrf.mxu0  ;;  %v9355_v63 = vld [vmem:[#allocation18 + $0xc4] ss:$16 sps:$4 sm:$0xff]   ;;  %v9353_v26 = vld [vmem:[#allocation18 + $0xc0] ss:$16 sps:$4 sm:$0xff]  }
 0x807   : > { %v10778_v10 = vadd.f32 %v3396_v9, %v2802_v27  ;;  %v3485_v11 = vpop.f32.mrf.mxu1  ;;  %v9358_v2 = vld [vmem:[#allocation18 + $0x2c4] ss:$16 sps:$4 sm:$0xff]   ;;  %v9356_v27 = vld [vmem:[#allocation18 + $0x2c0] ss:$16 sps:$4 sm:$0xff]  }
 0x808   : > { %v10781_v12 = vadd.f32 %v3485_v11, %v2804_v4  ;;  %v3398_v13 = vpop.f32.mrf.mxu0  ;;  %v4006_v7 = vld [vmem:[#allocation12 + $0x50] sm:$0xff]  ;;  %v9361_v4 = vld [vmem:[#allocation18 + $0xa4] ss:$16 sps:$4 sm:$0xff]  }
 0x809   : > { %v10784_v14 = vadd.f32 %v3398_v13, %v2803_v35  ;;  %v3487_v15 = vpop.f32.mrf.mxu1  ;;  %v9359_v9 = vld [vmem:[#allocation18 + $0xa0] ss:$16 sps:$4 sm:$0xff]   ;;  %v9364_v35 = vld [vmem:[#allocation18 + $0x2a4] ss:$16 sps:$4 sm:$0xff]  }
 0x80a   : > { %v10787_v16 = vadd.f32 %v3487_v15, %v2805_v28  ;;  %v3402_v17 = vpop.f32.mrf.mxu0  ;;  %v9362_v11 = vld [vmem:[#allocation18 + $0x2a0] ss:$16 sps:$4 sm:$0xff]   ;;  %v4007_v28 = vld [vmem:[#allocation12 + $0x58] sm:$0xff] }
 0x80b   : > { %v10790_v18 = vadd.f32 %v3402_v17, %v2806_v29  ;;  %v3491_v19 = vpop.f32.mrf.mxu1  ;;  %v9367_v13 = vld [vmem:[#allocation18 + $0x84] ss:$16 sps:$4 sm:$0xff]   ;;  %v9365_v15 = vld [vmem:[#allocation18 + $0x80] ss:$16 sps:$4 sm:$0xff]  }
 0x80c   : > { %v10793_v20 = vadd.f32 %v3491_v19, %v2808_v37  ;;  %v3404_v21 = vpop.f32.mrf.mxu0  ;;  %v9370_v29 = vld [vmem:[#allocation18 + $0x284] ss:$16 sps:$4 sm:$0xff]   ;;  %v9368_v37 = vld [vmem:[#allocation18 + $0x280] ss:$16 sps:$4 sm:$0xff]  }
 0x80d   : > { %v10795_v22 = vadd.f32 %v3404_v21, %v2807_v38  ;;  %v3493_v40 = vpop.f32.mrf.mxu1  ;;  %v9373_v17 = vld [vmem:[#allocation18 + $0x64] ss:$16 sps:$4 sm:$0xff]   ;;  %v9371_v19 = vld [vmem:[#allocation18 + $0x60] ss:$16 sps:$4 sm:$0xff]  }
 0x80e   : > { %v10797_v44 = vadd.f32 %v3493_v40, %v2809_v30  ;;  %v9376_v38 = vld [vmem:[#allocation18 + $0x264] ss:$16 sps:$4 sm:$0xff]   ;;  %v9374_v30 = vld [vmem:[#allocation18 + $0x260] ss:$16 sps:$4 sm:$0xff]  }
 0x80f   : > { %v9379_v21 = vld [vmem:[#allocation18 + $0x44] ss:$16 sps:$4 sm:$0xff]  }
 0x810   : > { %v9382_v40 = vld [vmem:[#allocation18 + $0x244] ss:$16 sps:$4 sm:$0xff]  }
 0x83f   : > { %v3931_v31 = vpop.f32.mrf.mxu0 }
 0x840   : > { %v3984_v41 = vpop.f32.mrf.mxu1 }
 0x841   : > { %v3933_v46 = vpop.f32.mrf.mxu0 }
 0x842   : > { %v3986_v47 = vpop.f32.mrf.mxu1 }
 0x843   : > { %v3935_v33 = vpop.f32.mrf.mxu0 }
 0x844   : > { %v3988_v39 = vpop.f32.mrf.mxu1 }
 0x845   : > { %v3937_v42 = vpop.f32.mrf.mxu0 }
 0x846   : > { %v3990_v54 = vpop.f32.mrf.mxu1 }
 0x847   : > { %v3941_v52 = vpop.f32.mrf.mxu0 }
 0x848   : > { %v3994_v49 = vpop.f32.mrf.mxu1 }
 0x849   : > { %v3943_v50 = vpop.f32.mrf.mxu0 }
 0x84a   : > { %v3996_v43 = vpop.f32.mrf.mxu1 }
 0x84b   : > { %v3945_v34 = vpop.f32.mrf.mxu0 }
 0x84c   : > { %v3998_v45 = vpop.f32.mrf.mxu1 }
 0x84d   : > { %v3947_v53 = vpop.f32.mrf.mxu0 }
 0x84e   : > { %v4000_v55 = vpop.f32.mrf.mxu1  ;;  %4044 = vmatprep.subr.mxu0 %v3947_v53  ;;  %v9403_v53 = vld [vmem:[#allocation18 + $0x1c4] ss:$16 sps:$4 sm:$0xff]  }
 0x84f   : > { %4133 = vmatprep.subr.mxu1 %v4000_v55  ;;  %4045 = vmatpush1.msra.mxu0 %v3945_v34  ;;  %v9395_v34 = vld [vmem:[#allocation18 + $0x1e0] ss:$16 sps:$4 sm:$0xff]   ;;  %v9406_v55 = vld [vmem:[#allocation18 + $0x3c4] ss:$16 sps:$4 sm:$0xff]  }
 0x850   : > { %4134 = vmatpush1.msra.mxu1 %v3998_v45  ;;  %4046 = vmatprep.subr.mxu0 %v3943_v50  ;;  %v9397_v50 = vld [vmem:[#allocation18 + $0x1e4] ss:$16 sps:$4 sm:$0xff]   ;;  %v9398_v45 = vld [vmem:[#allocation18 + $0x3e0] ss:$16 sps:$4 sm:$0xff]  }
 0x851   : > { %4135 = vmatprep.subr.mxu1 %v3996_v43  ;;  %4047 = vmatpush1.msra.mxu0 %v3941_v52  ;;  %v9389_v52 = vld [vmem:[#allocation18] ss:$16 sps:$4 sm:$0xff]   ;;  %v9400_v43 = vld [vmem:[#allocation18 + $0x3e4] ss:$16 sps:$4 sm:$0xff]  }
 0x852   : > { %4136 = vmatpush1.msra.mxu1 %v3994_v49  ;;  %4048 = vmatprep.subr.mxu0 %v3937_v42  ;;  %v9391_v42 = vld [vmem:[#allocation18 + $0x4] ss:$16 sps:$4 sm:$0xff]   ;;  %v9392_v49 = vld [vmem:[#allocation18 + $0x200] ss:$16 sps:$4 sm:$0xff]  }
 0x853   : > { %4137 = vmatprep.subr.mxu1 %v3990_v54  ;;  %4049 = vmatpush1.msra.mxu0 %v3935_v33  ;;  %v9383_v33 = vld [vmem:[#allocation18 + $0x20] ss:$16 sps:$4 sm:$0xff]   ;;  %v9394_v54 = vld [vmem:[#allocation18 + $0x204] ss:$16 sps:$4 sm:$0xff]  }
 0x854   : > { %4138 = vmatpush1.msra.mxu1 %v3988_v39  ;;  %4050 = vmatprep.subr.mxu0 %v3933_v46  ;;  %v9385_v46 = vld [vmem:[#allocation18 + $0x24] ss:$16 sps:$4 sm:$0xff]   ;;  %v9386_v39 = vld [vmem:[#allocation18 + $0x220] ss:$16 sps:$4 sm:$0xff]  }
 0x855   : > { %4139 = vmatprep.subr.mxu1 %v3986_v47  ;;  %4051 = vmatpush1.msra.mxu0 %v3931_v31  ;;  %v9377_v31 = vld [vmem:[#allocation18 + $0x40] ss:$16 sps:$4 sm:$0xff]   ;;  %v9388_v47 = vld [vmem:[#allocation18 + $0x224] ss:$16 sps:$4 sm:$0xff]  }
 0x856   : > { %4140 = vmatpush1.msra.mxu1 %v3984_v41  ;;  %8244 = vmatmul.mubr.msk.f32.vlgmr.msra.gmra.mxu0 %vm1427_vm1, %v4004_v57  ;;  %v9380_v41 = vld [vmem:[#allocation18 + $0x240] ss:$16 sps:$4 sm:$0xff]  }
 0x857   : > { %8248 = vmatmul.mubr.msk.f32.vlgmr.msra.gmra.mxu1 %vm1427_vm1, %v4004_v57  ;;  %4090 = vmatprep.mubr.f32.mxu0 %v10290_v36  ;;  %v9401_v57 = vld [vmem:[#allocation18 + $0x1c0] ss:$16 sps:$4 sm:$0xff]  }
 0x858   : > { %4179 = vmatprep.mubr.f32.mxu1 %v10290_v36  ;;  %5007 = vmatprep.subr.bf16.mxu0 %v9349_v58  ;;  %v9404_v58 = vld [vmem:[#allocation18 + $0x3c0] ss:$16 sps:$4 sm:$0xff]  }
 0x859   : > { %5060 = vmatprep.subr.bf16.mxu1 %v9352_v23  ;;  %5008 = vmatpush1.bf16.msra.mxu0 %v9347_v60  ;;  %v9409_v60 = vld [vmem:[#allocation18 + $0x1a4] ss:$16 sps:$4 sm:$0xff]  }
 0x85a   : > { %8245 = vmatmul.mubr.msk.f32.gmra.mxu0 %vm1427_vm1, %v4005_v25  ;;  %5061 = vmatpush1.bf16.msra.mxu1 %v9350_v24  ;;  %v9412_v23 = vld [vmem:[#allocation18 + $0x3a4] ss:$16 sps:$4 sm:$0xff]   ;;  %v9407_v24 = vld [vmem:[#allocation18 + $0x1a0] ss:$16 sps:$4 sm:$0xff]  }
 0x85b   : > { %8249 = vmatmul.mubr.msk.f32.gmra.mxu1 %vm1427_vm1, %v4005_v25  ;;  %4096 = vmatprep.mubr.f32.mxu0 %v10290_v36  ;;  %v9410_v25 = vld [vmem:[#allocation18 + $0x3a0] ss:$16 sps:$4 sm:$0xff]  }
 0x85c   : > { %4185 = vmatprep.mubr.f32.mxu1 %v10290_v36  ;;  %5009 = vmatprep.subr.bf16.mxu0 %v9355_v63  ;;  %v9415_v63 = vld [vmem:[#allocation18 + $0x184] ss:$16 sps:$4 sm:$0xff]  }
 0x85d   : > { %5062 = vmatprep.subr.bf16.mxu1 %v9358_v2  ;;  %5010 = vmatpush1.bf16.msra.mxu0 %v9353_v26  ;;  %v9418_v26 = vld [vmem:[#allocation18 + $0x384] ss:$16 sps:$4 sm:$0xff]   ;;  %v9413_v2 = vld [vmem:[#allocation18 + $0x180] ss:$16 sps:$4 sm:$0xff]  }
 0x85e   : > { %8246 = vmatmul.mubr.msk.f32.gmra.mxu0 %vm1427_vm1, %v4006_v7  ;;  %5063 = vmatpush1.bf16.msra.mxu1 %v9356_v27  ;;  %v9416_v27 = vld [vmem:[#allocation18 + $0x380] ss:$16 sps:$4 sm:$0xff]  }
 0x85f   : > { %8250 = vmatmul.mubr.msk.f32.gmra.mxu1 %vm1427_vm1, %v4006_v7  ;;  %4102 = vmatprep.mubr.f32.mxu0 %v10290_v36  ;;  %v9421_v7 = vld [vmem:[#allocation18 + $0x164] ss:$16 sps:$4 sm:$0xff]  }
 0x860   : > { %4191 = vmatprep.mubr.f32.mxu1 %v10290_v36  ;;  %5011 = vmatprep.subr.bf16.mxu0 %v9361_v4  ;;  %v9424_v4 = vld [vmem:[#allocation18 + $0x364] ss:$16 sps:$4 sm:$0xff]  }
 0x861   : > { %5064 = vmatprep.subr.bf16.mxu1 %v9364_v35  ;;  %5012 = vmatpush1.bf16.msra.mxu0 %v9359_v9  ;;  %v9419_v9 = vld [vmem:[#allocation18 + $0x160] ss:$16 sps:$4 sm:$0xff]  }
 0x862   : > { %8247 = vmatmul.mubr.msk.f32.gmra.mxu0 %vm1427_vm1, %v4007_v28  ;;  %5065 = vmatpush1.bf16.msra.mxu1 %v9362_v11  ;;  %v9422_v35 = vld [vmem:[#allocation18 + $0x360] ss:$16 sps:$4 sm:$0xff]   ;;  %v9427_v11 = vld [vmem:[#allocation18 + $0x144] ss:$16 sps:$4 sm:$0xff]  }
 0x863   : > { %8251 = vmatmul.mubr.msk.f32.gmra.mxu1 %vm1427_vm1, %v4007_v28  ;;  %5013 = vmatprep.subr.bf16.mxu0 %v9367_v13  ;;  %v9430_v28 = vld [vmem:[#allocation18 + $0x344] ss:$16 sps:$4 sm:$0xff]   ;;  %v9425_v13 = vld [vmem:[#allocation18 + $0x140] ss:$16 sps:$4 sm:$0xff]  }
 0x864   : > { %5066 = vmatprep.subr.bf16.mxu1 %v9370_v29  ;;  %v9428_v29 = vld [vmem:[#allocation18 + $0x340] ss:$16 sps:$4 sm:$0xff]  }
 0x865   : > { %5014 = vmatpush1.bf16.msra.mxu0 %v9365_v15  ;;  %v9433_v15 = vld [vmem:[#allocation18 + $0x124] ss:$16 sps:$4 sm:$0xff]  }
 0x866   : > { %5067 = vmatpush1.bf16.msra.mxu1 %v9368_v37  ;;  %5015 = vmatprep.subr.bf16.mxu0 %v9373_v17  ;;  %v9436_v37 = vld [vmem:[#allocation18 + $0x324] ss:$16 sps:$4 sm:$0xff]   ;;  %v9431_v17 = vld [vmem:[#allocation18 + $0x120] ss:$16 sps:$4 sm:$0xff]  }
 0x867   : > { %5068 = vmatprep.subr.bf16.mxu1 %v9376_v38  ;;  %v9434_v38 = vld [vmem:[#allocation18 + $0x320] ss:$16 sps:$4 sm:$0xff]  }
 0x869   : > { %5016 = vmatpush1.bf16.msra.mxu0 %v9371_v19  ;;  %v9439_v19 = vld [vmem:[#allocation18 + $0x104] ss:$16 sps:$4 sm:$0xff]  }
 0x86a   : > { %5069 = vmatpush1.bf16.msra.mxu1 %v9374_v30  ;;  %5017 = vmatprep.subr.bf16.mxu0 %v9379_v21  ;;  %v9442_v30 = vld [vmem:[#allocation18 + $0x304] ss:$16 sps:$4 sm:$0xff]   ;;  %v9437_v21 = vld [vmem:[#allocation18 + $0x100] ss:$16 sps:$4 sm:$0xff]  }
 0x86b   : > { %5070 = vmatprep.subr.bf16.mxu1 %v9382_v40  ;;  %v9440_v40 = vld [vmem:[#allocation18 + $0x300] ss:$16 sps:$4 sm:$0xff]  }
 0x86d   : > { %5018 = vmatpush1.bf16.msra.mxu0 %v9377_v31  ;;  %v9445_v31 = vld [vmem:[#allocation18 + $0xec] ss:$16 sps:$4 sm:$0xff]  }
 0x86e   : > { %5071 = vmatpush1.bf16.msra.mxu1 %v9380_v41  ;;  %5019 = vmatprep.subr.bf16.mxu0 %v9385_v46  ;;  %v9448_v41 = vld [vmem:[#allocation18 + $0x2ec] ss:$16 sps:$4 sm:$0xff]  }
 0x86f   : > { %5072 = vmatprep.subr.bf16.mxu1 %v9388_v47 }
 0x871   : > { %5020 = vmatpush1.bf16.msra.mxu0 %v9383_v33 }
 0x872   : > { %5073 = vmatpush1.bf16.msra.mxu1 %v9386_v39  ;;  %5021 = vmatprep.subr.bf16.mxu0 %v9391_v42 }
 0x873   : > { %5074 = vmatprep.subr.bf16.mxu1 %v9394_v54 }
 0x875   : > { %5022 = vmatpush1.bf16.msra.mxu0 %v9389_v52 }
 0x876   : > { %5075 = vmatpush1.bf16.msra.mxu1 %v9392_v49  ;;  %5023 = vmatprep.subr.bf16.mxu0 %v9397_v50 }
 0x877   : > { %5076 = vmatprep.subr.bf16.mxu1 %v9400_v43 }
 0x879   : > { %5024 = vmatpush2.bf16.msra.mxu0 %v9395_v34 }
 0x87a   : > { %5077 = vmatpush2.bf16.msra.mxu1 %v9398_v45  ;;  %5025 = vmatprep.subr.bf16.mxu0 %v9403_v53 }
 0x87b   : > { %5078 = vmatprep.subr.bf16.mxu1 %v9406_v55 }
 0x87d   : > { %5026 = vmatpush2.bf16.msra.mxu0 %v9401_v57 }
 0x87e   : > { %5079 = vmatpush2.bf16.msra.mxu1 %v9404_v58  ;;  %5027 = vmatprep.subr.bf16.mxu0 %v9409_v60 }
 0x87f   : > { %5080 = vmatprep.subr.bf16.mxu1 %v9412_v23 }
 0x881   : > { %5028 = vmatpush2.bf16.msra.mxu0 %v9407_v24 }
 0x882   : > { %5081 = vmatpush2.bf16.msra.mxu1 %v9410_v25  ;;  %5029 = vmatprep.subr.bf16.mxu0 %v9415_v63 }
 0x883   : > { %5082 = vmatprep.subr.bf16.mxu1 %v9418_v26 }
 0x885   : > { %5030 = vmatpush2.bf16.msra.mxu0 %v9413_v2 }
 0x886   : > { %5083 = vmatpush2.bf16.msra.mxu1 %v9416_v27  ;;  %5031 = vmatprep.subr.bf16.mxu0 %v9421_v7 }
 0x887   : > { %5084 = vmatprep.subr.bf16.mxu1 %v9424_v4  ;;  %v9443_v4 = vld [vmem:[#allocation18 + $0xe8] ss:$16 sps:$4 sm:$0xff]  }
 0x889   : > { %5032 = vmatpush2.bf16.msra.mxu0 %v9419_v9 }
 0x88a   : > { %5085 = vmatpush2.bf16.msra.mxu1 %v9422_v35  ;;  %5033 = vmatprep.subr.bf16.mxu0 %v9427_v11  ;;  %v9446_v11 = vld [vmem:[#allocation18 + $0x2e8] ss:$16 sps:$4 sm:$0xff]  }
 0x88b   : > { %5086 = vmatprep.subr.bf16.mxu1 %v9430_v28  ;;  %v9451_v28 = vld [vmem:[#allocation18 + $0xcc] ss:$16 sps:$4 sm:$0xff]  }
 0x88d   : > { %5034 = vmatpush2.bf16.msra.mxu0 %v9425_v13 }
 0x88e   : > { %5087 = vmatpush2.bf16.msra.mxu1 %v9428_v29  ;;  %5035 = vmatprep.subr.bf16.mxu0 %v9433_v15 }
 0x88f   : > { %5088 = vmatprep.subr.bf16.mxu1 %v9436_v37  ;;  %v9454_v37 = vld [vmem:[#allocation18 + $0x2cc] ss:$16 sps:$4 sm:$0xff]  }
 0x891   : > { %5036 = vmatpush2.bf16.msra.mxu0 %v9431_v17 }
 0x892   : > { %5089 = vmatpush2.bf16.msra.mxu1 %v9434_v38  ;;  %5037 = vmatprep.subr.bf16.mxu0 %v9439_v19 }
 0x893   : > { %5090 = vmatprep.subr.bf16.mxu1 %v9442_v30 }
 0x895   : > { %5038 = vmatpush2.bf16.msra.mxu0 %v9437_v21 }
 0x896   : > { %5091 = vmatpush2.bf16.msra.mxu1 %v9440_v40  ;;  %5113 = vmatprep.subr.bf16.mxu0 %v9445_v31  ;;  %v9457_v31 = vld [vmem:[#allocation18 + $0xac] ss:$16 sps:$4 sm:$0xff]  }
 0x897   : > { %5166 = vmatprep.subr.bf16.mxu1 %v9448_v41 }
 0x916   : > { %v4086_v46 = vpop.f32.mrf.mxu0 }
 0x917   : > { %v4175_v47 = vpop.f32.mrf.mxu1  ;;  %v4198_v39 = vadd.f32 %v4086_v46, %v10754_v51 }
 0x918   : > { %v4088_v33 = vpop.f32.mrf.mxu0  ;;  %v4200_v54 = vadd.f32 %v4175_v47, %v10757_v56 }
 0x919   : > { %v4177_v42 = vpop.f32.mrf.mxu1  ;;  %v4199_v49 = vadd.f32 %v4088_v33, %v10760_v59  ;;  %v4214_v55 = vmax.f32 %v4198_v39, 0.0  ;;  %v9460_v33 = vld [vmem:[#allocation18 + $0x2ac] ss:$16 sps:$4 sm:$0xff]  }
 0x91a   : > { %v4092_v52 = vpop.f32.mrf.mxu0  ;;  %v4201_v34 = vadd.f32 %v4177_v42, %v10763_v61  ;;  %v4216_v51 = vmax.f32 %v4200_v54, 0.0 }
 0x91b   : > { %v4202_v50 = vadd.f32 %v4092_v52, %v10766_v62  ;;  %v4181_v43 = vpop.f32.mrf.mxu1  ;;  %v4215_v25 = vmax.f32 %v4199_v49, 0.0  ;;  %v9455_v52 = vld [vmem:[#allocation18 + $0xa8] ss:$16 sps:$4 sm:$0xff]  }
 0x91c   : > { %v4204_v45 = vadd.f32 %v4181_v43, %v10769_v0  ;;  %v4094_v53 = vpop.f32.mrf.mxu0  ;;  %v4217_v26 = vmax.f32 %v4201_v34, 0.0  ;;  %v9466_v43 = vld [vmem:[#allocation18 + $0x28c] ss:$16 sps:$4 sm:$0xff]   ;;  %v9461_v34 = vld [vmem:[#allocation18 + $0x88] ss:$16 sps:$4 sm:$0xff]  }
 0x91d   : > { %v4218_v57 = vmax.f32 %v4202_v50, 0.0  ;;  %v4203_v58 = vadd.f32 %v4094_v53, %v10772_v5  ;;  %v4183_v60 = vpop.f32.mrf.mxu1  ;;  %v9463_v50 = vld [vmem:[#allocation18 + $0x8c] ss:$16 sps:$4 sm:$0xff]  }
 0x91e   : > { %v4220_v23 = vmax.f32 %v4204_v45, 0.0  ;;  %v4205_v56 = vadd.f32 %v4183_v60, %v10775_v8  ;;  %v4098_v24 = vpop.f32.mrf.mxu0  ;;  %v9464_v45 = vld [vmem:[#allocation18 + $0x288] ss:$16 sps:$4 sm:$0xff]   ;;  %v9469_v53 = vld [vmem:[#allocation18 + $0x6c] ss:$16 sps:$4 sm:$0xff]  }
 0x91f   : > { %v10821_v59 = vpack.c.bf16 %v4218_v57, %v4214_v55  ;;  %v4219_v62 = vmax.f32 %v4203_v58, 0.0  ;;  %v4187_v63 = vpop.f32.mrf.mxu1  ;;  %v4206_v5 = vadd.f32 %v4098_v24, %v10778_v10  ;;  %v9472_v55 = vld [vmem:[#allocation18 + $0x26c] ss:$16 sps:$4 sm:$0xff]   ;;  %v9467_v57 = vld [vmem:[#allocation18 + $0x68] ss:$16 sps:$4 sm:$0xff]  }
 0x920   : > { %v10823_v61 = vpack.c.bf16 %v4220_v23, %v4216_v51  ;;  %v4221_v0 = vmax.f32 %v4205_v56, 0.0  ;;  %v4100_v2 = vpop.f32.mrf.mxu0  ;;  %v4208_v8 = vadd.f32 %v4187_v63, %v10781_v12  ;;  %v9470_v58 = vld [vmem:[#allocation18 + $0x268] ss:$16 sps:$4 sm:$0xff]   ;;  %v9475_v60 = vld [vmem:[#allocation18 + $0x4c] ss:$16 sps:$4 sm:$0xff]  }
 0x921   : > { %v10825_v27 = vpack.c.bf16 %v4219_v62, %v4215_v25  ;;  %v4189_v7 = vpop.f32.mrf.mxu1  ;;  %v4207_v13 = vadd.f32 %v4100_v2, %v10784_v14  ;;  %v4222_v12 = vmax.f32 %v4206_v5, 0.0  ;;  %v9478_v51 = vld [vmem:[#allocation18 + $0x24c] ss:$16 sps:$4 sm:$0xff]   ;;  %v9473_v23 = vld [vmem:[#allocation18 + $0x48] ss:$16 sps:$4 sm:$0xff]  }
 0x922   : > { %v10828_v9 = vpack.c.bf16 %v4221_v0, %v4217_v26  ;;  %v4104_v35 = vpop.f32.mrf.mxu0  ;;  %v4209_v17 = vadd.f32 %v4189_v7, %v10787_v16  ;;  %v4224_v21 = vmax.f32 %v4208_v8, 0.0  ;;  %v9476_v56 = vld [vmem:[#allocation18 + $0x248] ss:$16 sps:$4 sm:$0xff]   ;;  %v9481_v24 = vld [vmem:[#allocation18 + $0x2c] ss:$16 sps:$4 sm:$0xff]  }
 0x923   : > { %v4210_v29 = vadd.f32 %v4104_v35, %v10790_v18  ;;  %v4193_v15 = vpop.f32.mrf.mxu1  ;;  %5039 = vmatprep.mubr.bf16.mxu0 %v10825_v27  ;;  %v9449_v18 = vld [vmem:[#allocation18 + $0xc8] ss:$16 sps:$4 sm:$0xff]   ;;  %v4223_v41 = vmax.f32 %v4207_v13, 0.0  ;;  %v9484_v25 = vld [vmem:[#allocation18 + $0x22c] ss:$16 sps:$4 sm:$0xff]  }
 0x924   : > { %v4212_v10 = vadd.f32 %v4193_v15, %v10793_v20  ;;  %5092 = vmatprep.mubr.bf16.mxu1 %v10828_v9  ;;  %v4106_v38 = vpop.f32.mrf.mxu0  ;;  %5040 = vmatmul.mubr.bf16.vlgmr.msra.gmra.mxu0 %v10821_v59  ;;  %v9452_v20 = vld [vmem:[#allocation18 + $0x2c8] ss:$16 sps:$4 sm:$0xff]   ;;  %v9487_v26 = vld [vmem:[#allocation18 + $0xc] ss:$16 sps:$4 sm:$0xff]  }
 0x925   : > { %v4226_v19 = vmax.f32 %v4210_v29, 0.0  ;;  %v4211_v30 = vadd.f32 %v4106_v38, %v10795_v22  ;;  %v4195_v14 = vpop.f32.mrf.mxu1  ;;  %5093 = vmatmul.mubr.bf16.vlgmr.msra.gmra.mxu1 %v10823_v61  ;;  %5114 = vmatpush1.bf16.msra.mxu0 %v9443_v4  ;;  %v4225_v22 = vmax.f32 %v4209_v17, 0.0  ;;  %v9479_v62 = vld [vmem:[#allocation18 + $0x28] ss:$16 sps:$4 sm:$0xff]   ;;  %v9490_v0 = vld [vmem:[#allocation18 + $0x20c] ss:$16 sps:$4 sm:$0xff]  }
 0x926   : > { %v4228_v40 = vmax.f32 %v4212_v10, 0.0  ;;  %v4213_v16 = vadd.f32 %v4195_v14, %v10797_v44  ;;  %5167 = vmatpush1.bf16.msra.mxu1 %v9446_v11  ;;  %5115 = vmatprep.subr.bf16.mxu0 %v9451_v28  ;;  %v9458_v44 = vld [vmem:[#allocation18 + $0x2a8] ss:$16 sps:$4 sm:$0xff]   ;;  %v9493_v7 = vld [vmem:[#allocation18 + $0x1ec] ss:$16 sps:$4 sm:$0xff]  }
 0x927   : > { %v10841_v46 = vpack.c.bf16 %v4226_v19, %v4222_v12  ;;  %v4227_v47 = vmax.f32 %v4211_v30, 0.0  ;;  %5168 = vmatprep.subr.bf16.mxu1 %v9454_v37  ;;  %v9482_v63 = vld [vmem:[#allocation18 + $0x228] ss:$16 sps:$4 sm:$0xff]   ;;  %v9496_v4 = vld [vmem:[#allocation18 + $0x3ec] ss:$16 sps:$4 sm:$0xff]  }
 0x928   : > { %v10843_v39 = vpack.c.bf16 %v4228_v40, %v4224_v21  ;;  %v4229_v42 = vmax.f32 %v4213_v16, 0.0  ;;  %v9485_v2 = vld [vmem:[#allocation18 + $0x8] ss:$16 sps:$4 sm:$0xff]   ;;  %v9499_v11 = vld [vmem:[#allocation18 + $0x1cc] ss:$16 sps:$4 sm:$0xff]  }
 0x929   : > { %v10845_v54 = vpack.c.bf16 %v4227_v47, %v4223_v41  ;;  %5116 = vmatpush1.bf16.msra.mxu0 %v9449_v18  ;;  %v9488_v5 = vld [vmem:[#allocation18 + $0x208] ss:$16 sps:$4 sm:$0xff]   ;;  %v9502_v28 = vld [vmem:[#allocation18 + $0x3cc] ss:$16 sps:$4 sm:$0xff]  }
 0x92a   : > { %v10847_v49 = vpack.c.bf16 %v4229_v42, %v4225_v22  ;;  %5169 = vmatpush1.bf16.msra.mxu1 %v9452_v20  ;;  %5117 = vmatprep.subr.bf16.mxu0 %v9457_v31  ;;  %v9491_v8 = vld [vmem:[#allocation18 + $0x1e8] ss:$16 sps:$4 sm:$0xff]   ;;  %v9505_v15 = vld [vmem:[#allocation18 + $0x1ac] ss:$16 sps:$4 sm:$0xff]  }
 0x92b   : > { %5049 = vmatprep.mubr.bf16.mxu0 %v10845_v54  ;;  %5170 = vmatprep.subr.bf16.mxu1 %v9460_v33  ;;  %v9494_v35 = vld [vmem:[#allocation18 + $0x3e8] ss:$16 sps:$4 sm:$0xff]   ;;  %v9508_v37 = vld [vmem:[#allocation18 + $0x3ac] ss:$16 sps:$4 sm:$0xff]  }
 0x92c   : > { %5102 = vmatprep.mubr.bf16.mxu1 %v10847_v49  ;;  %5050 = vmatmul.mubr.bf16.gmra.mxu0 %v10841_v46  ;;  %v9497_v13 = vld [vmem:[#allocation18 + $0x1c8] ss:$16 sps:$4 sm:$0xff]   ;;  %v9511_v38 = vld [vmem:[#allocation18 + $0x18c] ss:$16 sps:$4 sm:$0xff]  }
 0x92d   : > { %5103 = vmatmul.mubr.bf16.gmra.mxu1 %v10843_v39  ;;  %5118 = vmatpush1.bf16.msra.mxu0 %v9455_v52  ;;  %v9500_v29 = vld [vmem:[#allocation18 + $0x3c8] ss:$16 sps:$4 sm:$0xff]   ;;  %v9514_v12 = vld [vmem:[#allocation18 + $0x38c] ss:$16 sps:$4 sm:$0xff]  }
 0x92e   : > { %5171 = vmatpush1.bf16.msra.mxu1 %v9458_v44  ;;  %5145 = vmatprep.mubr.bf16.mxu0 %v10825_v27  ;;  %v9503_v17 = vld [vmem:[#allocation18 + $0x1a8] ss:$16 sps:$4 sm:$0xff]   ;;  %v9517_v14 = vld [vmem:[#allocation18 + $0x16c] ss:$16 sps:$4 sm:$0xff]  }
 0x92f   : > { %5198 = vmatprep.mubr.bf16.mxu1 %v10828_v9  ;;  %5119 = vmatprep.subr.bf16.mxu0 %v9463_v50  ;;  %v9506_v10 = vld [vmem:[#allocation18 + $0x3a8] ss:$16 sps:$4 sm:$0xff]   ;;  %v9520_v18 = vld [vmem:[#allocation18 + $0x36c] ss:$16 sps:$4 sm:$0xff]  }
 0x930   : > { %5172 = vmatprep.subr.bf16.mxu1 %v9466_v43  ;;  %v9509_v19 = vld [vmem:[#allocation18 + $0x188] ss:$16 sps:$4 sm:$0xff]   ;;  %v9523_v16 = vld [vmem:[#allocation18 + $0x14c] ss:$16 sps:$4 sm:$0xff]  }
 0x931   : > { %5120 = vmatpush1.bf16.msra.mxu0 %v9461_v34  ;;  %v9512_v30 = vld [vmem:[#allocation18 + $0x388] ss:$16 sps:$4 sm:$0xff]   ;;  %v9526_v20 = vld [vmem:[#allocation18 + $0x34c] ss:$16 sps:$4 sm:$0xff]   ;;  %v9541_v34 = vld [vmem:[#allocation18 + $0x4e4] ss:$16 sps:$4 sm:$0xff]  }
 0x932   : > { %5173 = vmatpush1.bf16.msra.mxu1 %v9464_v45  ;;  %5121 = vmatprep.subr.bf16.mxu0 %v9469_v53  ;;  %v9515_v21 = vld [vmem:[#allocation18 + $0x168] ss:$16 sps:$4 sm:$0xff]   ;;  %v9529_v47 = vld [vmem:[#allocation18 + $0x12c] ss:$16 sps:$4 sm:$0xff]   ;;  %v9539_v45 = vld [vmem:[#allocation18 + $0x4e0] ss:$16 sps:$4 sm:$0xff]  }
 0x933   : > { %5174 = vmatprep.subr.bf16.mxu1 %v9472_v55  ;;  %v9518_v40 = vld [vmem:[#allocation18 + $0x368] ss:$16 sps:$4 sm:$0xff]   ;;  %v9532_v33 = vld [vmem:[#allocation18 + $0x32c] ss:$16 sps:$4 sm:$0xff]   ;;  %v9544_v53 = vld [vmem:[#allocation18 + $0x4c4] ss:$16 sps:$4 sm:$0xff]  }
 0x934   : > { %v9521_v31 = vld [vmem:[#allocation18 + $0x148] ss:$16 sps:$4 sm:$0xff]   ;;  %v9535_v52 = vld [vmem:[#allocation18 + $0x10c] ss:$16 sps:$4 sm:$0xff]   ;;  %v9542_v55 = vld [vmem:[#allocation18 + $0x4c0] ss:$16 sps:$4 sm:$0xff]  }
 0x935   : > { %5122 = vmatpush1.bf16.msra.mxu0 %v9467_v57  ;;  %v9524_v41 = vld [vmem:[#allocation18 + $0x348] ss:$16 sps:$4 sm:$0xff]   ;;  %v9538_v44 = vld [vmem:[#allocation18 + $0x30c] ss:$16 sps:$4 sm:$0xff]   ;;  %v9547_v57 = vld [vmem:[#allocation18 + $0x4a4] ss:$16 sps:$4 sm:$0xff]  }
 0x936   : > { %5175 = vmatpush1.bf16.msra.mxu1 %v9470_v58  ;;  %5123 = vmatprep.subr.bf16.mxu0 %v9475_v60  ;;  %v9527_v22 = vld [vmem:[#allocation18 + $0x128] ss:$16 sps:$4 sm:$0xff]   ;;  %v9545_v58 = vld [vmem:[#allocation18 + $0x4a0] ss:$16 sps:$4 sm:$0xff]   ;;  %v9550_v60 = vld [vmem:[#allocation18 + $0x484] ss:$16 sps:$4 sm:$0xff]  }
 0x937   : > { %5176 = vmatprep.subr.bf16.mxu1 %v9478_v51  ;;  %v9530_v42 = vld [vmem:[#allocation18 + $0x328] ss:$16 sps:$4 sm:$0xff]   ;;  %v9548_v51 = vld [vmem:[#allocation18 + $0x480] ss:$16 sps:$4 sm:$0xff]  }
 0x938   : > { %v9533_v50 = vld [vmem:[#allocation18 + $0x108] ss:$16 sps:$4 sm:$0xff]  }
 0x939   : > { %5124 = vmatpush1.bf16.msra.mxu0 %v9473_v23  ;;  %v9536_v43 = vld [vmem:[#allocation18 + $0x308] ss:$16 sps:$4 sm:$0xff]   ;;  %v9553_v23 = vld [vmem:[#allocation18 + $0x464] ss:$16 sps:$4 sm:$0xff]  }
 0x93a   : > { %5177 = vmatpush1.bf16.msra.mxu1 %v9476_v56  ;;  %5125 = vmatprep.subr.bf16.mxu0 %v9481_v24  ;;  %v9551_v56 = vld [vmem:[#allocation18 + $0x460] ss:$16 sps:$4 sm:$0xff]   ;;  %v9556_v24 = vld [vmem:[#allocation18 + $0x444] ss:$16 sps:$4 sm:$0xff]  }
 0x93b   : > { %5178 = vmatprep.subr.bf16.mxu1 %v9484_v25  ;;  %v9554_v25 = vld [vmem:[#allocation18 + $0x440] ss:$16 sps:$4 sm:$0xff]  }
 0x93d   : > { %5126 = vmatpush1.bf16.msra.mxu0 %v9479_v62  ;;  %v9559_v62 = vld [vmem:[#allocation18 + $0x424] ss:$16 sps:$4 sm:$0xff]  }
 0x93e   : > { %5179 = vmatpush1.bf16.msra.mxu1 %v9482_v63  ;;  %5127 = vmatprep.subr.bf16.mxu0 %v9487_v26  ;;  %v9557_v63 = vld [vmem:[#allocation18 + $0x420] ss:$16 sps:$4 sm:$0xff]   ;;  %v9562_v26 = vld [vmem:[#allocation18 + $0x404] ss:$16 sps:$4 sm:$0xff]  }
 0x93f   : > { %5180 = vmatprep.subr.bf16.mxu1 %v9490_v0  ;;  %v9560_v0 = vld [vmem:[#allocation18 + $0x400] ss:$16 sps:$4 sm:$0xff]  }
 0x941   : > { %5128 = vmatpush1.bf16.msra.mxu0 %v9485_v2  ;;  %v9565_v2 = vld [vmem:[#allocation18 + $0x5e4] ss:$16 sps:$4 sm:$0xff]  }
 0x942   : > { %5181 = vmatpush1.bf16.msra.mxu1 %v9488_v5  ;;  %5129 = vmatprep.subr.bf16.mxu0 %v9493_v7  ;;  %v9563_v5 = vld [vmem:[#allocation18 + $0x5e0] ss:$16 sps:$4 sm:$0xff]   ;;  %v9568_v7 = vld [vmem:[#allocation18 + $0x5c4] ss:$16 sps:$4 sm:$0xff]  }
 0x943   : > { %5182 = vmatprep.subr.bf16.mxu1 %v9496_v4  ;;  %v9566_v4 = vld [vmem:[#allocation18 + $0x5c0] ss:$16 sps:$4 sm:$0xff]  }
 0x945   : > { %5130 = vmatpush2.bf16.msra.mxu0 %v9491_v8  ;;  %v9571_v8 = vld [vmem:[#allocation18 + $0x5a4] ss:$16 sps:$4 sm:$0xff]  }
 0x946   : > { %5183 = vmatpush2.bf16.msra.mxu1 %v9494_v35  ;;  %5131 = vmatprep.subr.bf16.mxu0 %v9499_v11  ;;  %v9569_v35 = vld [vmem:[#allocation18 + $0x5a0] ss:$16 sps:$4 sm:$0xff]   ;;  %v9574_v11 = vld [vmem:[#allocation18 + $0x584] ss:$16 sps:$4 sm:$0xff]  }
 0x947   : > { %5184 = vmatprep.subr.bf16.mxu1 %v9502_v28  ;;  %v9572_v28 = vld [vmem:[#allocation18 + $0x580] ss:$16 sps:$4 sm:$0xff]  }
 0x949   : > { %5132 = vmatpush2.bf16.msra.mxu0 %v9497_v13  ;;  %v9577_v13 = vld [vmem:[#allocation18 + $0x564] ss:$16 sps:$4 sm:$0xff]  }
 0x94a   : > { %5185 = vmatpush2.bf16.msra.mxu1 %v9500_v29  ;;  %5133 = vmatprep.subr.bf16.mxu0 %v9505_v15  ;;  %v9575_v29 = vld [vmem:[#allocation18 + $0x560] ss:$16 sps:$4 sm:$0xff]   ;;  %v9580_v15 = vld [vmem:[#allocation18 + $0x544] ss:$16 sps:$4 sm:$0xff]  }
 0x94b   : > { %5186 = vmatprep.subr.bf16.mxu1 %v9508_v37  ;;  %v9578_v37 = vld [vmem:[#allocation18 + $0x540] ss:$16 sps:$4 sm:$0xff]  }
 0x94d   : > { %5134 = vmatpush2.bf16.msra.mxu0 %v9503_v17  ;;  %v9583_v17 = vld [vmem:[#allocation18 + $0x524] ss:$16 sps:$4 sm:$0xff]  }
 0x94e   : > { %5187 = vmatpush2.bf16.msra.mxu1 %v9506_v10  ;;  %5135 = vmatprep.subr.bf16.mxu0 %v9511_v38  ;;  %v9581_v10 = vld [vmem:[#allocation18 + $0x520] ss:$16 sps:$4 sm:$0xff]   ;;  %v9586_v38 = vld [vmem:[#allocation18 + $0x504] ss:$16 sps:$4 sm:$0xff]  }
 0x94f   : > { %5188 = vmatprep.subr.bf16.mxu1 %v9514_v12  ;;  %v9584_v12 = vld [vmem:[#allocation18 + $0x500] ss:$16 sps:$4 sm:$0xff]  }
 0x951   : > { %5136 = vmatpush2.bf16.msra.mxu0 %v9509_v19  ;;  %v9589_v19 = vld [vmem:[#allocation18 + $0x4ec] ss:$16 sps:$4 sm:$0xff]  }
 0x952   : > { %5189 = vmatpush2.bf16.msra.mxu1 %v9512_v30  ;;  %5137 = vmatprep.subr.bf16.mxu0 %v9517_v14  ;;  %v9587_v30 = vld [vmem:[#allocation18 + $0x4e8] ss:$16 sps:$4 sm:$0xff]   ;;  %v9592_v14 = vld [vmem:[#allocation18 + $0x4cc] ss:$16 sps:$4 sm:$0xff]  }
 0x953   : > { %5190 = vmatprep.subr.bf16.mxu1 %v9520_v18  ;;  %v9590_v18 = vld [vmem:[#allocation18 + $0x4c8] ss:$16 sps:$4 sm:$0xff]  }
 0x955   : > { %5138 = vmatpush2.bf16.msra.mxu0 %v9515_v21  ;;  %v9595_v21 = vld [vmem:[#allocation18 + $0x4ac] ss:$16 sps:$4 sm:$0xff]  }
 0x956   : > { %5191 = vmatpush2.bf16.msra.mxu1 %v9518_v40  ;;  %5139 = vmatprep.subr.bf16.mxu0 %v9523_v16  ;;  %v9593_v40 = vld [vmem:[#allocation18 + $0x4a8] ss:$16 sps:$4 sm:$0xff]   ;;  %v9598_v16 = vld [vmem:[#allocation18 + $0x48c] ss:$16 sps:$4 sm:$0xff]  }
 0x957   : > { %5192 = vmatprep.subr.bf16.mxu1 %v9526_v20  ;;  %v9596_v20 = vld [vmem:[#allocation18 + $0x488] ss:$16 sps:$4 sm:$0xff]  }
 0x959   : > { %5140 = vmatpush2.bf16.msra.mxu0 %v9521_v31  ;;  %v9601_v31 = vld [vmem:[#allocation18 + $0x46c] ss:$16 sps:$4 sm:$0xff]  }
 0x95a   : > { %5193 = vmatpush2.bf16.msra.mxu1 %v9524_v41  ;;  %5141 = vmatprep.subr.bf16.mxu0 %v9529_v47  ;;  %v9599_v41 = vld [vmem:[#allocation18 + $0x468] ss:$16 sps:$4 sm:$0xff]   ;;  %v9604_v47 = vld [vmem:[#allocation18 + $0x44c] ss:$16 sps:$4 sm:$0xff]  }
 0x95b   : > { %5194 = vmatprep.subr.bf16.mxu1 %v9532_v33  ;;  %v9602_v33 = vld [vmem:[#allocation18 + $0x448] ss:$16 sps:$4 sm:$0xff]  }
 0x95d   : > { %5142 = vmatpush2.bf16.msra.mxu0 %v9527_v22  ;;  %v9607_v22 = vld [vmem:[#allocation18 + $0x42c] ss:$16 sps:$4 sm:$0xff]  }
 0x95e   : > { %5195 = vmatpush2.bf16.msra.mxu1 %v9530_v42  ;;  %5143 = vmatprep.subr.bf16.mxu0 %v9535_v52  ;;  %v9605_v42 = vld [vmem:[#allocation18 + $0x428] ss:$16 sps:$4 sm:$0xff]   ;;  %v9610_v52 = vld [vmem:[#allocation18 + $0x40c] ss:$16 sps:$4 sm:$0xff]  }
 0x95f   : > { %5196 = vmatprep.subr.bf16.mxu1 %v9538_v44  ;;  %v9608_v44 = vld [vmem:[#allocation18 + $0x408] ss:$16 sps:$4 sm:$0xff]  }
 0x961   : > { %5144 = vmatpush2.bf16.msra.mxu0 %v9533_v50  ;;  %v9613_v50 = vld [vmem:[#allocation18 + $0x5ec] ss:$16 sps:$4 sm:$0xff]  }
 0x962   : > { %5197 = vmatpush2.bf16.msra.mxu1 %v9536_v43  ;;  %v9611_v43 = vld [vmem:[#allocation18 + $0x5e8] ss:$16 sps:$4 sm:$0xff]  }
 0x963   : > { %6179 = vmatprep.subr.bf16.mxu1 %v9541_v34  ;;  %v9616_v34 = vld [vmem:[#allocation18 + $0x5cc] ss:$16 sps:$4 sm:$0xff]  }
 0x964   : > { %5146 = vmatmul.mubr.bf16.vlgmr.msra.gmra.mxu0 %v10821_v59 }
 0x965   : > { %5199 = vmatmul.mubr.bf16.vlgmr.msra.gmra.mxu1 %v10823_v61  ;;  %5155 = vmatprep.mubr.bf16.mxu0 %v10845_v54 }
 0x966   : > { %5208 = vmatprep.mubr.bf16.mxu1 %v10847_v49  ;;  %6180 = vmatpush1.bf16.msra.mxu1 %v9539_v45  ;;  %v9614_v45 = vld [vmem:[#allocation18 + $0x5c8] ss:$16 sps:$4 sm:$0xff]  }
 0x967   : > { %6181 = vmatprep.subr.bf16.mxu1 %v9544_v53  ;;  %v9619_v53 = vld [vmem:[#allocation18 + $0x5ac] ss:$16 sps:$4 sm:$0xff]  }
 0x96a   : > { %6182 = vmatpush1.bf16.msra.mxu1 %v9542_v55  ;;  %v9617_v55 = vld [vmem:[#allocation18 + $0x5a8] ss:$16 sps:$4 sm:$0xff]  }
 0x96b   : > { %6183 = vmatprep.subr.bf16.mxu1 %v9547_v57  ;;  %v9622_v57 = vld [vmem:[#allocation18 + $0x58c] ss:$16 sps:$4 sm:$0xff]  }
 0x96c   : > { %5156 = vmatmul.mubr.bf16.gmra.mxu0 %v10841_v46 }
 0x96d   : > { %5209 = vmatmul.mubr.bf16.gmra.mxu1 %v10843_v39  ;;  %5291 = vmatprep.mubr.f32.mxu0 %v10290_v36 }
 0x96e   : > { %6184 = vmatpush1.bf16.msra.mxu1 %v9545_v58  ;;  %6211 = vmatprep.mubr.bf16.mxu1 %v10825_v27  ;;  %v9620_v58 = vld [vmem:[#allocation18 + $0x588] ss:$16 sps:$4 sm:$0xff]  }
 0x96f   : > { %6185 = vmatprep.subr.bf16.mxu1 %v9550_v60  ;;  %v9625_v60 = vld [vmem:[#allocation18 + $0x56c] ss:$16 sps:$4 sm:$0xff]  }
 0x972   : > { %6186 = vmatpush1.bf16.msra.mxu1 %v9548_v51  ;;  %v9623_v51 = vld [vmem:[#allocation18 + $0x568] ss:$16 sps:$4 sm:$0xff]  }
 0x973   : > { %6187 = vmatprep.subr.bf16.mxu1 %v9553_v23  ;;  %v9628_v23 = vld [vmem:[#allocation18 + $0x54c] ss:$16 sps:$4 sm:$0xff]  }
 0x976   : > { %6188 = vmatpush1.bf16.msra.mxu1 %v9551_v56  ;;  %v9626_v56 = vld [vmem:[#allocation18 + $0x548] ss:$16 sps:$4 sm:$0xff]  }
 0x977   : > { %6189 = vmatprep.subr.bf16.mxu1 %v9556_v24  ;;  %v9631_v24 = vld [vmem:[#allocation18 + $0x52c] ss:$16 sps:$4 sm:$0xff]  }
 0x97a   : > { %6190 = vmatpush1.bf16.msra.mxu1 %v9554_v25  ;;  %v9629_v25 = vld [vmem:[#allocation18 + $0x528] ss:$16 sps:$4 sm:$0xff]  }
 0x97b   : > { %6191 = vmatprep.subr.bf16.mxu1 %v9559_v62  ;;  %v9634_v62 = vld [vmem:[#allocation18 + $0x50c] ss:$16 sps:$4 sm:$0xff]  }
 0x97e   : > { %6192 = vmatpush1.bf16.msra.mxu1 %v9557_v63  ;;  %v9632_v63 = vld [vmem:[#allocation18 + $0x508] ss:$16 sps:$4 sm:$0xff]  }
 0x97f   : > { %6193 = vmatprep.subr.bf16.mxu1 %v9562_v26 }
 0x982   : > { %6194 = vmatpush1.bf16.msra.mxu1 %v9560_v0 }
 0x983   : > { %6195 = vmatprep.subr.bf16.mxu1 %v9565_v2 }
 0x986   : > { %6196 = vmatpush2.bf16.msra.mxu1 %v9563_v5 }
 0x987   : > { %6197 = vmatprep.subr.bf16.mxu1 %v9568_v7 }
 0x98a   : > { %6198 = vmatpush2.bf16.msra.mxu1 %v9566_v4 }
 0x98b   : > { %6199 = vmatprep.subr.bf16.mxu1 %v9571_v8 }
 0x98e   : > { %6200 = vmatpush2.bf16.msra.mxu1 %v9569_v35 }
 0x98f   : > { %6201 = vmatprep.subr.bf16.mxu1 %v9574_v11 }
 0x992   : > { %6202 = vmatpush2.bf16.msra.mxu1 %v9572_v28 }
 0x993   : > { %6203 = vmatprep.subr.bf16.mxu1 %v9577_v13 }
 0x996   : > { %6204 = vmatpush2.bf16.msra.mxu1 %v9575_v29 }
 0x997   : > { %6205 = vmatprep.subr.bf16.mxu1 %v9580_v15 }
 0x99a   : > { %6206 = vmatpush2.bf16.msra.mxu1 %v9578_v37 }
 0x99b   : > { %6207 = vmatprep.subr.bf16.mxu1 %v9583_v17 }
 0x99e   : > { %6208 = vmatpush2.bf16.msra.mxu1 %v9581_v10 }
 0x99f   : > { %6209 = vmatprep.subr.bf16.mxu1 %v9586_v38 }
 0x9a2   : > { %6210 = vmatpush2.bf16.msra.mxu1 %v9584_v12 }
 0x9a3   : > { %6285 = vmatprep.subr.bf16.mxu1 %v9589_v19 }
 0x9a5   : > { %6212 = vmatmul.mubr.bf16.vlgmr.msra.gmra.mxu1 %v10821_v59 }
 0x9a6   : > { %6221 = vmatprep.mubr.bf16.mxu1 %v10845_v54  ;;  %6286 = vmatpush1.bf16.msra.mxu1 %v9587_v30 }
 0x9a7   : > { %6287 = vmatprep.subr.bf16.mxu1 %v9592_v14 }
 0x9aa   : > { %6288 = vmatpush1.bf16.msra.mxu1 %v9590_v18 }
 0x9ab   : > { %6289 = vmatprep.subr.bf16.mxu1 %v9595_v21 }
 0x9ad   : > { %6222 = vmatmul.mubr.bf16.gmra.mxu1 %v10841_v46 }
 0x9ae   : > { %6290 = vmatpush1.bf16.msra.mxu1 %v9593_v40  ;;  %6317 = vmatprep.mubr.bf16.mxu1 %v10825_v27 }
 0x9af   : > { %6291 = vmatprep.subr.bf16.mxu1 %v9598_v16  ;;  %v5219_v16 = vld [vmem:[#allocation16] sm:$0xff] }
 0x9b2   : > { %6292 = vmatpush1.bf16.msra.mxu1 %v9596_v20  ;;  %v5220_v20 = vld [vmem:[#allocation16 + $0x8] sm:$0xff] }
 0x9b3   : > { %6293 = vmatprep.subr.bf16.mxu1 %v9601_v31 }
 0x9b6   : > { %6294 = vmatpush1.bf16.msra.mxu1 %v9599_v41 }
 0x9b7   : > { %6295 = vmatprep.subr.bf16.mxu1 %v9604_v47 }
 0x9ba   : > { %6296 = vmatpush1.bf16.msra.mxu1 %v9602_v33 }
 0x9bb   : > { %6297 = vmatprep.subr.bf16.mxu1 %v9607_v22 }
 0x9be   : > { %6298 = vmatpush1.bf16.msra.mxu1 %v9605_v42 }
 0x9bf   : > { %6299 = vmatprep.subr.bf16.mxu1 %v9610_v52 }
 0x9c2   : > { %6300 = vmatpush1.bf16.msra.mxu1 %v9608_v44 }
 0x9c3   : > { %6301 = vmatprep.subr.bf16.mxu1 %v9613_v50 }
 0x9c6   : > { %6302 = vmatpush2.bf16.msra.mxu1 %v9611_v43 }
 0x9c7   : > { %6303 = vmatprep.subr.bf16.mxu1 %v9616_v34 }
 0x9ca   : > { %6304 = vmatpush2.bf16.msra.mxu1 %v9614_v45 }
 0x9cb   : > { %6305 = vmatprep.subr.bf16.mxu1 %v9619_v53 }
 0x9ce   : > { %6306 = vmatpush2.bf16.msra.mxu1 %v9617_v55 }
 0x9cf   : > { %6307 = vmatprep.subr.bf16.mxu1 %v9622_v57 }
 0x9d2   : > { %6308 = vmatpush2.bf16.msra.mxu1 %v9620_v58 }
 0x9d3   : > { %6309 = vmatprep.subr.bf16.mxu1 %v9625_v60 }
 0x9d6   : > { %6310 = vmatpush2.bf16.msra.mxu1 %v9623_v51 }
 0x9d7   : > { %6311 = vmatprep.subr.bf16.mxu1 %v9628_v23 }
 0x9da   : > { %6312 = vmatpush2.bf16.msra.mxu1 %v9626_v56 }
 0x9db   : > { %6313 = vmatprep.subr.bf16.mxu1 %v9631_v24 }
 0x9de   : > { %6314 = vmatpush2.bf16.msra.mxu1 %v9629_v25 }
 0x9df   : > { %6315 = vmatprep.subr.bf16.mxu1 %v9634_v62 }
 0x9e2   : > { %6316 = vmatpush2.bf16.msra.mxu1 %v9632_v63  ;;  %v9637_v63 = vld [vmem:[#allocation18 + $0x6e4] ss:$16 sps:$4 sm:$0xff]  }
 0x9e4   : > { %v5041_v26 = vpop.f32.mrf.mxu0 }
 0x9e5   : > { %6318 = vmatmul.mubr.bf16.vlgmr.msra.gmra.mxu1 %v10821_v59  ;;  %v5094_v0 = vpop.f32.mrf.mxu1 }
 0x9e6   : > { %6327 = vmatprep.mubr.bf16.mxu1 %v10845_v54  ;;  %v5043_v2 = vpop.f32.mrf.mxu0  ;;  %v5095_v40 = vadd.f32 %v5094_v0, %v5041_v26  ;;  %v9635_v0 = vld [vmem:[#allocation18 + $0x6e0] ss:$16 sps:$4 sm:$0xff]  }
 0x9e7   : > { %v5096_v5 = vpop.f32.mrf.mxu1 }
 0x9e8   : > { %v5045_v7 = vpop.f32.mrf.mxu0  ;;  %v5097_v21 = vadd.f32 %v5096_v5, %v5043_v2  ;;  %v9640_v2 = vld [vmem:[#allocation18 + $0x6c4] ss:$16 sps:$4 sm:$0xff]   ;;  %v9638_v5 = vld [vmem:[#allocation18 + $0x6c0] ss:$16 sps:$4 sm:$0xff]  }
 0x9e9   : > { %v5098_v4 = vpop.f32.mrf.mxu1 }
 0x9ea   : > { %v5047_v8 = vpop.f32.mrf.mxu0  ;;  %v5099_v18 = vadd.f32 %v5098_v4, %v5045_v7  ;;  %v9643_v7 = vld [vmem:[#allocation18 + $0x6a4] ss:$16 sps:$4 sm:$0xff]   ;;  %v9641_v4 = vld [vmem:[#allocation18 + $0x6a0] ss:$16 sps:$4 sm:$0xff]  }
 0x9eb   : > { %v5100_v35 = vpop.f32.mrf.mxu1 }
 0x9ec   : > { %v5051_v11 = vpop.f32.mrf.mxu0  ;;  %v5101_v14 = vadd.f32 %v5100_v35, %v5047_v8  ;;  %v9646_v8 = vld [vmem:[#allocation18 + $0x684] ss:$16 sps:$4 sm:$0xff]   ;;  %v9644_v35 = vld [vmem:[#allocation18 + $0x680] ss:$16 sps:$4 sm:$0xff]  }
 0x9ed   : > { %6328 = vmatmul.mubr.bf16.gmra.mxu1 %v10841_v46  ;;  %v5104_v28 = vpop.f32.mrf.mxu1 }
 0x9ee   : > { %v5053_v13 = vpop.f32.mrf.mxu0  ;;  %6464 = vmatprep.mubr.f32.mxu1 %v10290_v36  ;;  %v5105_v30 = vadd.f32 %v5104_v28, %v5051_v11  ;;  %v9649_v11 = vld [vmem:[#allocation18 + $0x664] ss:$16 sps:$4 sm:$0xff]   ;;  %v9647_v28 = vld [vmem:[#allocation18 + $0x660] ss:$16 sps:$4 sm:$0xff]  }
 0x9ef   : > { %v5106_v29 = vpop.f32.mrf.mxu1 }
 0x9f0   : > { %v5055_v15 = vpop.f32.mrf.mxu0  ;;  %v5107_v19 = vadd.f32 %v5106_v29, %v5053_v13  ;;  %v9652_v13 = vld [vmem:[#allocation18 + $0x644] ss:$16 sps:$4 sm:$0xff]   ;;  %v9650_v29 = vld [vmem:[#allocation18 + $0x640] ss:$16 sps:$4 sm:$0xff]  }
 0x9f1   : > { %v5108_v37 = vpop.f32.mrf.mxu1 }
 0x9f2   : > { %v5057_v17 = vpop.f32.mrf.mxu0  ;;  %v5109_v12 = vadd.f32 %v5108_v37, %v5055_v15  ;;  %v9655_v15 = vld [vmem:[#allocation18 + $0x624] ss:$16 sps:$4 sm:$0xff]   ;;  %v9653_v37 = vld [vmem:[#allocation18 + $0x620] ss:$16 sps:$4 sm:$0xff]  }
 0x9f3   : > { %v5110_v10 = vpop.f32.mrf.mxu1 }
 0x9f4   : > { %v5111_v38 = vadd.f32 %v5110_v10, %v5057_v17  ;;  %v9658_v17 = vld [vmem:[#allocation18 + $0x604] ss:$16 sps:$4 sm:$0xff]   ;;  %v9656_v10 = vld [vmem:[#allocation18 + $0x600] ss:$16 sps:$4 sm:$0xff]  }
 0x9f6   : > { %5251 = vmatprep.subr.mxu0 %v5111_v38  ;;  %v9661_v38 = vld [vmem:[#allocation18 + $0x7e4] ss:$16 sps:$4 sm:$0xff]  }
 0x9f7   : > { %5252 = vmatpush1.msra.mxu0 %v5109_v12  ;;  %v9659_v12 = vld [vmem:[#allocation18 + $0x7e0] ss:$16 sps:$4 sm:$0xff]  }
 0x9f8   : > { %5253 = vmatprep.subr.mxu0 %v5107_v19  ;;  %v9664_v19 = vld [vmem:[#allocation18 + $0x7c4] ss:$16 sps:$4 sm:$0xff]  }
 0x9f9   : > { %5254 = vmatpush1.msra.mxu0 %v5105_v30  ;;  %v9662_v30 = vld [vmem:[#allocation18 + $0x7c0] ss:$16 sps:$4 sm:$0xff]  }
 0x9fa   : > { %5255 = vmatprep.subr.mxu0 %v5101_v14  ;;  %v9667_v14 = vld [vmem:[#allocation18 + $0x7a4] ss:$16 sps:$4 sm:$0xff]  }
 0x9fb   : > { %5256 = vmatpush1.msra.mxu0 %v5099_v18  ;;  %v9665_v18 = vld [vmem:[#allocation18 + $0x7a0] ss:$16 sps:$4 sm:$0xff]  }
 0x9fc   : > { %5257 = vmatprep.subr.mxu0 %v5097_v21  ;;  %v9670_v21 = vld [vmem:[#allocation18 + $0x784] ss:$16 sps:$4 sm:$0xff]  }
 0x9fd   : > { %5258 = vmatpush1.msra.mxu0 %v5095_v40  ;;  %v9668_v40 = vld [vmem:[#allocation18 + $0x780] ss:$16 sps:$4 sm:$0xff]  }
 0x9fe   : > { %8380 = vmatmul.mubr.msk.f32.vlgmr.msra.gmra.mxu0 %vm1427_vm1, %v5219_v16 }
 0x9ff   : > { %5297 = vmatprep.mubr.f32.mxu0 %v10290_v36 }
 0xa02   : > { %8381 = vmatmul.mubr.msk.f32.gmra.mxu0 %vm1427_vm1, %v5220_v20 }
 0xa03   : > { %5368 = vmatprep.mubr.f32.mxu0 %v10290_v36 }
 0xa24   : > { %v5147_v31 = vpop.f32.mrf.mxu0 }
 0xa25   : > { %v5200_v41 = vpop.f32.mrf.mxu1 }
 0xa26   : > { %v5149_v47 = vpop.f32.mrf.mxu0  ;;  %v5201_v26 = vadd.f32 %v5200_v41, %v5147_v31  ;;  %v9676_v31 = vld [vmem:[#allocation18 + $0x744] ss:$16 sps:$4 sm:$0xff]   ;;  %v9674_v41 = vld [vmem:[#allocation18 + $0x740] ss:$16 sps:$4 sm:$0xff]  }
 0xa27   : > { %v5202_v33 = vpop.f32.mrf.mxu1 }
 0xa28   : > { %v5151_v22 = vpop.f32.mrf.mxu0  ;;  %v5203_v62 = vadd.f32 %v5202_v33, %v5149_v47  ;;  %v9679_v47 = vld [vmem:[#allocation18 + $0x724] ss:$16 sps:$4 sm:$0xff]   ;;  %v9677_v33 = vld [vmem:[#allocation18 + $0x720] ss:$16 sps:$4 sm:$0xff]  }
 0xa29   : > { %v5204_v42 = vpop.f32.mrf.mxu1 }
 0xa2a   : > { %v5153_v52 = vpop.f32.mrf.mxu0  ;;  %v5205_v25 = vadd.f32 %v5204_v42, %v5151_v22  ;;  %v9682_v22 = vld [vmem:[#allocation18 + $0x704] ss:$16 sps:$4 sm:$0xff]   ;;  %v9680_v42 = vld [vmem:[#allocation18 + $0x700] ss:$16 sps:$4 sm:$0xff]  }
 0xa2b   : > { %v5206_v44 = vpop.f32.mrf.mxu1 }
 0xa2c   : > { %v5157_v50 = vpop.f32.mrf.mxu0  ;;  %v5207_v24 = vadd.f32 %v5206_v44, %v5153_v52  ;;  %v9685_v52 = vld [vmem:[#allocation18 + $0x6ec] ss:$16 sps:$4 sm:$0xff]   ;;  %v9683_v44 = vld [vmem:[#allocation18 + $0x6e8] ss:$16 sps:$4 sm:$0xff]  }
 0xa2d   : > { %v5210_v43 = vpop.f32.mrf.mxu1 }
 0xa2e   : > { %v5159_v34 = vpop.f32.mrf.mxu0  ;;  %v5211_v56 = vadd.f32 %v5210_v43, %v5157_v50  ;;  %v9688_v50 = vld [vmem:[#allocation18 + $0x6cc] ss:$16 sps:$4 sm:$0xff]   ;;  %v9686_v43 = vld [vmem:[#allocation18 + $0x6c8] ss:$16 sps:$4 sm:$0xff]  }
 0xa2f   : > { %v5212_v45 = vpop.f32.mrf.mxu1 }
 0xa30   : > { %v5161_v53 = vpop.f32.mrf.mxu0  ;;  %v5213_v23 = vadd.f32 %v5212_v45, %v5159_v34  ;;  %v9691_v34 = vld [vmem:[#allocation18 + $0x6ac] ss:$16 sps:$4 sm:$0xff]   ;;  %v9689_v45 = vld [vmem:[#allocation18 + $0x6a8] ss:$16 sps:$4 sm:$0xff]  }
 0xa31   : > { %v5214_v55 = vpop.f32.mrf.mxu1 }
 0xa32   : > { %v5163_v57 = vpop.f32.mrf.mxu0  ;;  %v5215_v51 = vadd.f32 %v5214_v55, %v5161_v53  ;;  %v9694_v53 = vld [vmem:[#allocation18 + $0x68c] ss:$16 sps:$4 sm:$0xff]   ;;  %v9692_v55 = vld [vmem:[#allocation18 + $0x688] ss:$16 sps:$4 sm:$0xff]  }
 0xa33   : > { %v5216_v58 = vpop.f32.mrf.mxu1 }
 0xa34   : > { %v5217_v60 = vadd.f32 %v5216_v58, %v5163_v57  ;;  %v9697_v57 = vld [vmem:[#allocation18 + $0x66c] ss:$16 sps:$4 sm:$0xff]   ;;  %v9695_v58 = vld [vmem:[#allocation18 + $0x668] ss:$16 sps:$4 sm:$0xff]  }
 0xa36   : > { %5328 = vmatprep.subr.mxu0 %v5217_v60  ;;  %v9700_v60 = vld [vmem:[#allocation18 + $0x64c] ss:$16 sps:$4 sm:$0xff]  }
 0xa37   : > { %5329 = vmatpush1.msra.mxu0 %v5215_v51  ;;  %v9698_v51 = vld [vmem:[#allocation18 + $0x648] ss:$16 sps:$4 sm:$0xff]  }
 0xa38   : > { %5330 = vmatprep.subr.mxu0 %v5213_v23  ;;  %v9703_v23 = vld [vmem:[#allocation18 + $0x62c] ss:$16 sps:$4 sm:$0xff]  }
 0xa39   : > { %5331 = vmatpush1.msra.mxu0 %v5211_v56  ;;  %v9701_v56 = vld [vmem:[#allocation18 + $0x628] ss:$16 sps:$4 sm:$0xff]  }
 0xa3a   : > { %5332 = vmatprep.subr.mxu0 %v5207_v24  ;;  %v9706_v24 = vld [vmem:[#allocation18 + $0x60c] ss:$16 sps:$4 sm:$0xff]  }
 0xa3b   : > { %5333 = vmatpush1.msra.mxu0 %v5205_v25  ;;  %v9704_v25 = vld [vmem:[#allocation18 + $0x608] ss:$16 sps:$4 sm:$0xff]  }
 0xa3c   : > { %5334 = vmatprep.subr.mxu0 %v5203_v62  ;;  %v9709_v62 = vld [vmem:[#allocation18 + $0x7ec] ss:$16 sps:$4 sm:$0xff]  }
 0xa3d   : > { %5335 = vmatpush1.msra.mxu0 %v5201_v26  ;;  %v9712_v26 = vld [vmem:[#allocation18 + $0x7cc] ss:$16 sps:$4 sm:$0xff]  }
 0xa3e   : > { %8382 = vmatmul.mubr.msk.f32.vlgmr.msra.gmra.mxu0 %vm1427_vm1, %v5219_v16  ;;  %6232 = vmatprep.subr.bf16.mxu0 %v9637_v63  ;;  %v9673_v16 = vld [vmem:[#allocation18 + $0x764] ss:$16 sps:$4 sm:$0xff]   ;;  %v9707_v63 = vld [vmem:[#allocation18 + $0x7e8] ss:$16 sps:$4 sm:$0xff]  }
 0xa3f   : > { %6233 = vmatpush1.bf16.msra.mxu0 %v9635_v0  ;;  %5374 = vmatprep.mubr.f32.mxu0 %v10290_v36  ;;  %v9710_v0 = vld [vmem:[#allocation18 + $0x7c8] ss:$16 sps:$4 sm:$0xff]  }
 0xa40   : > { %6234 = vmatprep.subr.bf16.mxu0 %v9640_v2  ;;  %v9715_v2 = vld [vmem:[#allocation18 + $0x7ac] ss:$16 sps:$4 sm:$0xff]  }
 0xa42   : > { %8383 = vmatmul.mubr.msk.f32.gmra.mxu0 %vm1427_vm1, %v5220_v20  ;;  %v9671_v20 = vld [vmem:[#allocation18 + $0x760] ss:$16 sps:$4 sm:$0xff]  }
 0xa43   : > { %6235 = vmatpush1.bf16.msra.mxu0 %v9638_v5  ;;  %6264 = vmatprep.mubr.bf16.mxu0 %v10828_v9  ;;  %v9713_v5 = vld [vmem:[#allocation18 + $0x7a8] ss:$16 sps:$4 sm:$0xff]  }
 0xa44   : > { %6236 = vmatprep.subr.bf16.mxu0 %v9643_v7  ;;  %v9718_v7 = vld [vmem:[#allocation18 + $0x78c] ss:$16 sps:$4 sm:$0xff]  }
 0xa47   : > { %6237 = vmatpush1.bf16.msra.mxu0 %v9641_v4  ;;  %v9716_v4 = vld [vmem:[#allocation18 + $0x788] ss:$16 sps:$4 sm:$0xff]  }
 0xa48   : > { %6238 = vmatprep.subr.bf16.mxu0 %v9646_v8  ;;  %v9721_v8 = vld [vmem:[#allocation18 + $0x76c] ss:$16 sps:$4 sm:$0xff]  }
 0xa4b   : > { %6239 = vmatpush1.bf16.msra.mxu0 %v9644_v35  ;;  %v9719_v35 = vld [vmem:[#allocation18 + $0x768] ss:$16 sps:$4 sm:$0xff]  }
 0xa4c   : > { %6240 = vmatprep.subr.bf16.mxu0 %v9649_v11  ;;  %v9724_v11 = vld [vmem:[#allocation18 + $0x74c] ss:$16 sps:$4 sm:$0xff]  }
 0xa4f   : > { %6241 = vmatpush1.bf16.msra.mxu0 %v9647_v28  ;;  %v9722_v28 = vld [vmem:[#allocation18 + $0x748] ss:$16 sps:$4 sm:$0xff]  }
 0xa50   : > { %6242 = vmatprep.subr.bf16.mxu0 %v9652_v13  ;;  %v9727_v13 = vld [vmem:[#allocation18 + $0x72c] ss:$16 sps:$4 sm:$0xff]  }
 0xa53   : > { %6243 = vmatpush1.bf16.msra.mxu0 %v9650_v29  ;;  %v9725_v29 = vld [vmem:[#allocation18 + $0x728] ss:$16 sps:$4 sm:$0xff]  }
 0xa54   : > { %6244 = vmatprep.subr.bf16.mxu0 %v9655_v15  ;;  %v9730_v15 = vld [vmem:[#allocation18 + $0x70c] ss:$16 sps:$4 sm:$0xff]  }
 0xa57   : > { %6245 = vmatpush1.bf16.msra.mxu0 %v9653_v37  ;;  %v9728_v37 = vld [vmem:[#allocation18 + $0x708] ss:$16 sps:$4 sm:$0xff]  }
 0xa58   : > { %6246 = vmatprep.subr.bf16.mxu0 %v9658_v17  ;;  %v9733_v17 = vld [vmem:[#allocation18 + $0x8e4] ss:$16 sps:$4 sm:$0xff]  }
 0xa5b   : > { %6247 = vmatpush1.bf16.msra.mxu0 %v9656_v10  ;;  %v9731_v10 = vld [vmem:[#allocation18 + $0x8e0] ss:$16 sps:$4 sm:$0xff]  }
 0xa5c   : > { %6248 = vmatprep.subr.bf16.mxu0 %v9661_v38  ;;  %v9736_v38 = vld [vmem:[#allocation18 + $0x8c4] ss:$16 sps:$4 sm:$0xff]  }
 0xa5f   : > { %6249 = vmatpush2.bf16.msra.mxu0 %v9659_v12  ;;  %v9734_v12 = vld [vmem:[#allocation18 + $0x8c0] ss:$16 sps:$4 sm:$0xff]  }
 0xa60   : > { %6250 = vmatprep.subr.bf16.mxu0 %v9664_v19  ;;  %v9739_v19 = vld [vmem:[#allocation18 + $0x8a4] ss:$16 sps:$4 sm:$0xff]  }
 0xa63   : > { %6251 = vmatpush2.bf16.msra.mxu0 %v9662_v30  ;;  %v9737_v30 = vld [vmem:[#allocation18 + $0x8a0] ss:$16 sps:$4 sm:$0xff]  }
 0xa64   : > { %6252 = vmatprep.subr.bf16.mxu0 %v9667_v14  ;;  %v9742_v14 = vld [vmem:[#allocation18 + $0x884] ss:$16 sps:$4 sm:$0xff]  }
 0xa67   : > { %6253 = vmatpush2.bf16.msra.mxu0 %v9665_v18  ;;  %v9740_v18 = vld [vmem:[#allocation18 + $0x880] ss:$16 sps:$4 sm:$0xff]  }
 0xa68   : > { %6254 = vmatprep.subr.bf16.mxu0 %v9670_v21  ;;  %v9745_v21 = vld [vmem:[#allocation18 + $0x864] ss:$16 sps:$4 sm:$0xff]  }
 0xa6b   : > { %6255 = vmatpush2.bf16.msra.mxu0 %v9668_v40  ;;  %v9743_v40 = vld [vmem:[#allocation18 + $0x860] ss:$16 sps:$4 sm:$0xff]  }
 0xa6c   : > { %6256 = vmatprep.subr.bf16.mxu0 %v9673_v16  ;;  %v9748_v16 = vld [vmem:[#allocation18 + $0x844] ss:$16 sps:$4 sm:$0xff]  }
 0xa6f   : > { %6257 = vmatpush2.bf16.msra.mxu0 %v9671_v20  ;;  %v9746_v20 = vld [vmem:[#allocation18 + $0x840] ss:$16 sps:$4 sm:$0xff]  }
 0xa70   : > { %6258 = vmatprep.subr.bf16.mxu0 %v9676_v31  ;;  %v9751_v31 = vld [vmem:[#allocation18 + $0x824] ss:$16 sps:$4 sm:$0xff]  }
 0xa73   : > { %6259 = vmatpush2.bf16.msra.mxu0 %v9674_v41  ;;  %v9749_v41 = vld [vmem:[#allocation18 + $0x820] ss:$16 sps:$4 sm:$0xff]  }
 0xa74   : > { %6260 = vmatprep.subr.bf16.mxu0 %v9679_v47  ;;  %v9754_v47 = vld [vmem:[#allocation18 + $0x804] ss:$16 sps:$4 sm:$0xff]  }
 0xa77   : > { %6261 = vmatpush2.bf16.msra.mxu0 %v9677_v33  ;;  %v9752_v33 = vld [vmem:[#allocation18 + $0x800] ss:$16 sps:$4 sm:$0xff]  }
 0xa78   : > { %6262 = vmatprep.subr.bf16.mxu0 %v9682_v22  ;;  %v9757_v22 = vld [vmem:[#allocation18 + $0x9e4] ss:$16 sps:$4 sm:$0xff]  }
 0xa7b   : > { %6263 = vmatpush2.bf16.msra.mxu0 %v9680_v42  ;;  %v9755_v42 = vld [vmem:[#allocation18 + $0x9e0] ss:$16 sps:$4 sm:$0xff]  }
 0xa7c   : > { %6338 = vmatprep.subr.bf16.mxu0 %v9685_v52  ;;  %v9760_v52 = vld [vmem:[#allocation18 + $0x9c4] ss:$16 sps:$4 sm:$0xff]  }
 0xa7e   : > { %6265 = vmatmul.mubr.bf16.vlgmr.msra.gmra.mxu0 %v10823_v61 }
 0xa7f   : > { %6274 = vmatprep.mubr.bf16.mxu0 %v10847_v49  ;;  %6339 = vmatpush1.bf16.msra.mxu0 %v9683_v44  ;;  %v9758_v44 = vld [vmem:[#allocation18 + $0x9c0] ss:$16 sps:$4 sm:$0xff]  }
 0xa80   : > { %6340 = vmatprep.subr.bf16.mxu0 %v9688_v50  ;;  %v9763_v50 = vld [vmem:[#allocation18 + $0x9a4] ss:$16 sps:$4 sm:$0xff]  }
 0xa83   : > { %6341 = vmatpush1.bf16.msra.mxu0 %v9686_v43  ;;  %v9761_v43 = vld [vmem:[#allocation18 + $0x9a0] ss:$16 sps:$4 sm:$0xff]  }
 0xa84   : > { %6342 = vmatprep.subr.bf16.mxu0 %v9691_v34  ;;  %v9766_v34 = vld [vmem:[#allocation18 + $0x984] ss:$16 sps:$4 sm:$0xff]  }
 0xa86   : > { %6275 = vmatmul.mubr.bf16.gmra.mxu0 %v10843_v39 }
 0xa87   : > { %6343 = vmatpush1.bf16.msra.mxu0 %v9689_v45  ;;  %6370 = vmatprep.mubr.bf16.mxu0 %v10828_v9  ;;  %v9764_v45 = vld [vmem:[#allocation18 + $0x980] ss:$16 sps:$4 sm:$0xff]  }
 0xa88   : > { %6344 = vmatprep.subr.bf16.mxu0 %v9694_v53  ;;  %v9769_v53 = vld [vmem:[#allocation18 + $0x964] ss:$16 sps:$4 sm:$0xff]  }
 0xa8b   : > { %6345 = vmatpush1.bf16.msra.mxu0 %v9692_v55  ;;  %v9767_v55 = vld [vmem:[#allocation18 + $0x960] ss:$16 sps:$4 sm:$0xff]  }
 0xa8c   : > { %6346 = vmatprep.subr.bf16.mxu0 %v9697_v57  ;;  %v9772_v57 = vld [vmem:[#allocation18 + $0x944] ss:$16 sps:$4 sm:$0xff]  }
 0xa8f   : > { %6347 = vmatpush1.bf16.msra.mxu0 %v9695_v58 }
 0xa90   : > { %6348 = vmatprep.subr.bf16.mxu0 %v9700_v60  ;;  %v9770_v60 = vld [vmem:[#allocation18 + $0x940] ss:$16 sps:$4 sm:$0xff]  }
 0xa93   : > { %6349 = vmatpush1.bf16.msra.mxu0 %v9698_v51  ;;  %v9775_v51 = vld [vmem:[#allocation18 + $0x924] ss:$16 sps:$4 sm:$0xff]  }
 0xa94   : > { %6350 = vmatprep.subr.bf16.mxu0 %v9703_v23 }
 0xa97   : > { %6351 = vmatpush1.bf16.msra.mxu0 %v9701_v56  ;;  %v9773_v56 = vld [vmem:[#allocation18 + $0x920] ss:$16 sps:$4 sm:$0xff]  }
 0xa98   : > { %6352 = vmatprep.subr.bf16.mxu0 %v9706_v24  ;;  %v9778_v24 = vld [vmem:[#allocation18 + $0x904] ss:$16 sps:$4 sm:$0xff]  }
 0xa9b   : > { %6353 = vmatpush1.bf16.msra.mxu0 %v9704_v25 }
 0xa9c   : > { %6354 = vmatprep.subr.bf16.mxu0 %v9709_v62  ;;  %v9776_v62 = vld [vmem:[#allocation18 + $0x900] ss:$16 sps:$4 sm:$0xff]  }
 0xa9f   : > { %6355 = vmatpush2.bf16.msra.mxu0 %v9707_v63  ;;  %v9781_v63 = vld [vmem:[#allocation18 + $0x8ec] ss:$16 sps:$4 sm:$0xff]  }
 0xaa0   : > { %6356 = vmatprep.subr.bf16.mxu0 %v9712_v26  ;;  %v10893_v26 = vld [vmem:[#allocation19] sm:$0xf] }
 0xaa3   : > { %6357 = vmatpush2.bf16.msra.mxu0 %v9710_v0 }
 0xaa4   : > { %6358 = vmatprep.subr.bf16.mxu0 %v9715_v2  ;;  %v5393_v2 = vrot.slane %v10893_v26, %v2784_v48 }
 0xaa7   : > { %6359 = vmatpush2.bf16.msra.mxu0 %v9713_v5  ;;  %v9779_v5 = vld [vmem:[#allocation18 + $0x8e8] ss:$16 sps:$4 sm:$0xff]  }
 0xaa8   : > { %6360 = vmatprep.subr.bf16.mxu0 %v9718_v7  ;;  %v9784_v7 = vld [vmem:[#allocation18 + $0x8cc] ss:$16 sps:$4 sm:$0xff]  }
 0xaab   : > { %6361 = vmatpush2.bf16.msra.mxu0 %v9716_v4  ;;  %v5397_v4 = vrot.slane %v10893_v26, %v2788_v32  ;;  %v9790_v32 = vld [vmem:[#allocation18 + $0x88c] ss:$16 sps:$4 sm:$0xff]  }
 0xaac   : > { %6362 = vmatprep.subr.bf16.mxu0 %v9721_v8 }
 0xaaf   : > { %6363 = vmatpush2.bf16.msra.mxu0 %v9719_v35 }
 0xab0   : > { %6364 = vmatprep.subr.bf16.mxu0 %v9724_v11  ;;  %v9782_v11 = vld [vmem:[#allocation18 + $0x8c8] ss:$16 sps:$4 sm:$0xff]  }
 0xab3   : > { %6365 = vmatpush2.bf16.msra.mxu0 %v9722_v28 }
 0xab4   : > { %6366 = vmatprep.subr.bf16.mxu0 %v9727_v13  ;;  %v9787_v13 = vld [vmem:[#allocation18 + $0x8ac] ss:$16 sps:$4 sm:$0xff]  }
 0xab7   : > { %6367 = vmatpush2.bf16.msra.mxu0 %v9725_v29 }
 0xab8   : > { %6368 = vmatprep.subr.bf16.mxu0 %v9730_v15  ;;  %v9785_v15 = vld [vmem:[#allocation18 + $0x8a8] ss:$16 sps:$4 sm:$0xff]  }
 0xabb   : > { %6369 = vmatpush2.bf16.msra.mxu0 %v9728_v37 }
 0xabc   : > { %7331 = vmatprep.subr.bf16.mxu0 %v9733_v17 }
 0xabe   : > { %6371 = vmatmul.mubr.bf16.vlgmr.msra.gmra.mxu0 %v10823_v61  ;;  %v10887_v58 = vpop.f32.mrf.mxu0 }
 0xabf   : > { %6380 = vmatprep.mubr.bf16.mxu0 %v10847_v49  ;;  %7332 = vmatpush1.bf16.msra.mxu0 %v9731_v10  ;;  %v9788_v10 = vld [vmem:[#allocation18 + $0x888] ss:$16 sps:$4 sm:$0xff]  }
 0xac0   : > { %7333 = vmatprep.subr.bf16.mxu0 %v9736_v38  ;;  %v10889_v23 = vpop.f32.mrf.mxu0  ;;  %v9793_v38 = vld [vmem:[#allocation18 + $0x86c] ss:$16 sps:$4 sm:$0xff]  }
 0xac2   : > { %v10891_v25 = vpop.f32.mrf.mxu0 }
 0xac3   : > { %7334 = vmatpush1.bf16.msra.mxu0 %v9734_v12  ;;  %v9791_v12 = vld [vmem:[#allocation18 + $0x868] ss:$16 sps:$4 sm:$0xff]  }
 0xac4   : > { %7335 = vmatprep.subr.bf16.mxu0 %v9739_v19  ;;  %v10895_v0 = vpop.f32.mrf.mxu0  ;;  %v9796_v19 = vld [vmem:[#allocation18 + $0x84c] ss:$16 sps:$4 sm:$0xff]  }
 0xac6   : > { %6381 = vmatmul.mubr.bf16.gmra.mxu0 %v10843_v39 }
 0xac7   : > { %7336 = vmatpush1.bf16.msra.mxu0 %v9737_v30  ;;  %7363 = vmatprep.mubr.bf16.mxu0 %v10825_v27  ;;  %v9794_v30 = vld [vmem:[#allocation18 + $0x848] ss:$16 sps:$4 sm:$0xff]  }
 0xac8   : > { %7337 = vmatprep.subr.bf16.mxu0 %v9742_v14  ;;  %v9799_v14 = vld [vmem:[#allocation18 + $0x82c] ss:$16 sps:$4 sm:$0xff]  }
 0xacb   : > { %7338 = vmatpush1.bf16.msra.mxu0 %v9740_v18  ;;  %v9797_v18 = vld [vmem:[#allocation18 + $0x828] ss:$16 sps:$4 sm:$0xff]  }
 0xacc   : > { %7339 = vmatprep.subr.bf16.mxu0 %v9745_v21  ;;  %v9802_v21 = vld [vmem:[#allocation18 + $0x80c] ss:$16 sps:$4 sm:$0xff]  }
 0xacf   : > { %7340 = vmatpush1.bf16.msra.mxu0 %v9743_v40  ;;  %v9800_v40 = vld [vmem:[#allocation18 + $0x808] ss:$16 sps:$4 sm:$0xff]  }
 0xad0   : > { %7341 = vmatprep.subr.bf16.mxu0 %v9748_v16  ;;  %v9805_v16 = vld [vmem:[#allocation18 + $0x9ec] ss:$16 sps:$4 sm:$0xff]  }
 0xad3   : > { %7342 = vmatpush1.bf16.msra.mxu0 %v9746_v20  ;;  %v9808_v20 = vld [vmem:[#allocation18 + $0x9cc] ss:$16 sps:$4 sm:$0xff]  }
 0xad4   : > { %7343 = vmatprep.subr.bf16.mxu0 %v9751_v31  ;;  %v9806_v31 = vld [vmem:[#allocation18 + $0x9c8] ss:$16 sps:$4 sm:$0xff]  }
 0xad7   : > { %7344 = vmatpush1.bf16.msra.mxu0 %v9749_v41  ;;  %v9811_v41 = vld [vmem:[#allocation18 + $0x9ac] ss:$16 sps:$4 sm:$0xff]  }
 0xad8   : > { %7345 = vmatprep.subr.bf16.mxu0 %v9754_v47  ;;  %v9809_v47 = vld [vmem:[#allocation18 + $0x9a8] ss:$16 sps:$4 sm:$0xff]  }
 0xadb   : > { %7346 = vmatpush1.bf16.msra.mxu0 %v9752_v33  ;;  %v9814_v33 = vld [vmem:[#allocation18 + $0x98c] ss:$16 sps:$4 sm:$0xff]  }
 0xadc   : > { %7347 = vmatprep.subr.bf16.mxu0 %v9757_v22  ;;  %v9812_v22 = vld [vmem:[#allocation18 + $0x988] ss:$16 sps:$4 sm:$0xff]  }
 0xadf   : > { %7348 = vmatpush2.bf16.msra.mxu0 %v9755_v42  ;;  %v9817_v42 = vld [vmem:[#allocation18 + $0x96c] ss:$16 sps:$4 sm:$0xff]  }
 0xae0   : > { %7349 = vmatprep.subr.bf16.mxu0 %v9760_v52  ;;  %v9815_v52 = vld [vmem:[#allocation18 + $0x968] ss:$16 sps:$4 sm:$0xff]  }
 0xae3   : > { %7350 = vmatpush2.bf16.msra.mxu0 %v9758_v44  ;;  %v9820_v44 = vld [vmem:[#allocation18 + $0x94c] ss:$16 sps:$4 sm:$0xff]  }
 0xae4   : > { %7351 = vmatprep.subr.bf16.mxu0 %v9763_v50  ;;  %v9818_v50 = vld [vmem:[#allocation18 + $0x948] ss:$16 sps:$4 sm:$0xff]  }
 0xae7   : > { %7352 = vmatpush2.bf16.msra.mxu0 %v9761_v43  ;;  %v6213_v43 = vpop.f32.mrf.mxu1 }
 0xae8   : > { %7353 = vmatprep.subr.bf16.mxu0 %v9766_v34  ;;  %v9823_v34 = vld [vmem:[#allocation18 + $0x92c] ss:$16 sps:$4 sm:$0xff]  }
 0xaeb   : > { %7354 = vmatpush2.bf16.msra.mxu0 %v9764_v45  ;;  %v9821_v45 = vld [vmem:[#allocation18 + $0x928] ss:$16 sps:$4 sm:$0xff]  }
 0xaec   : > { %7355 = vmatprep.subr.bf16.mxu0 %v9769_v53  ;;  %v6215_v53 = vpop.f32.mrf.mxu1 }
 0xaef   : > { %7356 = vmatpush2.bf16.msra.mxu0 %v9767_v55  ;;  %v9826_v55 = vld [vmem:[#allocation18 + $0x90c] ss:$16 sps:$4 sm:$0xff]  }
 0xaf0   : > { %7357 = vmatprep.subr.bf16.mxu0 %v9772_v57  ;;  %v9824_v57 = vld [vmem:[#allocation18 + $0x908] ss:$16 sps:$4 sm:$0xff]  }
 0xaf3   : > { %7358 = vmatpush2.bf16.msra.mxu0 %v9770_v60  ;;  %v6217_v60 = vpop.f32.mrf.mxu1 }
 0xaf4   : > { %7359 = vmatprep.subr.bf16.mxu0 %v9775_v51 }
 0xaf5   : > { %v6219_v51 = vpop.f32.mrf.mxu1 }
 0xaf7   : > { %7360 = vmatpush2.bf16.msra.mxu0 %v9773_v56 }
 0xaf8   : > { %7361 = vmatprep.subr.bf16.mxu0 %v9778_v24  ;;  %v6223_v24 = vpop.f32.mrf.mxu1 }
 0xafb   : > { %7362 = vmatpush2.bf16.msra.mxu0 %v9776_v62 }
 0xafc   : > { %7437 = vmatprep.subr.bf16.mxu0 %v9781_v63 }
 0xafe   : > { %v5370_v8 = vpop.f32.mrf.mxu0  ;;  %7364 = vmatmul.mubr.bf16.vlgmr.msra.gmra.mxu0 %v10821_v59 }
 0xaff   : > { %v10904_v35 = vadd.f32 %v5393_v2, %v5370_v8  ;;  %7373 = vmatprep.mubr.bf16.mxu0 %v10845_v54  ;;  %7438 = vmatpush1.bf16.msra.mxu0 %v9779_v5 }
 0xb00   : > { %v5372_v28 = vpop.f32.mrf.mxu0  ;;  %7439 = vmatprep.subr.bf16.mxu0 %v9784_v7 }
 0xb01   : > { %v10907_v48 = vadd.f32 %v5397_v4, %v5372_v28 }
 0xb02   : > { %v5376_v29 = vpop.f32.mrf.mxu0 }
 0xb03   : > { %7440 = vmatpush1.bf16.msra.mxu0 %v9782_v11  ;;  %v10909_v1 = vadd.f32 %v5393_v2, %v5376_v29  ;;  %v6225_v2 = vpop.f32.mrf.mxu1 }
 0xb04   : > { %7441 = vmatprep.subr.bf16.mxu0 %v9787_v13  ;;  %v5378_v37 = vpop.f32.mrf.mxu0 }
 0xb05   : > { %v10911_v17 = vadd.f32 %v5397_v4, %v5378_v37  ;;  %v6227_v4 = vpop.f32.mrf.mxu1 }
 0xb06   : > { %7374 = vmatmul.mubr.bf16.gmra.mxu0 %v10841_v46 }
 0xb07   : > { %7442 = vmatpush1.bf16.msra.mxu0 %v9785_v15  ;;  %7469 = vmatprep.mubr.bf16.mxu0 %v10825_v27  ;;  %v9803_v27 = vld [vmem:[#allocation18 + $0x9e8] ss:$16 sps:$4 sm:$0xff]   ;;  %v6229_v28 = vpop.f32.mrf.mxu1 }
 0xb08   : > { %7443 = vmatprep.subr.bf16.mxu0 %v9790_v32 }
 0xb0b   : > { %7444 = vmatpush1.bf16.msra.mxu0 %v9788_v10 }
 0xb0c   : > { %7445 = vmatprep.subr.bf16.mxu0 %v9793_v38  ;;  %v6392_v38 = vld [vmem:[#allocation16 + $0x10] sm:$0xff] }
 0xb0f   : > { %7446 = vmatpush1.bf16.msra.mxu0 %v9791_v12  ;;  %v6393_v12 = vld [vmem:[#allocation16 + $0x18] sm:$0xff] }
 0xb10   : > { %7447 = vmatprep.subr.bf16.mxu0 %v9796_v19  ;;  %v6319_v19 = vpop.f32.mrf.mxu1 }
 0xb13   : > { %7448 = vmatpush1.bf16.msra.mxu0 %v9794_v30  ;;  %v6321_v30 = vpop.f32.mrf.mxu1 }
 0xb14   : > { %7449 = vmatprep.subr.bf16.mxu0 %v9799_v14 }
 0xb15   : > { %v6323_v14 = vpop.f32.mrf.mxu1 }
 0xb17   : > { %7450 = vmatpush1.bf16.msra.mxu0 %v9797_v18  ;;  %v6325_v18 = vpop.f32.mrf.mxu1 }
 0xb18   : > { %7451 = vmatprep.subr.bf16.mxu0 %v9802_v21 }
 0xb1b   : > { %7452 = vmatpush1.bf16.msra.mxu0 %v9800_v40  ;;  %v6329_v40 = vpop.f32.mrf.mxu1 }
 0xb1c   : > { %7453 = vmatprep.subr.bf16.mxu0 %v9805_v16 }
 0xb1f   : > { %7454 = vmatpush2.bf16.msra.mxu0 %v9803_v27 }
 0xb20   : > { %7455 = vmatprep.subr.bf16.mxu0 %v9808_v20  ;;  %v6331_v20 = vpop.f32.mrf.mxu1 }
 0xb23   : > { %7456 = vmatpush2.bf16.msra.mxu0 %v9806_v31 }
 0xb24   : > { %7457 = vmatprep.subr.bf16.mxu0 %v9811_v41 }
 0xb27   : > { %7458 = vmatpush2.bf16.msra.mxu0 %v9809_v47  ;;  %v6333_v47 = vpop.f32.mrf.mxu1 }
 0xb28   : > { %7459 = vmatprep.subr.bf16.mxu0 %v9814_v33 }
 0xb2b   : > { %7460 = vmatpush2.bf16.msra.mxu0 %v9812_v22 }
 0xb2c   : > { %7461 = vmatprep.subr.bf16.mxu0 %v9817_v42  ;;  %v6335_v42 = vpop.f32.mrf.mxu1 }
 0xb2f   : > { %7462 = vmatpush2.bf16.msra.mxu0 %v9815_v52 }
 0xb30   : > { %7463 = vmatprep.subr.bf16.mxu0 %v9820_v44 }
 0xb33   : > { %7464 = vmatpush2.bf16.msra.mxu0 %v9818_v50 }
 0xb34   : > { %7465 = vmatprep.subr.bf16.mxu0 %v9823_v34 }
 0xb37   : > { %7466 = vmatpush2.bf16.msra.mxu0 %v9821_v45 }
 0xb38   : > { %7467 = vmatprep.subr.bf16.mxu0 %v9826_v55 }
 0xb3b   : > { %7468 = vmatpush2.bf16.msra.mxu0 %v9824_v57  ;;  %v9829_v57 = vld [vmem:[#allocation18 + $0xae4] ss:$16 sps:$4 sm:$0xff]  }
 0xb3e   : > { %v6266_v56 = vpop.f32.mrf.mxu0  ;;  %7470 = vmatmul.mubr.bf16.vlgmr.msra.gmra.mxu0 %v10821_v59 }
 0xb3f   : > { %7479 = vmatprep.mubr.bf16.mxu0 %v10845_v54 }
 0xb40   : > { %v6268_v62 = vpop.f32.mrf.mxu0 }
 0xb41   : > { %v6269_v10 = vadd.f32 %v6268_v62, %v6215_v53  ;;  %v9835_v62 = vld [vmem:[#allocation18 + $0xaa4] ss:$16 sps:$4 sm:$0xff]  }
 0xb42   : > { %v6270_v63 = vpop.f32.mrf.mxu0 }
 0xb43   : > { %v6271_v37 = vadd.f32 %v6270_v63, %v6217_v60  ;;  %v9833_v63 = vld [vmem:[#allocation18 + $0xaa0] ss:$16 sps:$4 sm:$0xff]  }
 0xb44   : > { %v6272_v5 = vpop.f32.mrf.mxu0 }
 0xb45   : > { %v6273_v32 = vadd.f32 %v6272_v5, %v6219_v51  ;;  %v9827_v51 = vld [vmem:[#allocation18 + $0xae0] ss:$16 sps:$4 sm:$0xff]  }
 0xb46   : > { %v6276_v7 = vpop.f32.mrf.mxu0  ;;  %7480 = vmatmul.mubr.bf16.gmra.mxu0 %v10841_v46  ;;  %v6267_v46 = vadd.f32 %v6266_v56, %v6213_v43  ;;  %v9832_v56 = vld [vmem:[#allocation18 + $0xac4] ss:$16 sps:$4 sm:$0xff]   ;;  %v9836_v5 = vld [vmem:[#allocation18 + $0xa80] ss:$16 sps:$4 sm:$0xff]  }
 0xb47   : > { %7616 = vmatprep.mubr.f32.mxu0 %v10290_v36  ;;  %v6277_v54 = vadd.f32 %v6276_v7, %v6223_v24  ;;  %v9830_v24 = vld [vmem:[#allocation18 + $0xac0] ss:$16 sps:$4 sm:$0xff]   ;;  %v9841_v7 = vld [vmem:[#allocation18 + $0xa64] ss:$16 sps:$4 sm:$0xff]  }
 0xb48   : > { %v6278_v8 = vpop.f32.mrf.mxu0 }
 0xb49   : > { %v6279_v59 = vadd.f32 %v6278_v8, %v6225_v2  ;;  %v9838_v2 = vld [vmem:[#allocation18 + $0xa84] ss:$16 sps:$4 sm:$0xff]  }
 0xb4a   : > { %v6280_v11 = vpop.f32.mrf.mxu0  ;;  %v9844_v8 = vld [vmem:[#allocation18 + $0xa44] ss:$16 sps:$4 sm:$0xff]  }
 0xb4b   : > { %v6281_v15 = vadd.f32 %v6280_v11, %v6227_v4  ;;  %v9839_v4 = vld [vmem:[#allocation18 + $0xa60] ss:$16 sps:$4 sm:$0xff]  }
 0xb4c   : > { %v6282_v13 = vpop.f32.mrf.mxu0  ;;  %v9842_v11 = vld [vmem:[#allocation18 + $0xa40] ss:$16 sps:$4 sm:$0xff]  }
 0xb4d   : > { %v6283_v29 = vadd.f32 %v6282_v13, %v6229_v28  ;;  %v9847_v28 = vld [vmem:[#allocation18 + $0xa24] ss:$16 sps:$4 sm:$0xff]   ;;  %v9845_v13 = vld [vmem:[#allocation18 + $0xa20] ss:$16 sps:$4 sm:$0xff]  }
 0xb4f   : > { %6424 = vmatprep.subr.mxu1 %v6283_v29  ;;  %v9850_v29 = vld [vmem:[#allocation18 + $0xa04] ss:$16 sps:$4 sm:$0xff]  }
 0xb50   : > { %6425 = vmatpush1.msra.mxu1 %v6281_v15  ;;  %v9848_v15 = vld [vmem:[#allocation18 + $0xa00] ss:$16 sps:$4 sm:$0xff]  }
 0xb51   : > { %6426 = vmatprep.subr.mxu1 %v6279_v59  ;;  %v9853_v59 = vld [vmem:[#allocation18 + $0xbe4] ss:$16 sps:$4 sm:$0xff]  }
 0xb52   : > { %6427 = vmatpush1.msra.mxu1 %v6277_v54  ;;  %v9851_v54 = vld [vmem:[#allocation18 + $0xbe0] ss:$16 sps:$4 sm:$0xff]  }
 0xb53   : > { %6428 = vmatprep.subr.mxu1 %v6273_v32  ;;  %v9856_v32 = vld [vmem:[#allocation18 + $0xbc4] ss:$16 sps:$4 sm:$0xff]  }
 0xb54   : > { %6429 = vmatpush1.msra.mxu1 %v6271_v37  ;;  %v9854_v37 = vld [vmem:[#allocation18 + $0xbc0] ss:$16 sps:$4 sm:$0xff]  }
 0xb55   : > { %6430 = vmatprep.subr.mxu1 %v6269_v10  ;;  %v9859_v10 = vld [vmem:[#allocation18 + $0xba4] ss:$16 sps:$4 sm:$0xff]  }
 0xb56   : > { %6431 = vmatpush1.msra.mxu1 %v6267_v46  ;;  %v9857_v46 = vld [vmem:[#allocation18 + $0xba0] ss:$16 sps:$4 sm:$0xff]  }
 0xb57   : > { %8512 = vmatmul.mubr.msk.f32.vlgmr.msra.gmra.mxu1 %vm1427_vm1, %v6392_v38 }
 0xb58   : > { %6470 = vmatprep.mubr.f32.mxu1 %v10290_v36 }
 0xb5b   : > { %8513 = vmatmul.mubr.msk.f32.gmra.mxu1 %vm1427_vm1, %v6393_v12 }
 0xb5c   : > { %6541 = vmatprep.mubr.f32.mxu1 %v10290_v36 }
 0xb7e   : > { %v6372_v21 = vpop.f32.mrf.mxu0 }
 0xb7f   : > { %v6373_v60 = vadd.f32 %v6372_v21, %v6319_v19  ;;  %v9865_v19 = vld [vmem:[#allocation18 + $0xb64] ss:$16 sps:$4 sm:$0xff]  }
 0xb80   : > { %v6374_v16 = vpop.f32.mrf.mxu0  ;;  %v9871_v21 = vld [vmem:[#allocation18 + $0xb24] ss:$16 sps:$4 sm:$0xff]  }
 0xb81   : > { %v6375_v55 = vadd.f32 %v6374_v16, %v6321_v30  ;;  %v9863_v30 = vld [vmem:[#allocation18 + $0xb60] ss:$16 sps:$4 sm:$0xff]   ;;  %v9874_v16 = vld [vmem:[#allocation18 + $0xb04] ss:$16 sps:$4 sm:$0xff]  }
 0xb82   : > { %v6376_v27 = vpop.f32.mrf.mxu0 }
 0xb83   : > { %v6377_v53 = vadd.f32 %v6376_v27, %v6323_v14  ;;  %v9868_v14 = vld [vmem:[#allocation18 + $0xb44] ss:$16 sps:$4 sm:$0xff]   ;;  %v9872_v27 = vld [vmem:[#allocation18 + $0xb00] ss:$16 sps:$4 sm:$0xff]  }
 0xb84   : > { %v6378_v31 = vpop.f32.mrf.mxu0 }
 0xb85   : > { %v6379_v45 = vadd.f32 %v6378_v31, %v6325_v18  ;;  %v9866_v18 = vld [vmem:[#allocation18 + $0xb40] ss:$16 sps:$4 sm:$0xff]   ;;  %v9875_v31 = vld [vmem:[#allocation18 + $0xae8] ss:$16 sps:$4 sm:$0xff]  }
 0xb86   : > { %v6382_v41 = vpop.f32.mrf.mxu0 }
 0xb87   : > { %v6383_v34 = vadd.f32 %v6382_v41, %v6329_v40  ;;  %v9869_v40 = vld [vmem:[#allocation18 + $0xb20] ss:$16 sps:$4 sm:$0xff]   ;;  %v9880_v41 = vld [vmem:[#allocation18 + $0xacc] ss:$16 sps:$4 sm:$0xff]  }
 0xb88   : > { %v6384_v33 = vpop.f32.mrf.mxu0 }
 0xb89   : > { %v6385_v43 = vadd.f32 %v6384_v33, %v6331_v20  ;;  %v9877_v20 = vld [vmem:[#allocation18 + $0xaec] ss:$16 sps:$4 sm:$0xff]  }
 0xb8a   : > { %v6386_v22 = vpop.f32.mrf.mxu0  ;;  %v9883_v33 = vld [vmem:[#allocation18 + $0xaac] ss:$16 sps:$4 sm:$0xff]  }
 0xb8b   : > { %v6387_v50 = vadd.f32 %v6386_v22, %v6333_v47  ;;  %v9878_v47 = vld [vmem:[#allocation18 + $0xac8] ss:$16 sps:$4 sm:$0xff]  }
 0xb8c   : > { %v6388_v52 = vpop.f32.mrf.mxu0  ;;  %v9881_v22 = vld [vmem:[#allocation18 + $0xaa8] ss:$16 sps:$4 sm:$0xff]  }
 0xb8d   : > { %v6389_v44 = vadd.f32 %v6388_v52, %v6335_v42  ;;  %v9886_v42 = vld [vmem:[#allocation18 + $0xa8c] ss:$16 sps:$4 sm:$0xff]   ;;  %v9884_v52 = vld [vmem:[#allocation18 + $0xa88] ss:$16 sps:$4 sm:$0xff]  }
 0xb8f   : > { %6501 = vmatprep.subr.mxu1 %v6389_v44  ;;  %v9889_v44 = vld [vmem:[#allocation18 + $0xa6c] ss:$16 sps:$4 sm:$0xff]  }
 0xb90   : > { %6502 = vmatpush1.msra.mxu1 %v6387_v50  ;;  %v9887_v50 = vld [vmem:[#allocation18 + $0xa68] ss:$16 sps:$4 sm:$0xff]  }
 0xb91   : > { %6503 = vmatprep.subr.mxu1 %v6385_v43  ;;  %v9892_v43 = vld [vmem:[#allocation18 + $0xa4c] ss:$16 sps:$4 sm:$0xff]  }
 0xb92   : > { %6504 = vmatpush1.msra.mxu1 %v6383_v34  ;;  %v9890_v34 = vld [vmem:[#allocation18 + $0xa48] ss:$16 sps:$4 sm:$0xff]  }
 0xb93   : > { %6505 = vmatprep.subr.mxu1 %v6379_v45  ;;  %v9895_v45 = vld [vmem:[#allocation18 + $0xa2c] ss:$16 sps:$4 sm:$0xff]  }
 0xb94   : > { %6506 = vmatpush1.msra.mxu1 %v6377_v53  ;;  %v9893_v53 = vld [vmem:[#allocation18 + $0xa28] ss:$16 sps:$4 sm:$0xff]  }
 0xb95   : > { %6507 = vmatprep.subr.mxu1 %v6375_v55  ;;  %v9898_v55 = vld [vmem:[#allocation18 + $0xa0c] ss:$16 sps:$4 sm:$0xff]  }
 0xb96   : > { %6508 = vmatpush1.msra.mxu1 %v6373_v60  ;;  %v9901_v60 = vld [vmem:[#allocation18 + $0xbec] ss:$16 sps:$4 sm:$0xff]  }
 0xb97   : > { %8514 = vmatmul.mubr.msk.f32.vlgmr.msra.gmra.mxu1 %vm1427_vm1, %v6392_v38  ;;  %7384 = vmatprep.subr.bf16.mxu1 %v9829_v57  ;;  %v9862_v38 = vld [vmem:[#allocation18 + $0xb84] ss:$16 sps:$4 sm:$0xff]   ;;  %v9896_v57 = vld [vmem:[#allocation18 + $0xa08] ss:$16 sps:$4 sm:$0xff]  }
 0xb98   : > { %7385 = vmatpush1.bf16.msra.mxu1 %v9827_v51  ;;  %6547 = vmatprep.mubr.f32.mxu1 %v10290_v36  ;;  %v9904_v51 = vld [vmem:[#allocation18 + $0xbcc] ss:$16 sps:$4 sm:$0xff]  }
 0xb99   : > { %7386 = vmatprep.subr.bf16.mxu1 %v9832_v56  ;;  %v9902_v56 = vld [vmem:[#allocation18 + $0xbc8] ss:$16 sps:$4 sm:$0xff]  }
 0xb9b   : > { %8515 = vmatmul.mubr.msk.f32.gmra.mxu1 %vm1427_vm1, %v6393_v12  ;;  %v9860_v12 = vld [vmem:[#allocation18 + $0xb80] ss:$16 sps:$4 sm:$0xff]  }
 0xb9c   : > { %7387 = vmatpush1.bf16.msra.mxu1 %v9830_v24  ;;  %7416 = vmatprep.mubr.bf16.mxu1 %v10828_v9  ;;  %v9907_v24 = vld [vmem:[#allocation18 + $0xbac] ss:$16 sps:$4 sm:$0xff]  }
 0xb9d   : > { %7388 = vmatprep.subr.bf16.mxu1 %v9835_v62  ;;  %v9905_v62 = vld [vmem:[#allocation18 + $0xba8] ss:$16 sps:$4 sm:$0xff]  }
 0xba0   : > { %7389 = vmatpush1.bf16.msra.mxu1 %v9833_v63  ;;  %v9910_v63 = vld [vmem:[#allocation18 + $0xb8c] ss:$16 sps:$4 sm:$0xff]  }
 0xba1   : > { %7390 = vmatprep.subr.bf16.mxu1 %v9838_v2  ;;  %v9908_v2 = vld [vmem:[#allocation18 + $0xb88] ss:$16 sps:$4 sm:$0xff]  }
 0xba4   : > { %7391 = vmatpush1.bf16.msra.mxu1 %v9836_v5  ;;  %v9913_v5 = vld [vmem:[#allocation18 + $0xb6c] ss:$16 sps:$4 sm:$0xff]  }
 0xba5   : > { %7392 = vmatprep.subr.bf16.mxu1 %v9841_v7  ;;  %v9911_v7 = vld [vmem:[#allocation18 + $0xb68] ss:$16 sps:$4 sm:$0xff]  }
 0xba8   : > { %7393 = vmatpush1.bf16.msra.mxu1 %v9839_v4  ;;  %v9916_v4 = vld [vmem:[#allocation18 + $0xb4c] ss:$16 sps:$4 sm:$0xff]  }
 0xba9   : > { %7394 = vmatprep.subr.bf16.mxu1 %v9844_v8  ;;  %v9914_v8 = vld [vmem:[#allocation18 + $0xb48] ss:$16 sps:$4 sm:$0xff]  }
 0xbac   : > { %7395 = vmatpush1.bf16.msra.mxu1 %v9842_v11  ;;  %v9919_v11 = vld [vmem:[#allocation18 + $0xb2c] ss:$16 sps:$4 sm:$0xff]  }
 0xbad   : > { %7396 = vmatprep.subr.bf16.mxu1 %v9847_v28  ;;  %v9917_v28 = vld [vmem:[#allocation18 + $0xb28] ss:$16 sps:$4 sm:$0xff]  }
 0xbb0   : > { %7397 = vmatpush1.bf16.msra.mxu1 %v9845_v13  ;;  %v9922_v13 = vld [vmem:[#allocation18 + $0xb0c] ss:$16 sps:$4 sm:$0xff]  }
 0xbb1   : > { %7398 = vmatprep.subr.bf16.mxu1 %v9850_v29  ;;  %v9920_v29 = vld [vmem:[#allocation18 + $0xb08] ss:$16 sps:$4 sm:$0xff]  }
 0xbb4   : > { %7399 = vmatpush1.bf16.msra.mxu1 %v9848_v15  ;;  %v5385_v15 = vrot.slane %v10893_v26, %v10630_v3 }
 0xbb5   : > { %7400 = vmatprep.subr.bf16.mxu1 %v9853_v59  ;;  %v5389_v59 = vrot.slane %v10893_v26, %v10633_v6 }
 0xbb7   : > { %v5407_v6 = vadd.f32 %v5389_v59, %v10895_v0 }
 0xbb8   : > { %7401 = vmatpush2.bf16.msra.mxu1 %v9851_v54  ;;  %v5402_v54 = vadd.f32 %v5385_v15, %v10887_v58 }
 0xbb9   : > { %7402 = vmatprep.subr.bf16.mxu1 %v9856_v32 }
 0xbbc   : > { %7403 = vmatpush2.bf16.msra.mxu1 %v9854_v37  ;;  %v5403_v37 = vadd.f32 %v5389_v59, %v10889_v23 }
 0xbbd   : > { %7404 = vmatprep.subr.bf16.mxu1 %v9859_v10 }
 0xbc0   : > { %7405 = vmatpush2.bf16.msra.mxu1 %v9857_v46 }
 0xbc1   : > { %7406 = vmatprep.subr.bf16.mxu1 %v9862_v38  ;;  %v5406_v38 = vadd.f32 %v5385_v15, %v10891_v25 }
 0xbc4   : > { %7407 = vmatpush2.bf16.msra.mxu1 %v9860_v12 }
 0xbc5   : > { %7408 = vmatprep.subr.bf16.mxu1 %v9865_v19 }
 0xbc8   : > { %7409 = vmatpush2.bf16.msra.mxu1 %v9863_v30 }
 0xbc9   : > { %7410 = vmatprep.subr.bf16.mxu1 %v9868_v14 }
 0xbcc   : > { %7411 = vmatpush2.bf16.msra.mxu1 %v9866_v18 }
 0xbcd   : > { %7412 = vmatprep.subr.bf16.mxu1 %v9871_v21  ;;  %v7365_v21 = vpop.f32.mrf.mxu0 }
 0xbd0   : > { %7413 = vmatpush2.bf16.msra.mxu1 %v9869_v40 }
 0xbd1   : > { %7414 = vmatprep.subr.bf16.mxu1 %v9874_v16 }
 0xbd4   : > { %7415 = vmatpush2.bf16.msra.mxu1 %v9872_v27 }
 0xbd5   : > { %7490 = vmatprep.subr.bf16.mxu1 %v9877_v20 }
 0xbd7   : > { %7417 = vmatmul.mubr.bf16.vlgmr.msra.gmra.mxu1 %v10823_v61 }
 0xbd8   : > { %7426 = vmatprep.mubr.bf16.mxu1 %v10847_v49  ;;  %7491 = vmatpush1.bf16.msra.mxu1 %v9875_v31 }
 0xbd9   : > { %7492 = vmatprep.subr.bf16.mxu1 %v9880_v41 }
 0xbdc   : > { %7493 = vmatpush1.bf16.msra.mxu1 %v9878_v47 }
 0xbdd   : > { %7494 = vmatprep.subr.bf16.mxu1 %v9883_v33 }
 0xbdf   : > { %7427 = vmatmul.mubr.bf16.gmra.mxu1 %v10843_v39 }
 0xbe0   : > { %7495 = vmatpush1.bf16.msra.mxu1 %v9881_v22  ;;  %7522 = vmatprep.mubr.bf16.mxu1 %v10828_v9  ;;  %v9899_v9 = vld [vmem:[#allocation18 + $0xbe8] ss:$16 sps:$4 sm:$0xff]  }
 0xbe1   : > { %7496 = vmatprep.subr.bf16.mxu1 %v9886_v42 }
 0xbe4   : > { %7497 = vmatpush1.bf16.msra.mxu1 %v9884_v52 }
 0xbe5   : > { %7498 = vmatprep.subr.bf16.mxu1 %v9889_v44 }
 0xbe8   : > { %7499 = vmatpush1.bf16.msra.mxu1 %v9887_v50 }
 0xbe9   : > { %7500 = vmatprep.subr.bf16.mxu1 %v9892_v43 }
 0xbec   : > { %7501 = vmatpush1.bf16.msra.mxu1 %v9890_v34 }
 0xbed   : > { %7502 = vmatprep.subr.bf16.mxu1 %v9895_v45 }
 0xbf0   : > { %7503 = vmatpush1.bf16.msra.mxu1 %v9893_v53 }
 0xbf1   : > { %7504 = vmatprep.subr.bf16.mxu1 %v9898_v55 }
 0xbf4   : > { %7505 = vmatpush1.bf16.msra.mxu1 %v9896_v57  ;;  %v7544_v57 = vld [vmem:[#allocation16 + $0x20] sm:$0xff] }
 0xbf5   : > { %7506 = vmatprep.subr.bf16.mxu1 %v9901_v60  ;;  %v7545_v60 = vld [vmem:[#allocation16 + $0x28] sm:$0xff] }
 0xbf8   : > { %7507 = vmatpush2.bf16.msra.mxu1 %v9899_v9 }
 0xbf9   : > { %7508 = vmatprep.subr.bf16.mxu1 %v9904_v51 }
 0xbfc   : > { %7509 = vmatpush2.bf16.msra.mxu1 %v9902_v56 }
 0xbfd   : > { %7510 = vmatprep.subr.bf16.mxu1 %v9907_v24 }
 0xc00   : > { %7511 = vmatpush2.bf16.msra.mxu1 %v9905_v62 }
 0xc01   : > { %7512 = vmatprep.subr.bf16.mxu1 %v9910_v63 }
 0xc04   : > { %7513 = vmatpush2.bf16.msra.mxu1 %v9908_v2 }
 0xc05   : > { %7514 = vmatprep.subr.bf16.mxu1 %v9913_v5 }
 0xc08   : > { %7515 = vmatpush2.bf16.msra.mxu1 %v9911_v7 }
 0xc09   : > { %7516 = vmatprep.subr.bf16.mxu1 %v9916_v4 }
 0xc0c   : > { %7517 = vmatpush2.bf16.msra.mxu1 %v9914_v8 }
 0xc0d   : > { %7518 = vmatprep.subr.bf16.mxu1 %v9919_v11 }
 0xc10   : > { %7519 = vmatpush2.bf16.msra.mxu1 %v9917_v28 }
 0xc11   : > { %7520 = vmatprep.subr.bf16.mxu1 %v9922_v13 }
 0xc14   : > { %7521 = vmatpush2.bf16.msra.mxu1 %v9920_v29 }
 0xc17   : > { %v6466_v32 = vpop.f32.mrf.mxu1  ;;  %7523 = vmatmul.mubr.bf16.vlgmr.msra.gmra.mxu1 %v10823_v61 }
 0xc18   : > { %v10938_v10 = vadd.f32 %v6466_v32, %v5402_v54  ;;  %7532 = vmatprep.mubr.bf16.mxu1 %v10847_v49 }
 0xc19   : > { %v6468_v46 = vpop.f32.mrf.mxu1 }
 0xc1a   : > { %v10942_v12 = vadd.f32 %v6468_v46, %v5403_v37 }
 0xc1b   : > { %v6472_v3 = vpop.f32.mrf.mxu1 }
 0xc1c   : > { %v10945_v26 = vadd.f32 %v6472_v3, %v5406_v38 }
 0xc1d   : > { %v6474_v58 = vpop.f32.mrf.mxu1 }
 0xc1e   : > { %v10947_v19 = vadd.f32 %v6474_v58, %v5407_v6 }
 0xc1f   : > { %7533 = vmatmul.mubr.bf16.gmra.mxu1 %v10843_v39  ;;  %v7367_v39 = vpop.f32.mrf.mxu0 }
 0xc20   : > { %7699 = vmatprep.mubr.f32.mxu1 %v10290_v36 }
 0xc21   : > { %v7369_v40 = vpop.f32.mrf.mxu0 }
 0xc23   : > { %v7371_v16 = vpop.f32.mrf.mxu0 }
 0xc25   : > { %v7375_v20 = vpop.f32.mrf.mxu0 }
 0xc27   : > { %v7377_v41 = vpop.f32.mrf.mxu0 }
 0xc29   : > { %v7379_v33 = vpop.f32.mrf.mxu0 }
 0xc57   : > { %v6543_v61 = vpop.f32.mrf.mxu1 }
 0xc58   : > { %v10952_v49 = vadd.f32 %v6543_v61, %v10904_v35 }
 0xc59   : > { %v6545_v23 = vpop.f32.mrf.mxu1 }
 0xc5a   : > { %v10955_v25 = vadd.f32 %v6545_v23, %v10907_v48 }
 0xc5b   : > { %v6549_v30 = vpop.f32.mrf.mxu1 }
 0xc5c   : > { %v10958_v0 = vadd.f32 %v6549_v30, %v10909_v1  ;;  %v7381_v1 = vpop.f32.mrf.mxu0 }
 0xc5d   : > { %v6551_v14 = vpop.f32.mrf.mxu1 }
 0xc5e   : > { %v10961_v18 = vadd.f32 %v6551_v14, %v10911_v17  ;;  %v7471_v9 = vpop.f32.mrf.mxu0 }
 0xc60   : > { %v7473_v51 = vpop.f32.mrf.mxu0 }
 0xc62   : > { %v7475_v56 = vpop.f32.mrf.mxu0 }
 0xc64   : > { %v7477_v24 = vpop.f32.mrf.mxu0 }
 0xc66   : > { %v7481_v63 = vpop.f32.mrf.mxu0 }
 0xc68   : > { %v7483_v7 = vpop.f32.mrf.mxu0 }
 0xc6a   : > { %v7485_v11 = vpop.f32.mrf.mxu0 }
 0xc6c   : > { %v7487_v29 = vpop.f32.mrf.mxu0 }
 0xc97   : > { %v7418_v27 = vpop.f32.mrf.mxu1 }
 0xc98   : > { %v7419_v55 = vadd.f32 %v7418_v27, %v7365_v21 }
 0xc99   : > { %v7420_v35 = vpop.f32.mrf.mxu1 }
 0xc9a   : > { %v7421_v53 = vadd.f32 %v7420_v35, %v7367_v39 }
 0xc9b   : > { %v7422_v31 = vpop.f32.mrf.mxu1 }
 0xc9c   : > { %v7423_v45 = vadd.f32 %v7422_v31, %v7369_v40 }
 0xc9d   : > { %v7424_v47 = vpop.f32.mrf.mxu1 }
 0xc9e   : > { %v7425_v34 = vadd.f32 %v7424_v47, %v7371_v16 }
 0xc9f   : > { %v7428_v48 = vpop.f32.mrf.mxu1 }
 0xca0   : > { %v7429_v43 = vadd.f32 %v7428_v48, %v7375_v20 }
 0xca1   : > { %v7430_v22 = vpop.f32.mrf.mxu1 }
 0xca2   : > { %v7431_v17 = vadd.f32 %v7430_v22, %v7377_v41 }
 0xca3   : > { %v7432_v42 = vpop.f32.mrf.mxu1 }
 0xca4   : > { %v7433_v50 = vadd.f32 %v7432_v42, %v7379_v33 }
 0xca5   : > { %v7434_v52 = vpop.f32.mrf.mxu1 }
 0xca6   : > { %v7435_v44 = vadd.f32 %v7434_v52, %v7381_v1 }
 0xca8   : > { %7576 = vmatprep.subr.mxu0 %v7435_v44 }
 0xca9   : > { %7577 = vmatpush1.msra.mxu0 %v7433_v50 }
 0xcaa   : > { %7578 = vmatprep.subr.mxu0 %v7431_v17 }
 0xcab   : > { %7579 = vmatpush1.msra.mxu0 %v7429_v43 }
 0xcac   : > { %7580 = vmatprep.subr.mxu0 %v7425_v34 }
 0xcad   : > { %7581 = vmatpush1.msra.mxu0 %v7423_v45 }
 0xcae   : > { %7582 = vmatprep.subr.mxu0 %v7421_v53 }
 0xcaf   : > { %7583 = vmatpush1.msra.mxu0 %v7419_v55 }
 0xcb0   : > { %8644 = vmatmul.mubr.msk.f32.vlgmr.msra.gmra.mxu0 %vm1427_vm1, %v7544_v57 }
 0xcb1   : > { %7622 = vmatprep.mubr.f32.mxu0 %v10290_v36 }
 0xcb4   : > { %8645 = vmatmul.mubr.msk.f32.gmra.mxu0 %vm1427_vm1, %v7545_v60 }
 0xcb5   : > { %7693 = vmatprep.mubr.f32.mxu0 %v10290_v36 }
 0xcd7   : > { %v7524_v62 = vpop.f32.mrf.mxu1 }
 0xcd8   : > { %v7525_v3 = vadd.f32 %v7524_v62, %v7471_v9 }
 0xcd9   : > { %v7526_v2 = vpop.f32.mrf.mxu1 }
 0xcda   : > { %v7527_v38 = vadd.f32 %v7526_v2, %v7473_v51 }
 0xcdb   : > { %v7528_v5 = vpop.f32.mrf.mxu1 }
 0xcdc   : > { %v7529_v46 = vadd.f32 %v7528_v5, %v7475_v56 }
 0xcdd   : > { %v7530_v4 = vpop.f32.mrf.mxu1 }
 0xcde   : > { %v7531_v37 = vadd.f32 %v7530_v4, %v7477_v24 }
 0xcdf   : > { %v7534_v8 = vpop.f32.mrf.mxu1 }
 0xce0   : > { %v7535_v36 = vadd.f32 %v7534_v8, %v7481_v63 }
 0xce1   : > { %v7536_v28 = vpop.f32.mrf.mxu1 }
 0xce2   : > { %v7537_v32 = vadd.f32 %v7536_v28, %v7483_v7 }
 0xce3   : > { %v7538_v13 = vpop.f32.mrf.mxu1 }
 0xce4   : > { %v7539_v54 = vadd.f32 %v7538_v13, %v7485_v11 }
 0xce5   : > { %v7540_v15 = vpop.f32.mrf.mxu1 }
 0xce6   : > { %v7541_v59 = vadd.f32 %v7540_v15, %v7487_v29 }
 0xce8   : > { %7653 = vmatprep.subr.mxu0 %v7541_v59  ;;  %8826 = vmatprep.subr.mxu1 %v7541_v59 }
 0xce9   : > { %7654 = vmatpush1.msra.mxu0 %v7539_v54  ;;  %8830 = vmatpush1.msra.mxu1 %v7539_v54 }
 0xcea   : > { %7655 = vmatprep.subr.mxu0 %v7537_v32  ;;  %8827 = vmatprep.subr.mxu1 %v7537_v32 }
 0xceb   : > { %7656 = vmatpush1.msra.mxu0 %v7535_v36  ;;  %8831 = vmatpush1.msra.mxu1 %v7535_v36 }
 0xcec   : > { %7657 = vmatprep.subr.mxu0 %v7531_v37  ;;  %8828 = vmatprep.subr.mxu1 %v7531_v37 }
 0xced   : > { %7658 = vmatpush1.msra.mxu0 %v7529_v46  ;;  %8832 = vmatpush1.msra.mxu1 %v7529_v46 }
 0xcee   : > { %7659 = vmatprep.subr.mxu0 %v7527_v38  ;;  %8829 = vmatprep.subr.mxu1 %v7527_v38 }
 0xcef   : > { %7660 = vmatpush1.msra.mxu0 %v7525_v3  ;;  %8833 = vmatpush1.msra.mxu1 %v7525_v3 }
 0xcf0   : > { %8646 = vmatmul.mubr.msk.f32.vlgmr.msra.gmra.mxu0 %vm1427_vm1, %v7544_v57  ;;  %8647 = vmatmul.mubr.msk.f32.vlgmr.msra.gmra.mxu1 %vm1427_vm1, %v7545_v60 }
 0xd70   : > { %v7618_v6 = vpop.f32.mrf.mxu0 }
 0xd71   : > { %v7706_v58 = vadd.f32 %v7618_v6, %v10938_v10 }
 0xd72   : > { %v7620_v61 = vpop.f32.mrf.mxu0 }
 0xd73   : > { %v7714_v23 = vmax.f32 %v7706_v58, 0.0  ;;  %v7707_v30 = vadd.f32 %v7620_v61, %v10942_v12 }
 0xd74   : > { %v7624_v14 = vpop.f32.mrf.mxu0 }
 0xd75   : > { %7722 = vst [vmem:[%s607_s22] sm:$0xff] %v7714_v23  ;;  %v7715_v21 = vmax.f32 %v7707_v30, 0.0  ;;  %v7710_v39 = vadd.f32 %v7624_v14, %v10945_v26 }
 0xd76   : > { %v7626_v40 = vpop.f32.mrf.mxu0 }
 0xd77   : > { %7723 = vst [vmem:[%s607_s22 + $0x8] sm:$0xff] %v7715_v21  ;;  %v7718_v16 = vmax.f32 %v7710_v39, 0.0  ;;  %v7711_v27 = vadd.f32 %v7626_v40, %v10947_v19 }
 0xd79   : > { %7726 = vst [vmem:[%s607_s22 + $0x20] sm:$0xff] %v7718_v16  ;;  %v7719_v10 = vmax.f32 %v7711_v27, 0.0 }
 0xd7b   : > { %7727 = vst [vmem:[%s607_s22 + $0x28] sm:$0xff] %v7719_v10 }
 0xdb0   : > { %v7695_v20 = vpop.f32.mrf.mxu0  ;;  %v7701_v35 = vpop.f32.mrf.mxu1 }
 0xdb1   : > { %v7708_v31 = vadd.f32 %v7695_v20, %v10952_v49  ;;  %v7712_v41 = vadd.f32 %v7701_v35, %v10958_v0 }
 0xdb2   : > { %v7697_v12 = vpop.f32.mrf.mxu0  ;;  %v7703_v47 = vpop.f32.mrf.mxu1 }
 0xdb3   : > { %v7716_v48 = vmax.f32 %v7708_v31, 0.0  ;;  %v7720_v33 = vmax.f32 %v7712_v41, 0.0  ;;  %v7709_v26 = vadd.f32 %v7697_v12, %v10955_v25  ;;  %v7713_v22 = vadd.f32 %v7703_v47, %v10961_v18 }
 0xdb5   : > { %7724 = vst [vmem:[%s607_s22 + $0x10] sm:$0xff] %v7716_v48  ;;  %7728 = vst [vmem:[%s607_s22 + $0x30] sm:$0xff] %v7720_v33  ;;  %v7717_v19 = vmax.f32 %v7709_v26, 0.0  ;;  %v7721_v42 = vmax.f32 %v7713_v22, 0.0 }
 0xdb7   : > { %7725 = vst [vmem:[%s607_s22 + $0x18] sm:$0xff] %v7717_v19  ;;  %7729 = vst [vmem:[%s607_s22 + $0x38] sm:$0xff] %v7721_v42 }
 0xdb8 PF: > { %s30_s25 = sadd.s32 1, %s10269_s25  }
 0xdb9   : > { %p27_p6 = scmp.ge.s32.totalorder %s30_s25, 4  }
 0xdbb   :  { %29 = sbr.rel (!%p27_p6) target bundleno = 7 (0x7), region = 167 }
 0xdc0   :  { %7751 = vsyncpa [#allocation3], 1 }
 0xdc1   :  { %7753 = vsyncpa [#allocation3 + $0x1], 1 }
 0xdc2   :  { %7754 = vsyncpa [#allocation5], 1 }
 0xdc3   :  { %7755 = vsyncpa [#allocation8], 1 }
 0xdc4   :  { %7756 = vsyncpa [#allocation11], 1 }
 0xdc5   :  { %7757 = vsyncpa [#allocation14], 1 }
 0xdc6   :  { %7758 = vsyncpa [#allocation17], 1 }
 0xdc7   :  { %7759 = vsyncpa [#allocation20], 1 }

</bundles_post_ra>
